<compile_context>
chip_gen: v7x
topology: tpu7x:2x2x1
jax: 0.10.0
libtpu: 0.0.40
codegen_flags: <defaults>
</compile_context>

<pallas_src>
import functools

import jax
import jax.numpy as jnp
import numpy as np
from jax.experimental import pallas as pl
from jax.experimental.pallas import tpu as pltpu

LANE = 128
CONV_CFG = ((8, 4, 32), (4, 2, 64), (3, 1, 64))   # (kernel, stride, cout) per conv layer


def _round_up(x, m):
    return (x + m - 1) // m * m


def _choose_m_tile(m):
    """Row tiling for the conv GEMMs: single tile when small, 512-row tiles when big."""
    if m <= 512:
        mpad = _round_up(m, 64)
        return mpad, mpad
    tm = 512
    return _round_up(m, tm), tm


def _choose_b_tile(b):
    """Batch tiling for the fused conv3+heads call."""
    if b <= 256:
        bpad = _round_up(b, 8)
        return bpad, bpad
    tb = 256
    return _round_up(b, tb), tb


def _vmem_limit(block_bytes):
    """Scoped VMEM request ~= double-buffered blocks + headroom (v7x has 64 MiB)."""
    return int(min(32 * 1024 * 1024, max(8 * 1024 * 1024, 2 * block_bytes + (2 << 20))))


# -----------------------------------------------------------------------------
# Kernel 1: conv GEMM, full-K / full-N weight resident in VMEM, 1-D grid over M.
#   o = relu(x @ w + b)   (no accumulator scratch, no K loop)
# -----------------------------------------------------------------------------
def _gemm_bias_relu_kernel(x_ref, w_ref, b_ref, o_ref):
    y = jnp.dot(x_ref[...], w_ref[...], preferred_element_type=jnp.float32)
    y = jnp.maximum(y + b_ref[...], 0.0)
    o_ref[...] = y.astype(o_ref.dtype)


def pallas_conv_gemm(patches, w_pad, b_pad, *, n_valid, out_dtype=jnp.bfloat16):
    """patches: (M, K); w_pad: (K, Npad) bf16; b_pad: (1, Npad) f32 -> (M, n_valid)."""
    M, K = patches.shape
    Kw, Npad = w_pad.shape
    assert Kw == K and Npad % LANE == 0

    Mpad, tm = _choose_m_tile(M)
    x = jnp.pad(patches.astype(jnp.bfloat16), ((0, Mpad - M), (0, 0)))

    out_isz = jnp.dtype(out_dtype).itemsize
    block_bytes = tm * K * 2 + K * Npad * 2 + Npad * 4 + tm * Npad * out_isz
    cost = pl.CostEstimate(
        flops=2 * Mpad * Npad * K,
        transcendentals=0,
        bytes_accessed=(Mpad * K + K * Npad) * 2 + Npad * 4 + Mpad * Npad * out_isz)

    out = pl.pallas_call(
        _gemm_bias_relu_kernel,
        out_shape=jax.ShapeDtypeStruct((Mpad, Npad), out_dtype),
        grid=(Mpad // tm,),
        in_specs=[
            pl.BlockSpec((tm, K), lambda i: (i, 0)),
            pl.BlockSpec((K, Npad), lambda i: (0, 0)),    # full weight, VMEM resident
            pl.BlockSpec((1, Npad), lambda i: (0, 0)),
        ],
        out_specs=pl.BlockSpec((tm, Npad), lambda i: (i, 0)),
        compiler_params=pltpu.CompilerParams(
            dimension_semantics=("parallel",),
            vmem_limit_bytes=_vmem_limit(block_bytes)),
        cost_estimate=cost,
    )(x, w_pad, b_pad)
    return out[:M, :n_valid]


# -----------------------------------------------------------------------------
# Kernel 2: fused conv3 + policy/value heads.
#   For each of the P (=3x3) conv3 output positions p:
#       c3_p   = relu(patches3[p] @ W3 + b3)                 (Bt, 64)
#       hidden += c3_p @ W1_block[p]                          (64, 1024) block
#   hidden = relu(hidden + b1)   (kept in f32, never leaves VMEM)
#   out    = hidden @ W2 + b2    (block-diagonal policy|value, lane-dense 128 wide)
# All weights (~1.7 MB) are VMEM resident; the grid is 1-D over batch tiles.
# -----------------------------------------------------------------------------
def _conv3_heads_kernel(p3_ref, w3_ref, b3_ref, w1_ref, b1_ref, w2_ref, b2_ref, o_ref):
    n_pos = p3_ref.shape[0]
    bt = p3_ref.shape[1]
    w3 = w3_ref[...]
    b3 = b3_ref[...]
    h1 = jnp.zeros((bt, b1_ref.shape[-1]), jnp.float32) + b1_ref[...]
    for p in range(n_pos):
        c3 = jnp.dot(p3_ref[p], w3, preferred_element_type=jnp.float32)
        c3 = jnp.maximum(c3 + b3, 0.0).astype(jnp.bfloat16)
        h1 = h1 + jnp.dot(c3, w1_ref[p], preferred_element_type=jnp.float32)
    h1 = jnp.maximum(h1, 0.0)                       # hidden stays f32 (review item)
    out = jnp.dot(h1, w2_ref[...], preferred_element_type=jnp.float32) + b2_ref[...]
    o_ref[...] = out.astype(o_ref.dtype)


def pallas_conv3_heads(p3, w3, b3, w1b, b1, w2, b2):
    """p3: (P, B, K3) conv3 patches (position-leading).  Returns (B, Nout) f32."""
    P, B, K3 = p3.shape
    _, C3 = w3.shape
    H1 = b1.shape[-1]
    Nout = w2.shape[-1]

    Bpad, tb = _choose_b_tile(B)
    p3 = jnp.pad(p3.astype(jnp.bfloat16), ((0, 0), (0, Bpad - B), (0, 0)))

    block_bytes = (P * tb * K3 * 2 + K3 * C3 * 2 + C3 * 4 + P * C3 * H1 * 2
                   + H1 * 4 + H1 * Nout * 4 + Nout * 4 + tb * Nout * 4)
    cost = pl.CostEstimate(
        flops=2 * Bpad * (P * (K3 * C3 + C3 * H1) + H1 * Nout),
        transcendentals=0,
        bytes_accessed=(P * Bpad * K3 + K3 * C3 + P * C3 * H1) * 2
                       + (H1 * Nout + Bpad * Nout) * 4)

    out = pl.pallas_call(
        _conv3_heads_kernel,
        out_shape=jax.ShapeDtypeStruct((Bpad, Nout), jnp.float32),
        grid=(Bpad // tb,),
        in_specs=[
            pl.BlockSpec((P, tb, K3), lambda i: (0, i, 0)),
            pl.BlockSpec((K3, C3), lambda i: (0, 0)),
            pl.BlockSpec((1, C3), lambda i: (0, 0)),
            pl.BlockSpec((P, C3, H1), lambda i: (0, 0, 0)),
            pl.BlockSpec((1, H1), lambda i: (0, 0)),
            pl.BlockSpec((H1, Nout), lambda i: (0, 0)),
            pl.BlockSpec((1, Nout), lambda i: (0, 0)),
        ],
        out_specs=pl.BlockSpec((tb, Nout), lambda i: (i, 0)),
        compiler_params=pltpu.CompilerParams(
            dimension_semantics=("parallel",),
            vmem_limit_bytes=_vmem_limit(block_bytes)),
        cost_estimate=cost,
    )(p3, w3, b3, w1b, b1, w2, b2)
    return out[:B]


# -----------------------------------------------------------------------------
# im2col helpers (XLA layout plumbing outside the kernels).
# -----------------------------------------------------------------------------
def _im2col(x, k, s):
    """x: (B,H,W,C) -> (B*OH*OW, k*k*C); inner order (kh, kw, c)."""
    B, H, W, C = x.shape
    OH = (H - k) // s + 1
    OW = (W - k) // s + 1
    cols = [x[:, kh:kh + s * OH:s, kw:kw + s * OW:s, :]
            for kh in range(k) for kw in range(k)]
    p = jnp.concatenate(cols, axis=-1)              # (B, OH, OW, k*k*C)
    return p.reshape(B * OH * OW, k * k * C), (B, OH, OW)


def _im2col_positions_leading(x, k, s):
    """x: (B,H,W,C) -> (OH*OW, B, k*k*C); p = oh*OW + ow; inner order (kh, kw, c)."""
    B, H, W, C = x.shape
    OH = (H - k) // s + 1
    OW = (W - k) // s + 1
    blocks = [x[:, s * oh:s * oh + k, s * ow:s * ow + k, :].reshape(B, k * k * C)
              for oh in range(OH) for ow in range(OW)]
    return jnp.stack(blocks, axis=0)


# -----------------------------------------------------------------------------
# Parameters: deterministic synthetic params in PyTorch layout, plus a one-time
# re-layout into kernel form (transpose / concat / block-diag / lane-pad / bf16).
# -----------------------------------------------------------------------------
def init_params(obs_size, n_act, key):
    H, W, C = obs_size

    def conv_out(v, k, s):
        return (v - k) // s + 1

    oh = conv_out(conv_out(conv_out(H, 8, 4), 4, 2), 3, 1)
    ow = conv_out(conv_out(conv_out(W, 8, 4), 4, 2), 3, 1)
    conv_out_size = 64 * oh * ow

    ks = jax.random.split(key, 14)

    def u(k, shape, fan_in):
        bound = 1.0 / np.sqrt(fan_in)
        return jax.random.uniform(k, shape, jnp.float32, -bound, bound)

    params = {
        # conv weights in PyTorch layout (cout, cin, kh, kw)
        "w1": u(ks[0], (32, C, 8, 8), C * 64),   "b1": u(ks[1], (32,), C * 64),
        "w2": u(ks[2], (64, 32, 4, 4), 32 * 16), "b2": u(ks[3], (64,), 32 * 16),
        "w3": u(ks[4], (64, 64, 3, 3), 64 * 9),  "b3": u(ks[5], (64,), 64 * 9),
        # linear weights stored as (in, out)
        "pw1": u(ks[6], (conv_out_size, 512), conv_out_size),
        "pb1": u(ks[7], (512,), conv_out_size),
        "pw2": u(ks[8], (512, n_act), 512), "pb2": u(ks[9], (n_act,), 512),
        "vw1": u(ks[10], (conv_out_size, 512), conv_out_size),
        "vb1": u(ks[11], (512,), conv_out_size),
        "vw2": u(ks[12], (512, 1), 512), "vb2": u(ks[13], (1,), 512),
    }
    return params, conv_out_size


def prepare_pallas_params(params, obs_size, n_act):
    H, W, _ = obs_size

    def conv_out(v, k, s):
        return (v - k) // s + 1

    oh3 = conv_out(conv_out(conv_out(H, 8, 4), 4, 2), 3, 1)
    ow3 = conv_out(conv_out(conv_out(W, 8, 4), 4, 2), 3, 1)
    n_pos = oh3 * ow3
    c3 = CONV_CFG[-1][2]
    conv_out_size = c3 * n_pos
    assert params["pw1"].shape[0] == conv_out_size

    def conv_weight(w_pt, pad_n):
        cout, cin, kh, kw = w_pt.shape
        K = kh * kw * cin
        w_mat = jnp.transpose(w_pt, (2, 3, 1, 0)).reshape(K, cout)   # (kh,kw,cin) rows
        npad = _round_up(cout, LANE) if pad_n else cout
        return jnp.pad(w_mat, ((0, 0), (0, npad - cout))).astype(jnp.bfloat16), npad

    cw1, n1 = conv_weight(params["w1"], True)
    cw2, n2 = conv_weight(params["w2"], True)
    cw3, _ = conv_weight(params["w3"], False)         # stays inside the fused kernel
    cb1 = jnp.pad(params["b1"], (0, n1 - 32)).reshape(1, n1).astype(jnp.float32)
    cb2 = jnp.pad(params["b2"], (0, n2 - 64)).reshape(1, n2).astype(jnp.float32)
    cb3 = params["b3"].reshape(1, -1).astype(jnp.float32)

    # Heads layer 1: concat policy|value columns, then regroup rows (PyTorch NCHW
    # flatten index = c*n_pos + p) into per-spatial-position (c -> 1024) blocks.
    w1cat = jnp.concatenate([params["pw1"], params["vw1"]], axis=1)     # (conv_out, 1024)
    h1_width = w1cat.shape[1]
    hw1 = jnp.transpose(w1cat.reshape(c3, n_pos, h1_width), (1, 0, 2))  # (n_pos, 64, 1024)
    hb1 = jnp.concatenate([params["pb1"], params["vb1"]]).reshape(1, -1).astype(jnp.float32)

    # Heads layer 2: block-diagonal [policy | value | zero-pad] -> lane-dense, kept f32.
    hp = params["pw2"].shape[0]                                          # 512
    nout = _round_up(n_act + 1, LANE)
    hw2 = jnp.zeros((h1_width, nout), jnp.float32)
    hw2 = hw2.at[:hp, :n_act].set(params["pw2"])
    hw2 = hw2.at[hp:, n_act].set(params["vw2"][:, 0])
    hb2 = jnp.zeros((nout,), jnp.float32)
    hb2 = hb2.at[:n_act].set(params["pb2"])
    hb2 = hb2.at[n_act].set(params["vb2"][0])

    return {
        "cw1": cw1, "cb1": cb1,
        "cw2": cw2, "cb2": cb2,
        "cw3": cw3, "cb3": cb3,
        "hw1": hw1.astype(jnp.bfloat16), "hb1": hb1,
        "hw2": hw2, "hb2": hb2.reshape(1, nout),
    }


# -----------------------------------------------------------------------------
# Agent forward
# -----------------------------------------------------------------------------
def agent_forward(pp, x_nhwc, *, n_act):
    """x_nhwc: (B, H, W, C) f32 -> (policy_logits (B, n_act), value (B, 1))."""
    (k1, s1, c1), (k2, s2, c2), (k3, s3, _) = CONV_CFG
    h = x_nhwc.astype(jnp.bfloat16)

    p1, (B, OH, OW) = _im2col(h, k1, s1)
    h = pallas_conv_gemm(p1, pp["cw1"], pp["cb1"], n_valid=c1).reshape(B, OH, OW, c1)

    p2, (B, OH, OW) = _im2col(h, k2, s2)
    h = pallas_conv_gemm(p2, pp["cw2"], pp["cb2"], n_valid=c2).reshape(B, OH, OW, c2)

    # conv3 + both heads fused in one pallas_call (weights resident in VMEM).
    p3 = _im2col_positions_leading(h, k3, s3)
    out = pallas_conv3_heads(p3, pp["cw3"], pp["cb3"], pp["hw1"], pp["hb1"],
                             pp["hw2"], pp["hb2"])
    return out[:, :n_act], out[:, n_act:n_act + 1]


# -----------------------------------------------------------------------------
# Pure-JAX f32 reference implementing the original PyTorch forward exactly
# -----------------------------------------------------------------------------
def reference_forward(params, x_nhwc):
    def conv(x, w_pt, b, s):
        w_hwio = jnp.transpose(w_pt, (2, 3, 1, 0))
        y = jax.lax.conv_general_dilated(
            x, w_hwio, window_strides=(s, s), padding="VALID",
            dimension_numbers=("NHWC", "HWIO", "NHWC"))
        return jax.nn.relu(y + b)

    h = conv(x_nhwc, params["w1"], params["b1"], 4)
    h = conv(h, params["w2"], params["b2"], 2)
    h = conv(h, params["w3"], params["b3"], 1)
    B = h.shape[0]
    flat = jnp.transpose(h, (0, 3, 1, 2)).reshape(B, -1)   # PyTorch NCHW flatten
    policy = jax.nn.relu(flat @ params["pw1"] + params["pb1"]) @ params["pw2"] + params["pb2"]
    value = jax.nn.relu(flat @ params["vw1"] + params["vb1"]) @ params["vw2"] + params["vb2"]
    return policy, value


if __name__ == "__main__":
    # (H, W, C): 52x52 keeps shapes small while exercising a non-trivial flatten
    # (conv stack output is 3x3x64 -> conv_out_size = 576).
    obs_size = (52, 52, 4)
    n_act = 6
    batch = 2

    key = jax.random.PRNGKey(0)
    pkey, xkey = jax.random.split(key)
    params, conv_out_size = init_params(obs_size, n_act, pkey)
    pallas_params = prepare_pallas_params(params, obs_size, n_act)

    x = jax.random.normal(xkey, (batch,) + obs_size, dtype=jnp.float32)

    fwd = jax.jit(functools.partial(agent_forward, n_act=n_act))
    policy, value = fwd(pallas_params, x)
    jax.block_until_ready((policy, value))

    assert policy.shape == (batch, n_act), policy.shape
    assert value.shape == (batch, 1), value.shape

    # bf16 MXU inputs (f32 accumulation, f32 heads hidden) vs a pure-f32 reference.
    ref_p, ref_v = reference_forward(params, x)
    np.testing.assert_allclose(np.asarray(policy), np.asarray(ref_p),
                               rtol=5e-2, atol=5e-2)
    np.testing.assert_allclose(np.asarray(value), np.asarray(ref_v),
                               rtol=5e-2, atol=5e-2)

    print("KERNEL_OK")
</pallas_src>

<mosaic_0001>
module attributes {stable_mosaic.version = 11 : i64} {
  func.func @_gemm_bias_relu_kernel(%arg0: i32, %arg1: memref<320x256xbf16, #tpu.memory_space<vmem>>, %arg2: memref<256x128xbf16, #tpu.memory_space<vmem>>, %arg3: memref<1x128xf32, #tpu.memory_space<vmem>>, %arg4: memref<320x128xbf16, #tpu.memory_space<vmem>>) attributes {dimension_semantics = [#tpu.dimension_semantics<parallel>], iteration_bounds = array<i64: 1>, scalar_prefetch = 0 : i64, scratch_operands = 0 : i64, tpu.core_type = #tpu.core_type<tc>, window_params = [{transform_indices = @transform_0, window_bounds = array<i64: 320, 256>}, {pipeline_mode = #tpu.pipeline_mode<synchronous>, transform_indices = @transform_1, window_bounds = array<i64: 256, 128>}, {pipeline_mode = #tpu.pipeline_mode<synchronous>, transform_indices = @transform_2, window_bounds = array<i64: 1, 128>}, {transform_indices = @transform_3, window_bounds = array<i64: 320, 128>}]} {
    %c0 = arith.constant 0 : index
    %c0_0 = arith.constant 0 : index
    %0 = vector.load %arg1[%c0, %c0_0] : memref<320x256xbf16, #tpu.memory_space<vmem>>, vector<320x256xbf16>
    %c0_1 = arith.constant 0 : index
    %c0_2 = arith.constant 0 : index
    %1 = vector.load %arg2[%c0_1, %c0_2] : memref<256x128xbf16, #tpu.memory_space<vmem>>, vector<256x128xbf16>
    %cst = arith.constant dense<0.000000e+00> : vector<320x128xf32>
    %2 = tpu.matmul %0, %1, %cst {dimension_numbers = #tpu.dot_dimension_numbers<[1], [0], [0], [1], [0, 0, 1, 1], [], []>} : vector<320x256xbf16>, vector<256x128xbf16>, vector<320x128xf32> -> vector<320x128xf32>
    %c0_3 = arith.constant 0 : index
    %c0_4 = arith.constant 0 : index
    %3 = vector.load %arg3[%c0_3, %c0_4] : memref<1x128xf32, #tpu.memory_space<vmem>>, vector<1x128xf32>
    %4 = vector.broadcast %3 : vector<1x128xf32> to vector<320x128xf32>
    %5 = arith.addf %2, %4 : vector<320x128xf32>
    %cst_5 = arith.constant 0.000000e+00 : f32
    %6 = vector.broadcast %cst_5 : f32 to vector<320x128xf32>
    %7 = arith.maximumf %5, %6 : vector<320x128xf32>
    %8 = arith.truncf %7 : vector<320x128xf32> to vector<320x128xbf16>
    %c0_6 = arith.constant 0 : index
    %c0_7 = arith.constant 0 : index
    %9 = vector.load %arg4[%c0_6, %c0_7] : memref<320x128xbf16, #tpu.memory_space<vmem>>, vector<320x128xbf16>
    tpu.vector_store %arg4[%c0_6, %c0_7], %8 {strides = array<i32>} : memref<320x128xbf16, #tpu.memory_space<vmem>>, vector<320x128xbf16>,
    return
  }
  func.func @transform_0(%arg0: i32) -> (i32, i32) {
    %c0_i32 = arith.constant 0 : i32
    %c0_i32_0 = arith.constant 0 : i32
    return %arg0, %c0_i32 : i32, i32
  }
  func.func @transform_1(%arg0: i32) -> (i32, i32) {
    %c0_i32 = arith.constant 0 : i32
    %c0_i32_0 = arith.constant 0 : i32
    %c0_i32_1 = arith.constant 0 : i32
    return %c0_i32, %c0_i32_0 : i32, i32
  }
  func.func @transform_2(%arg0: i32) -> (i32, i32) {
    %c0_i32 = arith.constant 0 : i32
    %c0_i32_0 = arith.constant 0 : i32
    %c0_i32_1 = arith.constant 0 : i32
    return %c0_i32, %c0_i32_0 : i32, i32
  }
  func.func @transform_3(%arg0: i32) -> (i32, i32) {
    %c0_i32 = arith.constant 0 : i32
    %c0_i32_0 = arith.constant 0 : i32
    return %arg0, %c0_i32 : i32, i32
  }
}

module attributes {stable_mosaic.version = 11 : i64} {
  func.func @_gemm_bias_relu_kernel(%arg0: i32, %arg1: memref<64x512xbf16, #tpu.memory_space<vmem>>, %arg2: memref<512x128xbf16, #tpu.memory_space<vmem>>, %arg3: memref<1x128xf32, #tpu.memory_space<vmem>>, %arg4: memref<64x128xbf16, #tpu.memory_space<vmem>>) attributes {dimension_semantics = [#tpu.dimension_semantics<parallel>], iteration_bounds = array<i64: 1>, scalar_prefetch = 0 : i64, scratch_operands = 0 : i64, tpu.core_type = #tpu.core_type<tc>, window_params = [{transform_indices = @transform_0, window_bounds = array<i64: 64, 512>}, {pipeline_mode = #tpu.pipeline_mode<synchronous>, transform_indices = @transform_1, window_bounds = array<i64: 512, 128>}, {pipeline_mode = #tpu.pipeline_mode<synchronous>, transform_indices = @transform_2, window_bounds = array<i64: 1, 128>}, {transform_indices = @transform_3, window_bounds = array<i64: 64, 128>}]} {
    %c0 = arith.constant 0 : index
    %c0_0 = arith.constant 0 : index
    %0 = vector.load %arg1[%c0, %c0_0] : memref<64x512xbf16, #tpu.memory_space<vmem>>, vector<64x512xbf16>
    %c0_1 = arith.constant 0 : index
    %c0_2 = arith.constant 0 : index
    %1 = vector.load %arg2[%c0_1, %c0_2] : memref<512x128xbf16, #tpu.memory_space<vmem>>, vector<512x128xbf16>
    %cst = arith.constant dense<0.000000e+00> : vector<64x128xf32>
    %2 = tpu.matmul %0, %1, %cst {dimension_numbers = #tpu.dot_dimension_numbers<[1], [0], [0], [1], [0, 0, 1, 1], [], []>} : vector<64x512xbf16>, vector<512x128xbf16>, vector<64x128xf32> -> vector<64x128xf32>
    %c0_3 = arith.constant 0 : index
    %c0_4 = arith.constant 0 : index
    %3 = vector.load %arg3[%c0_3, %c0_4] : memref<1x128xf32, #tpu.memory_space<vmem>>, vector<1x128xf32>
    %4 = vector.broadcast %3 : vector<1x128xf32> to vector<64x128xf32>
    %5 = arith.addf %2, %4 : vector<64x128xf32>
    %cst_5 = arith.constant 0.000000e+00 : f32
    %6 = vector.broadcast %cst_5 : f32 to vector<64x128xf32>
    %7 = arith.maximumf %5, %6 : vector<64x128xf32>
    %8 = arith.truncf %7 : vector<64x128xf32> to vector<64x128xbf16>
    %c0_6 = arith.constant 0 : index
    %c0_7 = arith.constant 0 : index
    %9 = vector.load %arg4[%c0_6, %c0_7] : memref<64x128xbf16, #tpu.memory_space<vmem>>, vector<64x128xbf16>
    tpu.vector_store %arg4[%c0_6, %c0_7], %8 {strides = array<i32>} : memref<64x128xbf16, #tpu.memory_space<vmem>>, vector<64x128xbf16>,
    return
  }
  func.func @transform_0(%arg0: i32) -> (i32, i32) {
    %c0_i32 = arith.constant 0 : i32
    %c0_i32_0 = arith.constant 0 : i32
    return %arg0, %c0_i32 : i32, i32
  }
  func.func @transform_1(%arg0: i32) -> (i32, i32) {
    %c0_i32 = arith.constant 0 : i32
    %c0_i32_0 = arith.constant 0 : i32
    %c0_i32_1 = arith.constant 0 : i32
    return %c0_i32, %c0_i32_0 : i32, i32
  }
  func.func @transform_2(%arg0: i32) -> (i32, i32) {
    %c0_i32 = arith.constant 0 : i32
    %c0_i32_0 = arith.constant 0 : i32
    %c0_i32_1 = arith.constant 0 : i32
    return %c0_i32, %c0_i32_0 : i32, i32
  }
  func.func @transform_3(%arg0: i32) -> (i32, i32) {
    %c0_i32 = arith.constant 0 : i32
    %c0_i32_0 = arith.constant 0 : i32
    return %arg0, %c0_i32 : i32, i32
  }
}

module attributes {stable_mosaic.version = 11 : i64} {
  func.func @_conv3_heads_kernel(%arg0: i32, %arg1: memref<9x8x576xbf16, #tpu.memory_space<vmem>>, %arg2: memref<576x64xbf16, #tpu.memory_space<vmem>>, %arg3: memref<1x64xf32, #tpu.memory_space<vmem>>, %arg4: memref<9x64x1024xbf16, #tpu.memory_space<vmem>>, %arg5: memref<1x1024xf32, #tpu.memory_space<vmem>>, %arg6: memref<1024x128xf32, #tpu.memory_space<vmem>>, %arg7: memref<1x128xf32, #tpu.memory_space<vmem>>, %arg8: memref<8x128xf32, #tpu.memory_space<vmem>>) attributes {dimension_semantics = [#tpu.dimension_semantics<parallel>], iteration_bounds = array<i64: 1>, scalar_prefetch = 0 : i64, scratch_operands = 0 : i64, tpu.core_type = #tpu.core_type<tc>, window_params = [{transform_indices = @transform_0, window_bounds = array<i64: 9, 8, 576>}, {pipeline_mode = #tpu.pipeline_mode<synchronous>, transform_indices = @transform_1, window_bounds = array<i64: 576, 64>}, {pipeline_mode = #tpu.pipeline_mode<synchronous>, transform_indices = @transform_2, window_bounds = array<i64: 1, 64>}, {pipeline_mode = #tpu.pipeline_mode<synchronous>, transform_indices = @transform_3, window_bounds = array<i64: 9, 64, 1024>}, {pipeline_mode = #tpu.pipeline_mode<synchronous>, transform_indices = @transform_4, window_bounds = array<i64: 1, 1024>}, {pipeline_mode = #tpu.pipeline_mode<synchronous>, transform_indices = @transform_5, window_bounds = array<i64: 1024, 128>}, {pipeline_mode = #tpu.pipeline_mode<synchronous>, transform_indices = @transform_6, window_bounds = array<i64: 1, 128>}, {transform_indices = @transform_7, window_bounds = array<i64: 8, 128>}]} {
    %c0 = arith.constant 0 : index
    %c0_0 = arith.constant 0 : index
    %0 = vector.load %arg2[%c0, %c0_0] : memref<576x64xbf16, #tpu.memory_space<vmem>>, vector<576x64xbf16>
    %c0_1 = arith.constant 0 : index
    %c0_2 = arith.constant 0 : index
    %1 = vector.load %arg3[%c0_1, %c0_2] : memref<1x64xf32, #tpu.memory_space<vmem>>, vector<1x64xf32>
    %cst = arith.constant 0.000000e+00 : f32
    %2 = vector.broadcast %cst : f32 to vector<8x1024xf32>
    %c0_3 = arith.constant 0 : index
    %c0_4 = arith.constant 0 : index
    %3 = vector.load %arg5[%c0_3, %c0_4] : memref<1x1024xf32, #tpu.memory_space<vmem>>, vector<1x1024xf32>
    %4 = vector.broadcast %3 : vector<1x1024xf32> to vector<8x1024xf32>
    %5 = arith.addf %2, %4 : vector<8x1024xf32>
    %c0_5 = arith.constant 0 : index
    %c0_6 = arith.constant 0 : index
    %c0_7 = arith.constant 0 : index
    %6 = vector.load %arg1[%c0_5, %c0_6, %c0_7] : memref<9x8x576xbf16, #tpu.memory_space<vmem>>, vector<1x8x576xbf16>
    %7 = vector.shape_cast %6 : vector<1x8x576xbf16> to vector<8x576xbf16>
    %cst_8 = arith.constant dense<0.000000e+00> : vector<8x64xf32>
    %8 = tpu.matmul %7, %0, %cst_8 {dimension_numbers = #tpu.dot_dimension_numbers<[1], [0], [0], [1], [0, 0, 1, 1], [], []>} : vector<8x576xbf16>, vector<576x64xbf16>, vector<8x64xf32> -> vector<8x64xf32>
    %9 = vector.broadcast %1 : vector<1x64xf32> to vector<8x64xf32>
    %10 = arith.addf %8, %9 : vector<8x64xf32>
    %cst_9 = arith.constant 0.000000e+00 : f32
    %11 = vector.broadcast %cst_9 : f32 to vector<8x64xf32>
    %12 = arith.maximumf %10, %11 : vector<8x64xf32>
    %13 = arith.truncf %12 : vector<8x64xf32> to vector<8x64xbf16>
    %c0_10 = arith.constant 0 : index
    %c0_11 = arith.constant 0 : index
    %c0_12 = arith.constant 0 : index
    %14 = vector.load %arg4[%c0_10, %c0_11, %c0_12] : memref<9x64x1024xbf16, #tpu.memory_space<vmem>>, vector<1x64x1024xbf16>
    %15 = vector.shape_cast %14 : vector<1x64x1024xbf16> to vector<64x1024xbf16>
    %cst_13 = arith.constant dense<0.000000e+00> : vector<8x1024xf32>
    %16 = tpu.matmul %13, %15, %cst_13 {dimension_numbers = #tpu.dot_dimension_numbers<[1], [0], [0], [1], [0, 0, 1, 1], [], []>} : vector<8x64xbf16>, vector<64x1024xbf16>, vector<8x1024xf32> -> vector<8x1024xf32>
    %17 = arith.addf %5, %16 : vector<8x1024xf32>
    %c1 = arith.constant 1 : index
    %c0_14 = arith.constant 0 : index
    %c0_15 = arith.constant 0 : index
    %18 = vector.load %arg1[%c1, %c0_14, %c0_15] : memref<9x8x576xbf16, #tpu.memory_space<vmem>>, vector<1x8x576xbf16>
    %19 = vector.shape_cast %18 : vector<1x8x576xbf16> to vector<8x576xbf16>
    %cst_16 = arith.constant dense<0.000000e+00> : vector<8x64xf32>
    %20 = tpu.matmul %19, %0, %cst_16 {dimension_numbers = #tpu.dot_dimension_numbers<[1], [0], [0], [1], [0, 0, 1, 1], [], []>} : vector<8x576xbf16>, vector<576x64xbf16>, vector<8x64xf32> -> vector<8x64xf32>
    %21 = vector.broadcast %1 : vector<1x64xf32> to vector<8x64xf32>
    %22 = arith.addf %20, %21 : vector<8x64xf32>
    %cst_17 = arith.constant 0.000000e+00 : f32
    %23 = vector.broadcast %cst_17 : f32 to vector<8x64xf32>
    %24 = arith.maximumf %22, %23 : vector<8x64xf32>
    %25 = arith.truncf %24 : vector<8x64xf32> to vector<8x64xbf16>
    %c1_18 = arith.constant 1 : index
    %c0_19 = arith.constant 0 : index
    %c0_20 = arith.constant 0 : index
    %26 = vector.load %arg4[%c1_18, %c0_19, %c0_20] : memref<9x64x1024xbf16, #tpu.memory_space<vmem>>, vector<1x64x1024xbf16>
    %27 = vector.shape_cast %26 : vector<1x64x1024xbf16> to vector<64x1024xbf16>
    %cst_21 = arith.constant dense<0.000000e+00> : vector<8x1024xf32>
    %28 = tpu.matmul %25, %27, %cst_21 {dimension_numbers = #tpu.dot_dimension_numbers<[1], [0], [0], [1], [0, 0, 1, 1], [], []>} : vector<8x64xbf16>, vector<64x1024xbf16>, vector<8x1024xf32> -> vector<8x1024xf32>
    %29 = arith.addf %17, %28 : vector<8x1024xf32>
    %c2 = arith.constant 2 : index
    %c0_22 = arith.constant 0 : index
    %c0_23 = arith.constant 0 : index
    %30 = vector.load %arg1[%c2, %c0_22, %c0_23] : memref<9x8x576xbf16, #tpu.memory_space<vmem>>, vector<1x8x576xbf16>
    %31 = vector.shape_cast %30 : vector<1x8x576xbf16> to vector<8x576xbf16>
    %cst_24 = arith.constant dense<0.000000e+00> : vector<8x64xf32>
    %32 = tpu.matmul %31, %0, %cst_24 {dimension_numbers = #tpu.dot_dimension_numbers<[1], [0], [0], [1], [0, 0, 1, 1], [], []>} : vector<8x576xbf16>, vector<576x64xbf16>, vector<8x64xf32> -> vector<8x64xf32>
    %33 = vector.broadcast %1 : vector<1x64xf32> to vector<8x64xf32>
    %34 = arith.addf %32, %33 : vector<8x64xf32>
    %cst_25 = arith.constant 0.000000e+00 : f32
    %35 = vector.broadcast %cst_25 : f32 to vector<8x64xf32>
    %36 = arith.maximumf %34, %35 : vector<8x64xf32>
    %37 = arith.truncf %36 : vector<8x64xf32> to vector<8x64xbf16>
    %c2_26 = arith.constant 2 : index
    %c0_27 = arith.constant 0 : index
    %c0_28 = arith.constant 0 : index
    %38 = vector.load %arg4[%c2_26, %c0_27, %c0_28] : memref<9x64x1024xbf16, #tpu.memory_space<vmem>>, vector<1x64x1024xbf16>
    %39 = vector.shape_cast %38 : vector<1x64x1024xbf16> to vector<64x1024xbf16>
    %cst_29 = arith.constant dense<0.000000e+00> : vector<8x1024xf32>
    %40 = tpu.matmul %37, %39, %cst_29 {dimension_numbers = #tpu.dot_dimension_numbers<[1], [0], [0], [1], [0, 0, 1, 1], [], []>} : vector<8x64xbf16>, vector<64x1024xbf16>, vector<8x1024xf32> -> vector<8x1024xf32>
    %41 = arith.addf %29, %40 : vector<8x1024xf32>
    %c3 = arith.constant 3 : index
    %c0_30 = arith.constant 0 : index
    %c0_31 = arith.constant 0 : index
    %42 = vector.load %arg1[%c3, %c0_30, %c0_31] : memref<9x8x576xbf16, #tpu.memory_space<vmem>>, vector<1x8x576xbf16>
    %43 = vector.shape_cast %42 : vector<1x8x576xbf16> to vector<8x576xbf16>
    %cst_32 = arith.constant dense<0.000000e+00> : vector<8x64xf32>
    %44 = tpu.matmul %43, %0, %cst_32 {dimension_numbers = #tpu.dot_dimension_numbers<[1], [0], [0], [1], [0, 0, 1, 1], [], []>} : vector<8x576xbf16>, vector<576x64xbf16>, vector<8x64xf32> -> vector<8x64xf32>
    %45 = vector.broadcast %1 : vector<1x64xf32> to vector<8x64xf32>
    %46 = arith.addf %44, %45 : vector<8x64xf32>
    %cst_33 = arith.constant 0.000000e+00 : f32
    %47 = vector.broadcast %cst_33 : f32 to vector<8x64xf32>
    %48 = arith.maximumf %46, %47 : vector<8x64xf32>
    %49 = arith.truncf %48 : vector<8x64xf32> to vector<8x64xbf16>
    %c3_34 = arith.constant 3 : index
    %c0_35 = arith.constant 0 : index
    %c0_36 = arith.constant 0 : index
    %50 = vector.load %arg4[%c3_34, %c0_35, %c0_36] : memref<9x64x1024xbf16, #tpu.memory_space<vmem>>, vector<1x64x1024xbf16>
    %51 = vector.shape_cast %50 : vector<1x64x1024xbf16> to vector<64x1024xbf16>
    %cst_37 = arith.constant dense<0.000000e+00> : vector<8x1024xf32>
    %52 = tpu.matmul %49, %51, %cst_37 {dimension_numbers = #tpu.dot_dimension_numbers<[1], [0], [0], [1], [0, 0, 1, 1], [], []>} : vector<8x64xbf16>, vector<64x1024xbf16>, vector<8x1024xf32> -> vector<8x1024xf32>
    %53 = arith.addf %41, %52 : vector<8x1024xf32>
    %c4 = arith.constant 4 : index
    %c0_38 = arith.constant 0 : index
    %c0_39 = arith.constant 0 : index
    %54 = vector.load %arg1[%c4, %c0_38, %c0_39] : memref<9x8x576xbf16, #tpu.memory_space<vmem>>, vector<1x8x576xbf16>
    %55 = vector.shape_cast %54 : vector<1x8x576xbf16> to vector<8x576xbf16>
    %cst_40 = arith.constant dense<0.000000e+00> : vector<8x64xf32>
    %56 = tpu.matmul %55, %0, %cst_40 {dimension_numbers = #tpu.dot_dimension_numbers<[1], [0], [0], [1], [0, 0, 1, 1], [], []>} : vector<8x576xbf16>, vector<576x64xbf16>, vector<8x64xf32> -> vector<8x64xf32>
    %57 = vector.broadcast %1 : vector<1x64xf32> to vector<8x64xf32>
    %58 = arith.addf %56, %57 : vector<8x64xf32>
    %cst_41 = arith.constant 0.000000e+00 : f32
    %59 = vector.broadcast %cst_41 : f32 to vector<8x64xf32>
    %60 = arith.maximumf %58, %59 : vector<8x64xf32>
    %61 = arith.truncf %60 : vector<8x64xf32> to vector<8x64xbf16>
    %c4_42 = arith.constant 4 : index
    %c0_43 = arith.constant 0 : index
    %c0_44 = arith.constant 0 : index
    %62 = vector.load %arg4[%c4_42, %c0_43, %c0_44] : memref<9x64x1024xbf16, #tpu.memory_space<vmem>>, vector<1x64x1024xbf16>
    %63 = vector.shape_cast %62 : vector<1x64x1024xbf16> to vector<64x1024xbf16>
    %cst_45 = arith.constant dense<0.000000e+00> : vector<8x1024xf32>
    %64 = tpu.matmul %61, %63, %cst_45 {dimension_numbers = #tpu.dot_dimension_numbers<[1], [0], [0], [1], [0, 0, 1, 1], [], []>} : vector<8x64xbf16>, vector<64x1024xbf16>, vector<8x1024xf32> -> vector<8x1024xf32>
    %65 = arith.addf %53, %64 : vector<8x1024xf32>
    %c5 = arith.constant 5 : index
    %c0_46 = arith.constant 0 : index
    %c0_47 = arith.constant 0 : index
    %66 = vector.load %arg1[%c5, %c0_46, %c0_47] : memref<9x8x576xbf16, #tpu.memory_space<vmem>>, vector<1x8x576xbf16>
    %67 = vector.shape_cast %66 : vector<1x8x576xbf16> to vector<8x576xbf16>
    %cst_48 = arith.constant dense<0.000000e+00> : vector<8x64xf32>
    %68 = tpu.matmul %67, %0, %cst_48 {dimension_numbers = #tpu.dot_dimension_numbers<[1], [0], [0], [1], [0, 0, 1, 1], [], []>} : vector<8x576xbf16>, vector<576x64xbf16>, vector<8x64xf32> -> vector<8x64xf32>
    %69 = vector.broadcast %1 : vector<1x64xf32> to vector<8x64xf32>
    %70 = arith.addf %68, %69 : vector<8x64xf32>
    %cst_49 = arith.constant 0.000000e+00 : f32
    %71 = vector.broadcast %cst_49 : f32 to vector<8x64xf32>
    %72 = arith.maximumf %70, %71 : vector<8x64xf32>
    %73 = arith.truncf %72 : vector<8x64xf32> to vector<8x64xbf16>
    %c5_50 = arith.constant 5 : index
    %c0_51 = arith.constant 0 : index
    %c0_52 = arith.constant 0 : index
    %74 = vector.load %arg4[%c5_50, %c0_51, %c0_52] : memref<9x64x1024xbf16, #tpu.memory_space<vmem>>, vector<1x64x1024xbf16>
    %75 = vector.shape_cast %74 : vector<1x64x1024xbf16> to vector<64x1024xbf16>
    %cst_53 = arith.constant dense<0.000000e+00> : vector<8x1024xf32>
    %76 = tpu.matmul %73, %75, %cst_53 {dimension_numbers = #tpu.dot_dimension_numbers<[1], [0], [0], [1], [0, 0, 1, 1], [], []>} : vector<8x64xbf16>, vector<64x1024xbf16>, vector<8x1024xf32> -> vector<8x1024xf32>
    %77 = arith.addf %65, %76 : vector<8x1024xf32>
    %c6 = arith.constant 6 : index
    %c0_54 = arith.constant 0 : index
    %c0_55 = arith.constant 0 : index
    %78 = vector.load %arg1[%c6, %c0_54, %c0_55] : memref<9x8x576xbf16, #tpu.memory_space<vmem>>, vector<1x8x576xbf16>
    %79 = vector.shape_cast %78 : vector<1x8x576xbf16> to vector<8x576xbf16>
    %cst_56 = arith.constant dense<0.000000e+00> : vector<8x64xf32>
    %80 = tpu.matmul %79, %0, %cst_56 {dimension_numbers = #tpu.dot_dimension_numbers<[1], [0], [0], [1], [0, 0, 1, 1], [], []>} : vector<8x576xbf16>, vector<576x64xbf16>, vector<8x64xf32> -> vector<8x64xf32>
    %81 = vector.broadcast %1 : vector<1x64xf32> to vector<8x64xf32>
    %82 = arith.addf %80, %81 : vector<8x64xf32>
    %cst_57 = arith.constant 0.000000e+00 : f32
    %83 = vector.broadcast %cst_57 : f32 to vector<8x64xf32>
    %84 = arith.maximumf %82, %83 : vector<8x64xf32>
    %85 = arith.truncf %84 : vector<8x64xf32> to vector<8x64xbf16>
    %c6_58 = arith.constant 6 : index
    %c0_59 = arith.constant 0 : index
    %c0_60 = arith.constant 0 : index
    %86 = vector.load %arg4[%c6_58, %c0_59, %c0_60] : memref<9x64x1024xbf16, #tpu.memory_space<vmem>>, vector<1x64x1024xbf16>
    %87 = vector.shape_cast %86 : vector<1x64x1024xbf16> to vector<64x1024xbf16>
    %cst_61 = arith.constant dense<0.000000e+00> : vector<8x1024xf32>
    %88 = tpu.matmul %85, %87, %cst_61 {dimension_numbers = #tpu.dot_dimension_numbers<[1], [0], [0], [1], [0, 0, 1, 1], [], []>} : vector<8x64xbf16>, vector<64x1024xbf16>, vector<8x1024xf32> -> vector<8x1024xf32>
    %89 = arith.addf %77, %88 : vector<8x1024xf32>
    %c7 = arith.constant 7 : index
    %c0_62 = arith.constant 0 : index
    %c0_63 = arith.constant 0 : index
    %90 = vector.load %arg1[%c7, %c0_62, %c0_63] : memref<9x8x576xbf16, #tpu.memory_space<vmem>>, vector<1x8x576xbf16>
    %91 = vector.shape_cast %90 : vector<1x8x576xbf16> to vector<8x576xbf16>
    %cst_64 = arith.constant dense<0.000000e+00> : vector<8x64xf32>
    %92 = tpu.matmul %91, %0, %cst_64 {dimension_numbers = #tpu.dot_dimension_numbers<[1], [0], [0], [1], [0, 0, 1, 1], [], []>} : vector<8x576xbf16>, vector<576x64xbf16>, vector<8x64xf32> -> vector<8x64xf32>
    %93 = vector.broadcast %1 : vector<1x64xf32> to vector<8x64xf32>
    %94 = arith.addf %92, %93 : vector<8x64xf32>
    %cst_65 = arith.constant 0.000000e+00 : f32
    %95 = vector.broadcast %cst_65 : f32 to vector<8x64xf32>
    %96 = arith.maximumf %94, %95 : vector<8x64xf32>
    %97 = arith.truncf %96 : vector<8x64xf32> to vector<8x64xbf16>
    %c7_66 = arith.constant 7 : index
    %c0_67 = arith.constant 0 : index
    %c0_68 = arith.constant 0 : index
    %98 = vector.load %arg4[%c7_66, %c0_67, %c0_68] : memref<9x64x1024xbf16, #tpu.memory_space<vmem>>, vector<1x64x1024xbf16>
    %99 = vector.shape_cast %98 : vector<1x64x1024xbf16> to vector<64x1024xbf16>
    %cst_69 = arith.constant dense<0.000000e+00> : vector<8x1024xf32>
    %100 = tpu.matmul %97, %99, %cst_69 {dimension_numbers = #tpu.dot_dimension_numbers<[1], [0], [0], [1], [0, 0, 1, 1], [], []>} : vector<8x64xbf16>, vector<64x1024xbf16>, vector<8x1024xf32> -> vector<8x1024xf32>
    %101 = arith.addf %89, %100 : vector<8x1024xf32>
    %c8 = arith.constant 8 : index
    %c0_70 = arith.constant 0 : index
    %c0_71 = arith.constant 0 : index
    %102 = vector.load %arg1[%c8, %c0_70, %c0_71] : memref<9x8x576xbf16, #tpu.memory_space<vmem>>, vector<1x8x576xbf16>
    %103 = vector.shape_cast %102 : vector<1x8x576xbf16> to vector<8x576xbf16>
    %cst_72 = arith.constant dense<0.000000e+00> : vector<8x64xf32>
    %104 = tpu.matmul %103, %0, %cst_72 {dimension_numbers = #tpu.dot_dimension_numbers<[1], [0], [0], [1], [0, 0, 1, 1], [], []>} : vector<8x576xbf16>, vector<576x64xbf16>, vector<8x64xf32> -> vector<8x64xf32>
    %105 = vector.broadcast %1 : vector<1x64xf32> to vector<8x64xf32>
    %106 = arith.addf %104, %105 : vector<8x64xf32>
    %cst_73 = arith.constant 0.000000e+00 : f32
    %107 = vector.broadcast %cst_73 : f32 to vector<8x64xf32>
    %108 = arith.maximumf %106, %107 : vector<8x64xf32>
    %109 = arith.truncf %108 : vector<8x64xf32> to vector<8x64xbf16>
    %c8_74 = arith.constant 8 : index
    %c0_75 = arith.constant 0 : index
    %c0_76 = arith.constant 0 : index
    %110 = vector.load %arg4[%c8_74, %c0_75, %c0_76] : memref<9x64x1024xbf16, #tpu.memory_space<vmem>>, vector<1x64x1024xbf16>
    %111 = vector.shape_cast %110 : vector<1x64x1024xbf16> to vector<64x1024xbf16>
    %cst_77 = arith.constant dense<0.000000e+00> : vector<8x1024xf32>
    %112 = tpu.matmul %109, %111, %cst_77 {dimension_numbers = #tpu.dot_dimension_numbers<[1], [0], [0], [1], [0, 0, 1, 1], [], []>} : vector<8x64xbf16>, vector<64x1024xbf16>, vector<8x1024xf32> -> vector<8x1024xf32>
    %113 = arith.addf %101, %112 : vector<8x1024xf32>
    %cst_78 = arith.constant 0.000000e+00 : f32
    %114 = vector.broadcast %cst_78 : f32 to vector<8x1024xf32>
    %115 = arith.maximumf %113, %114 : vector<8x1024xf32>
    %c0_79 = arith.constant 0 : index
    %c0_80 = arith.constant 0 : index
    %116 = vector.load %arg6[%c0_79, %c0_80] : memref<1024x128xf32, #tpu.memory_space<vmem>>, vector<1024x128xf32>
    %cst_81 = arith.constant dense<0.000000e+00> : vector<8x128xf32>
    %117 = tpu.matmul %115, %116, %cst_81 {dimension_numbers = #tpu.dot_dimension_numbers<[1], [0], [0], [1], [0, 0, 1, 1], [], []>} : vector<8x1024xf32>, vector<1024x128xf32>, vector<8x128xf32> -> vector<8x128xf32>
    %c0_82 = arith.constant 0 : index
    %c0_83 = arith.constant 0 : index
    %118 = vector.load %arg7[%c0_82, %c0_83] : memref<1x128xf32, #tpu.memory_space<vmem>>, vector<1x128xf32>
    %119 = vector.broadcast %118 : vector<1x128xf32> to vector<8x128xf32>
    %120 = arith.addf %117, %119 : vector<8x128xf32>
    %c0_84 = arith.constant 0 : index
    %c0_85 = arith.constant 0 : index
    %121 = vector.load %arg8[%c0_84, %c0_85] : memref<8x128xf32, #tpu.memory_space<vmem>>, vector<8x128xf32>
    tpu.vector_store %arg8[%c0_84, %c0_85], %120 {strides = array<i32>} : memref<8x128xf32, #tpu.memory_space<vmem>>, vector<8x128xf32>,
    return
  }
  func.func @transform_0(%arg0: i32) -> (i32, i32, i32) {
    %c0_i32 = arith.constant 0 : i32
    %c0_i32_0 = arith.constant 0 : i32
    %c0_i32_1 = arith.constant 0 : i32
    return %c0_i32, %arg0, %c0_i32_0 : i32, i32, i32
  }
  func.func @transform_1(%arg0: i32) -> (i32, i32) {
    %c0_i32 = arith.constant 0 : i32
    %c0_i32_0 = arith.constant 0 : i32
    %c0_i32_1 = arith.constant 0 : i32
    return %c0_i32, %c0_i32_0 : i32, i32
  }
  func.func @transform_2(%arg0: i32) -> (i32, i32) {
    %c0_i32 = arith.constant 0 : i32
    %c0_i32_0 = arith.constant 0 : i32
    %c0_i32_1 = arith.constant 0 : i32
    return %c0_i32, %c0_i32_0 : i32, i32
  }
  func.func @transform_3(%arg0: i32) -> (i32, i32, i32) {
    %c0_i32 = arith.constant 0 : i32
    %c0_i32_0 = arith.constant 0 : i32
    %c0_i32_1 = arith.constant 0 : i32
    %c0_i32_2 = arith.constant 0 : i32
    return %c0_i32, %c0_i32_0, %c0_i32_1 : i32, i32, i32
  }
  func.func @transform_4(%arg0: i32) -> (i32, i32) {
    %c0_i32 = arith.constant 0 : i32
    %c0_i32_0 = arith.constant 0 : i32
    %c0_i32_1 = arith.constant 0 : i32
    return %c0_i32, %c0_i32_0 : i32, i32
  }
  func.func @transform_5(%arg0: i32) -> (i32, i32) {
    %c0_i32 = arith.constant 0 : i32
    %c0_i32_0 = arith.constant 0 : i32
    %c0_i32_1 = arith.constant 0 : i32
    return %c0_i32, %c0_i32_0 : i32, i32
  }
  func.func @transform_6(%arg0: i32) -> (i32, i32) {
    %c0_i32 = arith.constant 0 : i32
    %c0_i32_0 = arith.constant 0 : i32
    %c0_i32_1 = arith.constant 0 : i32
    return %c0_i32, %c0_i32_0 : i32, i32
  }
  func.func @transform_7(%arg0: i32) -> (i32, i32) {
    %c0_i32 = arith.constant 0 : i32
    %c0_i32_0 = arith.constant 0 : i32
    return %arg0, %c0_i32 : i32, i32
  }
}

</mosaic_0001>

<bundles_post_ra>
// kernel: agent_forward.3
= control target key start
LH: loop header
LB: loop body
LE: loop exit
PB: predicated region body
PF: predicated region fallthrough
CT: control target
= control target key end

     0   :  { %v1192_v0 = vmov 0   ;;  %s1518_s1 = inlined_call_operand.vmem [shape: bf16[256,128], index: 1, kind: input, shape index: {}]   ;;  %s1519_s0 = inlined_call_operand.vmem [shape: bf16[320,256], index: 0, kind: input, shape index: {}]   ;;  %s1520_s2 = inlined_call_operand.vmem [shape: f32[1,128], index: 2, kind: input, shape index: {}]   ;;  %s1521_s3 = inlined_call_operand.vmem [shape: bf16[320,128], index: 3, kind: output, shape index: {}]  }
   0x1   :  { %390 = vmatprep.subr.bf16.mxu0 %v1192_v0  ;;  %1083 = vmatprep.subr.bf16.mxu1 %v1192_v0  ;;  %v1116_v1 = vld [vmem:[%s1518_s1] sm:$0xff]   ;;  %v1117_v2 = vld [vmem:[%s1518_s1 + $0x8] sm:$0xff]   ;;  %v1118_v3 = vld [vmem:[%s1518_s1 + $0x10] sm:$0xff]  }
   0x2   :  { %391 = vmatpush1.bf16.msra.mxu0 %v1116_v1  ;;  %1099 = vmatpush1.bf16.msra.mxu1 %v1116_v1  ;;  %v1119_v4 = vld [vmem:[%s1518_s1 + $0x18] sm:$0xff]   ;;  %v1120_v5 = vld [vmem:[%s1518_s1 + $0x20] sm:$0xff]   ;;  %v1121_v7 = vld [vmem:[%s1518_s1 + $0x28] sm:$0xff]  }
   0x3   :  { %392 = vmatprep.subr.bf16.mxu0 %v1192_v0  ;;  %1084 = vmatprep.subr.bf16.mxu1 %v1192_v0  ;;  %v1134_v6 = vld [vmem:[%s1519_s0 + $0x4] ss:$8 sps:$4 sm:$0xff]   ;;  %v1122_v9 = vld [vmem:[%s1518_s1 + $0x30] sm:$0xff]   ;;  %v1123_v10 = vld [vmem:[%s1518_s1 + $0x38] sm:$0xff]  }
   0x4   :  { %v1137_v8 = vld [vmem:[%s1519_s0 + $0xa4] ss:$8 sps:$4 sm:$0xff]   ;;  %422 = vmatprep.mubr.bf16.mxu0 %v1134_v6  ;;  %v1126_v13 = vld [vmem:[%s1518_s1 + $0x50] sm:$0xff]   ;;  %v1127_v14 = vld [vmem:[%s1518_s1 + $0x58] sm:$0xff]  }
   0x5   :  { %502 = vmatprep.mubr.bf16.mxu1 %v1137_v8  ;;  %v1124_v11 = vld [vmem:[%s1518_s1 + $0x40] sm:$0xff]   ;;  %v1125_v12 = vld [vmem:[%s1518_s1 + $0x48] sm:$0xff]   ;;  %v1130_v17 = vld [vmem:[%s1518_s1 + $0x70] sm:$0xff]  }
   0x6   :  { %393 = vmatpush1.bf16.msra.mxu0 %v1117_v2  ;;  %1100 = vmatpush1.bf16.msra.mxu1 %v1117_v2  ;;  %v1128_v15 = vld [vmem:[%s1518_s1 + $0x60] sm:$0xff]   ;;  %v1129_v16 = vld [vmem:[%s1518_s1 + $0x68] sm:$0xff]   ;;  %v1131_v18 = vld [vmem:[%s1518_s1 + $0x78] sm:$0xff]  }
   0x7   :  { %394 = vmatprep.subr.bf16.mxu0 %v1192_v0  ;;  %1085 = vmatprep.subr.bf16.mxu1 %v1192_v0  ;;  %v1132_v19 = vld [vmem:[%s1519_s0] ss:$8 sps:$4 sm:$0xff]   ;;  %v1138_v21 = vld [vmem:[%s1519_s0 + $0x14] ss:$8 sps:$4 sm:$0xff]   ;;  %v1142_v23 = vld [vmem:[%s1519_s0 + $0x10] ss:$8 sps:$4 sm:$0xff]  }
   0x8   :  { %v1135_v20 = vld [vmem:[%s1519_s0 + $0xa0] ss:$8 sps:$4 sm:$0xff]   ;;  %v1140_v22 = vld [vmem:[%s1519_s0 + $0xb4] ss:$8 sps:$4 sm:$0xff]   ;;  %v1143_v24 = vld [vmem:[%s1519_s0 + $0xb0] ss:$8 sps:$4 sm:$0xff]  }
   0x9   :  { %v1144_v25 = vld [vmem:[%s1519_s0 + $0x24] ss:$8 sps:$4 sm:$0xff]   ;;  %v1148_v27 = vld [vmem:[%s1519_s0 + $0x20] ss:$8 sps:$4 sm:$0xff]   ;;  %v1150_v29 = vld [vmem:[%s1519_s0 + $0x34] ss:$8 sps:$4 sm:$0xff]  }
   0xa   :  { %395 = vmatpush1.bf16.msra.mxu0 %v1118_v3  ;;  %1101 = vmatpush1.bf16.msra.mxu1 %v1118_v3  ;;  %v1146_v26 = vld [vmem:[%s1519_s0 + $0xc4] ss:$8 sps:$4 sm:$0xff]   ;;  %v1149_v28 = vld [vmem:[%s1519_s0 + $0xc0] ss:$8 sps:$4 sm:$0xff]   ;;  %v1152_v30 = vld [vmem:[%s1519_s0 + $0xd4] ss:$8 sps:$4 sm:$0xff]  }
   0xb   :  { %396 = vmatprep.subr.bf16.mxu0 %v1192_v0  ;;  %1086 = vmatprep.subr.bf16.mxu1 %v1192_v0  ;;  %v1154_v31 = vld [vmem:[%s1519_s0 + $0x30] ss:$8 sps:$4 sm:$0xff]   ;;  %v1156_v33 = vld [vmem:[%s1519_s0 + $0x44] ss:$8 sps:$4 sm:$0xff]   ;;  %v1160_v35 = vld [vmem:[%s1519_s0 + $0x40] ss:$8 sps:$4 sm:$0xff]  }
   0xc   :  { %v1155_v32 = vld [vmem:[%s1519_s0 + $0xd0] ss:$8 sps:$4 sm:$0xff]   ;;  %v1158_v34 = vld [vmem:[%s1519_s0 + $0xe4] ss:$8 sps:$4 sm:$0xff]   ;;  %v1161_v36 = vld [vmem:[%s1519_s0 + $0xe0] ss:$8 sps:$4 sm:$0xff]  }
   0xd   :  { %v1162_v37 = vld [vmem:[%s1519_s0 + $0x54] ss:$8 sps:$4 sm:$0xff]   ;;  %v1166_v39 = vld [vmem:[%s1519_s0 + $0x50] ss:$8 sps:$4 sm:$0xff]   ;;  %v1168_v41 = vld [vmem:[%s1519_s0 + $0x64] ss:$8 sps:$4 sm:$0xff]  }
   0xe   :  { %397 = vmatpush1.bf16.msra.mxu0 %v1119_v4  ;;  %1102 = vmatpush1.bf16.msra.mxu1 %v1119_v4  ;;  %v1164_v38 = vld [vmem:[%s1519_s0 + $0xf4] ss:$8 sps:$4 sm:$0xff]   ;;  %v1167_v40 = vld [vmem:[%s1519_s0 + $0xf0] ss:$8 sps:$4 sm:$0xff]   ;;  %v1170_v42 = vld [vmem:[%s1519_s0 + $0x104] ss:$8 sps:$4 sm:$0xff]  }
   0xf   :  { %398 = vmatprep.subr.bf16.mxu0 %v1192_v0  ;;  %1087 = vmatprep.subr.bf16.mxu1 %v1192_v0  ;;  %v1172_v43 = vld [vmem:[%s1519_s0 + $0x60] ss:$8 sps:$4 sm:$0xff]   ;;  %v1174_v45 = vld [vmem:[%s1519_s0 + $0x74] ss:$8 sps:$4 sm:$0xff]   ;;  %v1178_v47 = vld [vmem:[%s1519_s0 + $0x70] ss:$8 sps:$4 sm:$0xff]  }
  0x10   :  { %v1173_v44 = vld [vmem:[%s1519_s0 + $0x100] ss:$8 sps:$4 sm:$0xff]   ;;  %v1176_v46 = vld [vmem:[%s1519_s0 + $0x114] ss:$8 sps:$4 sm:$0xff]   ;;  %v1179_v48 = vld [vmem:[%s1519_s0 + $0x110] ss:$8 sps:$4 sm:$0xff]  }
  0x11   :  { %v1180_v49 = vld [vmem:[%s1519_s0 + $0x84] ss:$8 sps:$4 sm:$0xff]   ;;  %v1184_v51 = vld [vmem:[%s1519_s0 + $0x80] ss:$8 sps:$4 sm:$0xff]   ;;  %v1186_v53 = vld [vmem:[%s1519_s0 + $0x94] ss:$8 sps:$4 sm:$0xff]  }
  0x12   :  { %399 = vmatpush1.bf16.msra.mxu0 %v1120_v5  ;;  %1103 = vmatpush1.bf16.msra.mxu1 %v1120_v5  ;;  %v1182_v50 = vld [vmem:[%s1519_s0 + $0x124] ss:$8 sps:$4 sm:$0xff]   ;;  %v1185_v52 = vld [vmem:[%s1519_s0 + $0x120] ss:$8 sps:$4 sm:$0xff]   ;;  %v1188_v54 = vld [vmem:[%s1519_s0 + $0x134] ss:$8 sps:$4 sm:$0xff]  }
  0x13   :  { %400 = vmatprep.subr.bf16.mxu0 %v1192_v0  ;;  %1088 = vmatprep.subr.bf16.mxu1 %v1192_v0  ;;  %v1190_v55 = vld [vmem:[%s1519_s0 + $0x90] ss:$8 sps:$4 sm:$0xff]   ;;  %v1416_v57 = vld [vmem:[%s1520_s2] ss:$0 sm:$0xff] }
  0x14   :  { %v1191_v56 = vld [vmem:[%s1519_s0 + $0x130] ss:$8 sps:$4 sm:$0xff]  }
  0x16   :  { %401 = vmatpush1.bf16.msra.mxu0 %v1121_v7  ;;  %1104 = vmatpush1.bf16.msra.mxu1 %v1121_v7 }
  0x17   :  { %402 = vmatprep.subr.bf16.mxu0 %v1192_v0  ;;  %1089 = vmatprep.subr.bf16.mxu1 %v1192_v0 }
  0x1a   :  { %403 = vmatpush1.bf16.msra.mxu0 %v1122_v9  ;;  %1105 = vmatpush1.bf16.msra.mxu1 %v1122_v9 }
  0x1b   :  { %404 = vmatprep.subr.bf16.mxu0 %v1192_v0  ;;  %1090 = vmatprep.subr.bf16.mxu1 %v1192_v0 }
  0x1e   :  { %405 = vmatpush1.bf16.msra.mxu0 %v1123_v10  ;;  %1106 = vmatpush1.bf16.msra.mxu1 %v1123_v10 }
  0x1f   :  { %406 = vmatprep.subr.bf16.mxu0 %v1192_v0  ;;  %1091 = vmatprep.subr.bf16.mxu1 %v1192_v0 }
  0x22   :  { %407 = vmatpush1.bf16.msra.mxu0 %v1124_v11  ;;  %1107 = vmatpush1.bf16.msra.mxu1 %v1124_v11 }
  0x23   :  { %408 = vmatprep.subr.bf16.mxu0 %v1192_v0  ;;  %1092 = vmatprep.subr.bf16.mxu1 %v1192_v0 }
  0x26   :  { %409 = vmatpush1.bf16.msra.mxu0 %v1125_v12  ;;  %1108 = vmatpush1.bf16.msra.mxu1 %v1125_v12 }
  0x27   :  { %410 = vmatprep.subr.bf16.mxu0 %v1192_v0  ;;  %1093 = vmatprep.subr.bf16.mxu1 %v1192_v0 }
  0x2a   :  { %411 = vmatpush1.bf16.msra.mxu0 %v1126_v13  ;;  %1109 = vmatpush1.bf16.msra.mxu1 %v1126_v13 }
  0x2b   :  { %412 = vmatprep.subr.bf16.mxu0 %v1192_v0  ;;  %1094 = vmatprep.subr.bf16.mxu1 %v1192_v0 }
  0x2e   :  { %413 = vmatpush1.bf16.msra.mxu0 %v1127_v14  ;;  %1110 = vmatpush1.bf16.msra.mxu1 %v1127_v14 }
  0x2f   :  { %414 = vmatprep.subr.bf16.mxu0 %v1192_v0  ;;  %1095 = vmatprep.subr.bf16.mxu1 %v1192_v0 }
  0x32   :  { %415 = vmatpush1.bf16.msra.mxu0 %v1128_v15  ;;  %1111 = vmatpush1.bf16.msra.mxu1 %v1128_v15 }
  0x33   :  { %416 = vmatprep.subr.bf16.mxu0 %v1192_v0  ;;  %1096 = vmatprep.subr.bf16.mxu1 %v1192_v0 }
  0x36   :  { %417 = vmatpush1.bf16.msra.mxu0 %v1129_v16  ;;  %1112 = vmatpush1.bf16.msra.mxu1 %v1129_v16 }
  0x37   :  { %418 = vmatprep.subr.bf16.mxu0 %v1192_v0  ;;  %1097 = vmatprep.subr.bf16.mxu1 %v1192_v0 }
  0x3a   :  { %419 = vmatpush1.bf16.msra.mxu0 %v1130_v17  ;;  %1113 = vmatpush1.bf16.msra.mxu1 %v1130_v17 }
  0x3b   :  { %420 = vmatprep.subr.bf16.mxu0 %v1192_v0  ;;  %1098 = vmatprep.subr.bf16.mxu1 %v1192_v0 }
  0x3e   :  { %421 = vmatpush1.bf16.msra.mxu0 %v1131_v18  ;;  %1114 = vmatpush1.bf16.msra.mxu1 %v1131_v18 }
  0x41   :  { %423 = vmatmul.mubr.bf16.vlgmr.msra.gmra.mrb[0].mxu0 %v1132_v19  ;;  %503 = vmatmul.mubr.bf16.vlgmr.msra.gmra.mrb[0].mxu1 %v1135_v20 }
  0x42   :  { %430 = vmatprep.mubr.bf16.mxu0 %v1138_v21  ;;  %510 = vmatprep.mubr.bf16.mxu1 %v1140_v22 }
  0x49   :  { %431 = vmatmul.mubr.bf16.gmra.mrb[4].mxu0 %v1142_v23  ;;  %511 = vmatmul.mubr.bf16.gmra.mrb[4].mxu1 %v1143_v24 }
  0x4a   :  { %438 = vmatprep.mubr.bf16.mxu0 %v1144_v25  ;;  %518 = vmatprep.mubr.bf16.mxu1 %v1146_v26 }
  0x51   :  { %439 = vmatmul.mubr.bf16.gmra.mrb[8].mxu0 %v1148_v27  ;;  %519 = vmatmul.mubr.bf16.gmra.mrb[8].mxu1 %v1149_v28 }
  0x52   :  { %446 = vmatprep.mubr.bf16.mxu0 %v1150_v29  ;;  %526 = vmatprep.mubr.bf16.mxu1 %v1152_v30 }
  0x59   :  { %447 = vmatmul.mubr.bf16.gmra.mrb[12].mxu0 %v1154_v31  ;;  %527 = vmatmul.mubr.bf16.gmra.mrb[12].mxu1 %v1155_v32 }
  0x5a   :  { %454 = vmatprep.mubr.bf16.mxu0 %v1156_v33  ;;  %534 = vmatprep.mubr.bf16.mxu1 %v1158_v34 }
  0x61   :  { %455 = vmatmul.mubr.bf16.gmra.mrb[16].mxu0 %v1160_v35  ;;  %535 = vmatmul.mubr.bf16.gmra.mrb[16].mxu1 %v1161_v36 }
  0x62   :  { %462 = vmatprep.mubr.bf16.mxu0 %v1162_v37  ;;  %542 = vmatprep.mubr.bf16.mxu1 %v1164_v38 }
  0x69   :  { %463 = vmatmul.mubr.bf16.gmra.mrb[20].mxu0 %v1166_v39  ;;  %543 = vmatmul.mubr.bf16.gmra.mrb[20].mxu1 %v1167_v40 }
  0x6a   :  { %470 = vmatprep.mubr.bf16.mxu0 %v1168_v41  ;;  %550 = vmatprep.mubr.bf16.mxu1 %v1170_v42 }
  0x71   :  { %471 = vmatmul.mubr.bf16.gmra.mrb[24].mxu0 %v1172_v43  ;;  %551 = vmatmul.mubr.bf16.gmra.mrb[24].mxu1 %v1173_v44 }
  0x72   :  { %478 = vmatprep.mubr.bf16.mxu0 %v1174_v45  ;;  %558 = vmatprep.mubr.bf16.mxu1 %v1176_v46 }
  0x79   :  { %479 = vmatmul.mubr.bf16.gmra.mrb[28].mxu0 %v1178_v47  ;;  %559 = vmatmul.mubr.bf16.gmra.mrb[28].mxu1 %v1179_v48 }
  0x7a   :  { %486 = vmatprep.mubr.bf16.mxu0 %v1180_v49  ;;  %566 = vmatprep.mubr.bf16.mxu1 %v1182_v50 }
  0x81   :  { %487 = vmatmul.mubr.bf16.gmra.mrb[32].mxu0 %v1184_v51  ;;  %567 = vmatmul.mubr.bf16.gmra.mrb[32].mxu1 %v1185_v52 }
  0x82   :  { %494 = vmatprep.mubr.bf16.mxu0 %v1186_v53  ;;  %574 = vmatprep.mubr.bf16.mxu1 %v1188_v54 }
  0x89   :  { %495 = vmatmul.mubr.bf16.gmra.mrb[36].mxu0 %v1190_v55  ;;  %575 = vmatmul.mubr.bf16.gmra.mrb[36].mxu1 %v1191_v56 }
 0x114   :  { %v424_v58 = vpop.f32.mrb[0].mxu0  ;;  %v504_v59 = vpop.f32.mrb[0].mxu1 }
 0x115   :  { %v425_v60 = vadd.f32 %v1416_v57, %v424_v58  ;;  %v505_v61 = vadd.f32 %v1416_v57, %v504_v59  ;;  %v426_v62 = vpop.f32.mrb[1].mxu0  ;;  %v506_v63 = vpop.f32.mrb[1].mxu1 }
 0x116   :  { %v427_v0 = vpop.f32.mrb[2].mxu0  ;;  %v507_v1 = vpop.f32.mrb[2].mxu1 }
 0x117   :  { %v428_v2 = vadd.f32 %v1416_v57, %v427_v0  ;;  %v508_v3 = vadd.f32 %v1416_v57, %v507_v1  ;;  %v429_v4 = vpop.f32.mrb[3].mxu0  ;;  %v509_v5 = vpop.f32.mrb[3].mxu1  ;;  %v583_v6 = vmax.f32 %v425_v60, 0.0  ;;  %v603_v7 = vmax.f32 %v505_v61, 0.0 }
 0x119   :  { %v584_v8 = vmax.f32 %v428_v2, 0.0  ;;  %v604_v9 = vmax.f32 %v508_v3, 0.0 }
 0x11b   :  { %v967_v10 = vpack.c.bf16 %v584_v8, %v583_v6  ;;  %v1017_v11 = vpack.c.bf16 %v604_v9, %v603_v7 }
 0x11c   :  { %v432_v12 = vpop.f32.mrb[4].mxu0  ;;  %v512_v13 = vpop.f32.mrb[4].mxu1 }
 0x11d   :  { %968 = vst [vmem:[%s1521_s3] sm:$0xff] %v967_v10   ;;  %1073 = vst [vmem:[%s1521_s3 + $0x50] sm:$0xff] %v1017_v11   ;;  %v433_v14 = vadd.f32 %v1416_v57, %v432_v12  ;;  %v513_v15 = vadd.f32 %v1416_v57, %v512_v13  ;;  %v434_v16 = vpop.f32.mrb[5].mxu0  ;;  %v514_v17 = vpop.f32.mrb[5].mxu1 }
 0x11e   :  { %v435_v18 = vpop.f32.mrb[6].mxu0  ;;  %v515_v19 = vpop.f32.mrb[6].mxu1 }
 0x11f   :  { %v436_v20 = vadd.f32 %v1416_v57, %v435_v18  ;;  %v516_v21 = vadd.f32 %v1416_v57, %v515_v19  ;;  %v437_v22 = vpop.f32.mrb[7].mxu0  ;;  %v517_v23 = vpop.f32.mrb[7].mxu1  ;;  %v585_v24 = vmax.f32 %v433_v14, 0.0  ;;  %v605_v25 = vmax.f32 %v513_v15, 0.0 }
 0x121   :  { %v586_v26 = vmax.f32 %v436_v20, 0.0  ;;  %v606_v27 = vmax.f32 %v516_v21, 0.0 }
 0x123   :  { %v972_v28 = vpack.c.bf16 %v586_v26, %v585_v24  ;;  %v1022_v29 = vpack.c.bf16 %v606_v27, %v605_v25 }
 0x124   :  { %v440_v30 = vpop.f32.mrb[8].mxu0  ;;  %v520_v31 = vpop.f32.mrb[8].mxu1 }
 0x125   :  { %1064 = vst [vmem:[%s1521_s3 + $0x8] sm:$0xff] %v972_v28   ;;  %1074 = vst [vmem:[%s1521_s3 + $0x58] sm:$0xff] %v1022_v29   ;;  %v441_v32 = vadd.f32 %v1416_v57, %v440_v30  ;;  %v521_v33 = vadd.f32 %v1416_v57, %v520_v31  ;;  %v442_v34 = vpop.f32.mrb[9].mxu0  ;;  %v522_v35 = vpop.f32.mrb[9].mxu1 }
 0x126   :  { %v443_v36 = vpop.f32.mrb[10].mxu0  ;;  %v523_v37 = vpop.f32.mrb[10].mxu1 }
 0x127   :  { %v444_v38 = vadd.f32 %v1416_v57, %v443_v36  ;;  %v524_v39 = vadd.f32 %v1416_v57, %v523_v37  ;;  %v445_v40 = vpop.f32.mrb[11].mxu0  ;;  %v525_v41 = vpop.f32.mrb[11].mxu1  ;;  %v587_v42 = vmax.f32 %v441_v32, 0.0  ;;  %v607_v43 = vmax.f32 %v521_v33, 0.0 }
 0x129   :  { %v588_v44 = vmax.f32 %v444_v38, 0.0  ;;  %v608_v45 = vmax.f32 %v524_v39, 0.0 }
 0x12b   :  { %v977_v46 = vpack.c.bf16 %v588_v44, %v587_v42  ;;  %v1027_v47 = vpack.c.bf16 %v608_v45, %v607_v43 }
 0x12c   :  { %v448_v48 = vpop.f32.mrb[12].mxu0  ;;  %v528_v49 = vpop.f32.mrb[12].mxu1 }
 0x12d   :  { %1065 = vst [vmem:[%s1521_s3 + $0x10] sm:$0xff] %v977_v46   ;;  %1075 = vst [vmem:[%s1521_s3 + $0x60] sm:$0xff] %v1027_v47   ;;  %v449_v50 = vadd.f32 %v1416_v57, %v448_v48  ;;  %v529_v51 = vadd.f32 %v1416_v57, %v528_v49  ;;  %v450_v52 = vpop.f32.mrb[13].mxu0  ;;  %v530_v53 = vpop.f32.mrb[13].mxu1 }
 0x12e   :  { %v451_v54 = vpop.f32.mrb[14].mxu0  ;;  %v531_v55 = vpop.f32.mrb[14].mxu1 }
 0x12f   :  { %v452_v56 = vadd.f32 %v1416_v57, %v451_v54  ;;  %v532_v58 = vadd.f32 %v1416_v57, %v531_v55  ;;  %v453_v59 = vpop.f32.mrb[15].mxu0  ;;  %v533_v60 = vpop.f32.mrb[15].mxu1  ;;  %v589_v61 = vmax.f32 %v449_v50, 0.0  ;;  %v609_v62 = vmax.f32 %v529_v51, 0.0 }
 0x131   :  { %v590_v63 = vmax.f32 %v452_v56, 0.0  ;;  %v610_v0 = vmax.f32 %v532_v58, 0.0 }
 0x133   :  { %v982_v1 = vpack.c.bf16 %v590_v63, %v589_v61  ;;  %v1032_v2 = vpack.c.bf16 %v610_v0, %v609_v62 }
 0x134   :  { %v456_v3 = vpop.f32.mrb[16].mxu0  ;;  %v536_v4 = vpop.f32.mrb[16].mxu1 }
 0x135   :  { %1066 = vst [vmem:[%s1521_s3 + $0x18] sm:$0xff] %v982_v1   ;;  %1076 = vst [vmem:[%s1521_s3 + $0x68] sm:$0xff] %v1032_v2   ;;  %v457_v5 = vadd.f32 %v1416_v57, %v456_v3  ;;  %v537_v6 = vadd.f32 %v1416_v57, %v536_v4  ;;  %v458_v7 = vpop.f32.mrb[17].mxu0  ;;  %v538_v8 = vpop.f32.mrb[17].mxu1 }
 0x136   :  { %v459_v9 = vpop.f32.mrb[18].mxu0  ;;  %v539_v10 = vpop.f32.mrb[18].mxu1 }
 0x137   :  { %v460_v11 = vadd.f32 %v1416_v57, %v459_v9  ;;  %v540_v12 = vadd.f32 %v1416_v57, %v539_v10  ;;  %v461_v13 = vpop.f32.mrb[19].mxu0  ;;  %v541_v14 = vpop.f32.mrb[19].mxu1  ;;  %v591_v15 = vmax.f32 %v457_v5, 0.0  ;;  %v611_v16 = vmax.f32 %v537_v6, 0.0 }
 0x139   :  { %v592_v17 = vmax.f32 %v460_v11, 0.0  ;;  %v612_v18 = vmax.f32 %v540_v12, 0.0 }
 0x13b   :  { %v987_v19 = vpack.c.bf16 %v592_v17, %v591_v15  ;;  %v1037_v20 = vpack.c.bf16 %v612_v18, %v611_v16 }
 0x13c   :  { %v464_v21 = vpop.f32.mrb[20].mxu0  ;;  %v544_v22 = vpop.f32.mrb[20].mxu1 }
 0x13d   :  { %1067 = vst [vmem:[%s1521_s3 + $0x20] sm:$0xff] %v987_v19   ;;  %1077 = vst [vmem:[%s1521_s3 + $0x70] sm:$0xff] %v1037_v20   ;;  %v465_v23 = vadd.f32 %v1416_v57, %v464_v21  ;;  %v545_v24 = vadd.f32 %v1416_v57, %v544_v22  ;;  %v466_v25 = vpop.f32.mrb[21].mxu0  ;;  %v546_v26 = vpop.f32.mrb[21].mxu1 }
 0x13e   :  { %v467_v27 = vpop.f32.mrb[22].mxu0  ;;  %v547_v28 = vpop.f32.mrb[22].mxu1 }
 0x13f   :  { %v468_v29 = vadd.f32 %v1416_v57, %v467_v27  ;;  %v548_v30 = vadd.f32 %v1416_v57, %v547_v28  ;;  %v469_v31 = vpop.f32.mrb[23].mxu0  ;;  %v549_v32 = vpop.f32.mrb[23].mxu1  ;;  %v593_v33 = vmax.f32 %v465_v23, 0.0  ;;  %v613_v34 = vmax.f32 %v545_v24, 0.0 }
 0x141   :  { %v594_v35 = vmax.f32 %v468_v29, 0.0  ;;  %v614_v36 = vmax.f32 %v548_v30, 0.0 }
 0x143   :  { %v992_v37 = vpack.c.bf16 %v594_v35, %v593_v33  ;;  %v1042_v38 = vpack.c.bf16 %v614_v36, %v613_v34 }
 0x144   :  { %v472_v39 = vpop.f32.mrb[24].mxu0  ;;  %v552_v40 = vpop.f32.mrb[24].mxu1 }
 0x145   :  { %1068 = vst [vmem:[%s1521_s3 + $0x28] sm:$0xff] %v992_v37   ;;  %1078 = vst [vmem:[%s1521_s3 + $0x78] sm:$0xff] %v1042_v38   ;;  %v473_v41 = vadd.f32 %v1416_v57, %v472_v39  ;;  %v553_v42 = vadd.f32 %v1416_v57, %v552_v40  ;;  %v474_v43 = vpop.f32.mrb[25].mxu0  ;;  %v554_v44 = vpop.f32.mrb[25].mxu1 }
 0x146   :  { %v475_v45 = vpop.f32.mrb[26].mxu0  ;;  %v555_v46 = vpop.f32.mrb[26].mxu1 }
 0x147   :  { %v476_v47 = vadd.f32 %v1416_v57, %v475_v45  ;;  %v556_v48 = vadd.f32 %v1416_v57, %v555_v46  ;;  %v477_v49 = vpop.f32.mrb[27].mxu0  ;;  %v557_v50 = vpop.f32.mrb[27].mxu1  ;;  %v595_v51 = vmax.f32 %v473_v41, 0.0  ;;  %v615_v52 = vmax.f32 %v553_v42, 0.0 }
 0x149   :  { %v596_v53 = vmax.f32 %v476_v47, 0.0  ;;  %v616_v54 = vmax.f32 %v556_v48, 0.0 }
 0x14b   :  { %v997_v55 = vpack.c.bf16 %v596_v53, %v595_v51  ;;  %v1047_v56 = vpack.c.bf16 %v616_v54, %v615_v52 }
 0x14c   :  { %v480_v58 = vpop.f32.mrb[28].mxu0  ;;  %v560_v59 = vpop.f32.mrb[28].mxu1 }
 0x14d   :  { %1069 = vst [vmem:[%s1521_s3 + $0x30] sm:$0xff] %v997_v55   ;;  %1079 = vst [vmem:[%s1521_s3 + $0x80] sm:$0xff] %v1047_v56   ;;  %v481_v60 = vadd.f32 %v1416_v57, %v480_v58  ;;  %v561_v61 = vadd.f32 %v1416_v57, %v560_v59  ;;  %v482_v62 = vpop.f32.mrb[29].mxu0  ;;  %v562_v63 = vpop.f32.mrb[29].mxu1 }
 0x14e   :  { %v483_v0 = vpop.f32.mrb[30].mxu0  ;;  %v563_v1 = vpop.f32.mrb[30].mxu1 }
 0x14f   :  { %v484_v2 = vadd.f32 %v1416_v57, %v483_v0  ;;  %v564_v3 = vadd.f32 %v1416_v57, %v563_v1  ;;  %v485_v4 = vpop.f32.mrb[31].mxu0  ;;  %v565_v5 = vpop.f32.mrb[31].mxu1  ;;  %v597_v6 = vmax.f32 %v481_v60, 0.0  ;;  %v617_v7 = vmax.f32 %v561_v61, 0.0 }
 0x151   :  { %v598_v8 = vmax.f32 %v484_v2, 0.0  ;;  %v618_v9 = vmax.f32 %v564_v3, 0.0 }
 0x153   :  { %v1002_v10 = vpack.c.bf16 %v598_v8, %v597_v6  ;;  %v1052_v11 = vpack.c.bf16 %v618_v9, %v617_v7 }
 0x154   :  { %v488_v12 = vpop.f32.mrb[32].mxu0  ;;  %v568_v13 = vpop.f32.mrb[32].mxu1 }
 0x155   :  { %1070 = vst [vmem:[%s1521_s3 + $0x38] sm:$0xff] %v1002_v10   ;;  %1080 = vst [vmem:[%s1521_s3 + $0x88] sm:$0xff] %v1052_v11   ;;  %v489_v14 = vadd.f32 %v1416_v57, %v488_v12  ;;  %v569_v15 = vadd.f32 %v1416_v57, %v568_v13  ;;  %v490_v16 = vpop.f32.mrb[33].mxu0  ;;  %v570_v17 = vpop.f32.mrb[33].mxu1 }
 0x156   :  { %v491_v18 = vpop.f32.mrb[34].mxu0  ;;  %v571_v19 = vpop.f32.mrb[34].mxu1 }
 0x157   :  { %v492_v20 = vadd.f32 %v1416_v57, %v491_v18  ;;  %v572_v21 = vadd.f32 %v1416_v57, %v571_v19  ;;  %v493_v22 = vpop.f32.mrb[35].mxu0  ;;  %v573_v23 = vpop.f32.mrb[35].mxu1  ;;  %v599_v24 = vmax.f32 %v489_v14, 0.0  ;;  %v619_v25 = vmax.f32 %v569_v15, 0.0 }
 0x159   :  { %v600_v26 = vmax.f32 %v492_v20, 0.0  ;;  %v620_v27 = vmax.f32 %v572_v21, 0.0 }
 0x15b   :  { %v1007_v28 = vpack.c.bf16 %v600_v26, %v599_v24  ;;  %v1057_v29 = vpack.c.bf16 %v620_v27, %v619_v25 }
 0x15c   :  { %v496_v30 = vpop.f32.mrb[36].mxu0  ;;  %v576_v31 = vpop.f32.mrb[36].mxu1 }
 0x15d   :  { %1071 = vst [vmem:[%s1521_s3 + $0x40] sm:$0xff] %v1007_v28   ;;  %1081 = vst [vmem:[%s1521_s3 + $0x90] sm:$0xff] %v1057_v29   ;;  %v497_v32 = vadd.f32 %v1416_v57, %v496_v30  ;;  %v577_v33 = vadd.f32 %v1416_v57, %v576_v31  ;;  %v498_v34 = vpop.f32.mrb[37].mxu0  ;;  %v578_v35 = vpop.f32.mrb[37].mxu1 }
 0x15e   :  { %v499_v36 = vpop.f32.mrb[38].mxu0  ;;  %v579_v37 = vpop.f32.mrb[38].mxu1 }
 0x15f   :  { %v500_v38 = vadd.f32 %v1416_v57, %v499_v36  ;;  %v580_v39 = vadd.f32 %v1416_v57, %v579_v37  ;;  %v501_v40 = vpop.f32.mrb[39].mxu0  ;;  %v581_v41 = vpop.f32.mrb[39].mxu1  ;;  %v601_v42 = vmax.f32 %v497_v32, 0.0  ;;  %v621_v43 = vmax.f32 %v577_v33, 0.0 }
 0x161   :  { %v602_v44 = vmax.f32 %v500_v38, 0.0  ;;  %v622_v45 = vmax.f32 %v580_v39, 0.0 }
 0x163   :  { %v1012_v46 = vpack.c.bf16 %v602_v44, %v601_v42  ;;  %v1062_v47 = vpack.c.bf16 %v622_v45, %v621_v43 }
 0x165   :  { %1072 = vst [vmem:[%s1521_s3 + $0x48] sm:$0xff] %v1012_v46   ;;  %1082 = vst [vmem:[%s1521_s3 + $0x98] sm:$0xff] %v1062_v47  }

// kernel: agent_forward.4
= control target key start
LH: loop header
LB: loop body
LE: loop exit
PB: predicated region body
PF: predicated region fallthrough
CT: control target
= control target key end

     0   :  { %s969_s1 = inlined_call_operand.vmem [shape: bf16[512,128], index: 1, kind: input, shape index: {}]   ;;  %s970_s0 = inlined_call_operand.vmem [shape: bf16[64,512], index: 0, kind: input, shape index: {}]   ;;  %s971_s2 = inlined_call_operand.vmem [shape: f32[1,128], index: 2, kind: input, shape index: {}]   ;;  %s972_s3 = inlined_call_operand.vmem [shape: bf16[64,128], index: 3, kind: output, shape index: {}]  }
   0x1   :  { %v724_v0 = vld [vmem:[%s969_s1 + $0x40] sm:$0xff]   ;;  %v728_v4 = vld [vmem:[%s969_s1 + $0x48] sm:$0xff]   ;;  %v732_v8 = vld [vmem:[%s969_s1 + $0x50] sm:$0xff]  }
   0x2   :  { %v725_v1 = vld [vmem:[%s969_s1 + $0xc0] sm:$0xff]   ;;  %644 = vmatprep.subr.bf16.mxu0 %v724_v0  ;;  %v729_v5 = vld [vmem:[%s969_s1 + $0xc8] sm:$0xff]   ;;  %v733_v9 = vld [vmem:[%s969_s1 + $0xd0] sm:$0xff]  }
   0x3   :  { %v726_v2 = vld [vmem:[%s969_s1] sm:$0xff]   ;;  %684 = vmatprep.subr.bf16.mxu1 %v725_v1  ;;  %v730_v6 = vld [vmem:[%s969_s1 + $0x8] sm:$0xff]   ;;  %v734_v10 = vld [vmem:[%s969_s1 + $0x10] sm:$0xff]  }
   0x4   :  { %v727_v3 = vld [vmem:[%s969_s1 + $0x80] sm:$0xff]   ;;  %645 = vmatpush3.bf16.msra.mxu0 %v726_v2  ;;  %v731_v7 = vld [vmem:[%s969_s1 + $0x88] sm:$0xff]   ;;  %v735_v11 = vld [vmem:[%s969_s1 + $0x90] sm:$0xff]  }
   0x5   :  { %685 = vmatpush3.bf16.msra.mxu1 %v727_v3  ;;  %646 = vmatprep.subr.bf16.mxu0 %v728_v4  ;;  %v736_v12 = vld [vmem:[%s969_s1 + $0x58] sm:$0xff]   ;;  %v740_v16 = vld [vmem:[%s969_s1 + $0x60] sm:$0xff]   ;;  %v744_v20 = vld [vmem:[%s969_s1 + $0x68] sm:$0xff]  }
   0x6   :  { %686 = vmatprep.subr.bf16.mxu1 %v729_v5  ;;  %v737_v13 = vld [vmem:[%s969_s1 + $0xd8] sm:$0xff]   ;;  %v741_v17 = vld [vmem:[%s969_s1 + $0xe0] sm:$0xff]   ;;  %v745_v21 = vld [vmem:[%s969_s1 + $0xe8] sm:$0xff]  }
   0x7   :  { %v738_v14 = vld [vmem:[%s969_s1 + $0x18] sm:$0xff]   ;;  %v742_v18 = vld [vmem:[%s969_s1 + $0x20] sm:$0xff]   ;;  %v746_v22 = vld [vmem:[%s969_s1 + $0x28] sm:$0xff]  }
   0x8   :  { %647 = vmatpush3.bf16.msra.mxu0 %v730_v6  ;;  %v739_v15 = vld [vmem:[%s969_s1 + $0x98] sm:$0xff]   ;;  %v743_v19 = vld [vmem:[%s969_s1 + $0xa0] sm:$0xff]   ;;  %v747_v23 = vld [vmem:[%s969_s1 + $0xa8] sm:$0xff]  }
   0x9   :  { %687 = vmatpush3.bf16.msra.mxu1 %v731_v7  ;;  %648 = vmatprep.subr.bf16.mxu0 %v732_v8  ;;  %v748_v24 = vld [vmem:[%s969_s1 + $0x70] sm:$0xff]   ;;  %v752_v28 = vld [vmem:[%s969_s1 + $0x78] sm:$0xff]   ;;  %v947_v50 = vld [vmem:[%s971_s2] ss:$0 sm:$0xff] }
   0xa   :  { %688 = vmatprep.subr.bf16.mxu1 %v733_v9  ;;  %v749_v25 = vld [vmem:[%s969_s1 + $0xf0] sm:$0xff]   ;;  %v753_v29 = vld [vmem:[%s969_s1 + $0xf8] sm:$0xff]  }
   0xb   :  { %v750_v26 = vld [vmem:[%s969_s1 + $0x30] sm:$0xff]   ;;  %v754_v30 = vld [vmem:[%s969_s1 + $0x38] sm:$0xff]  }
   0xc   :  { %649 = vmatpush3.bf16.msra.mxu0 %v734_v10  ;;  %v751_v27 = vld [vmem:[%s969_s1 + $0xb0] sm:$0xff]   ;;  %v755_v31 = vld [vmem:[%s969_s1 + $0xb8] sm:$0xff]  }
   0xd   :  { %689 = vmatpush3.bf16.msra.mxu1 %v735_v11  ;;  %650 = vmatprep.subr.bf16.mxu0 %v736_v12  ;;  %v756_v32 = vld [vmem:[%s970_s0] ss:$16 sps:$4 sm:$0xff]   ;;  %v758_v33 = vld [vmem:[%s970_s0 + $0x4] ss:$16 sps:$4 sm:$0xff]   ;;  %v759_v34 = vld [vmem:[%s970_s0 + $0x8] ss:$16 sps:$4 sm:$0xff]  }
   0xe   :  { %690 = vmatprep.subr.bf16.mxu1 %v737_v13  ;;  %v761_v35 = vld [vmem:[%s970_s0 + $0xc] ss:$16 sps:$4 sm:$0xff]   ;;  %406 = vmatprep.mubr.bf16.mxu0 %v758_v33  ;;  %v762_v36 = vld [vmem:[%s970_s0 + $0x24] ss:$16 sps:$4 sm:$0xff]   ;;  %v766_v38 = vld [vmem:[%s970_s0 + $0x20] ss:$16 sps:$4 sm:$0xff]  }
   0xf   :  { %471 = vmatprep.mubr.bf16.mxu1 %v761_v35  ;;  %v764_v37 = vld [vmem:[%s970_s0 + $0x2c] ss:$16 sps:$4 sm:$0xff]   ;;  %v767_v39 = vld [vmem:[%s970_s0 + $0x28] ss:$16 sps:$4 sm:$0xff]   ;;  %v768_v40 = vld [vmem:[%s970_s0 + $0x44] ss:$16 sps:$4 sm:$0xff]  }
  0x10   :  { %651 = vmatpush3.bf16.msra.mxu0 %v738_v14  ;;  %v770_v41 = vld [vmem:[%s970_s0 + $0x4c] ss:$16 sps:$4 sm:$0xff]   ;;  %v772_v42 = vld [vmem:[%s970_s0 + $0x40] ss:$16 sps:$4 sm:$0xff]   ;;  %v773_v43 = vld [vmem:[%s970_s0 + $0x48] ss:$16 sps:$4 sm:$0xff]  }
  0x11   :  { %691 = vmatpush3.bf16.msra.mxu1 %v739_v15  ;;  %652 = vmatprep.subr.bf16.mxu0 %v740_v16  ;;  %v774_v44 = vld [vmem:[%s970_s0 + $0x64] ss:$16 sps:$4 sm:$0xff]   ;;  %v776_v45 = vld [vmem:[%s970_s0 + $0x6c] ss:$16 sps:$4 sm:$0xff]   ;;  %v778_v46 = vld [vmem:[%s970_s0 + $0x60] ss:$16 sps:$4 sm:$0xff]  }
  0x12   :  { %692 = vmatprep.subr.bf16.mxu1 %v741_v17  ;;  %v779_v47 = vld [vmem:[%s970_s0 + $0x68] ss:$16 sps:$4 sm:$0xff]  }
  0x14   :  { %653 = vmatpush3.bf16.msra.mxu0 %v742_v18 }
  0x15   :  { %693 = vmatpush3.bf16.msra.mxu1 %v743_v19  ;;  %654 = vmatprep.subr.bf16.mxu0 %v744_v20 }
  0x16   :  { %694 = vmatprep.subr.bf16.mxu1 %v745_v21 }
  0x18   :  { %655 = vmatpush3.bf16.msra.mxu0 %v746_v22 }
  0x19   :  { %695 = vmatpush3.bf16.msra.mxu1 %v747_v23  ;;  %656 = vmatprep.subr.bf16.mxu0 %v748_v24 }
  0x1a   :  { %696 = vmatprep.subr.bf16.mxu1 %v749_v25 }
  0x1c   :  { %657 = vmatpush3.bf16.msra.mxu0 %v750_v26 }
  0x1d   :  { %697 = vmatpush3.bf16.msra.mxu1 %v751_v27  ;;  %658 = vmatprep.subr.bf16.mxu0 %v752_v28 }
  0x1e   :  { %698 = vmatprep.subr.bf16.mxu1 %v753_v29 }
  0x20   :  { %659 = vmatpush3.bf16.msra.mxu0 %v754_v30 }
  0x21   :  { %699 = vmatpush3.bf16.msra.mxu1 %v755_v31 }
  0x23   :  { %407 = vmatmul.mubr.bf16.vlgmr.msra.gmra.mrb[0].mxu0 %v756_v32 }
  0x24   :  { %472 = vmatmul.mubr.bf16.vlgmr.msra.gmra.mrb[0].mxu1 %v759_v34  ;;  %414 = vmatprep.mubr.bf16.mxu0 %v762_v36 }
  0x25   :  { %479 = vmatprep.mubr.bf16.mxu1 %v764_v37 }
  0x2b   :  { %415 = vmatmul.mubr.bf16.gmra.mrb[4].mxu0 %v766_v38 }
  0x2c   :  { %480 = vmatmul.mubr.bf16.gmra.mrb[4].mxu1 %v767_v39  ;;  %422 = vmatprep.mubr.bf16.mxu0 %v768_v40 }
  0x2d   :  { %487 = vmatprep.mubr.bf16.mxu1 %v770_v41 }
  0x33   :  { %423 = vmatmul.mubr.bf16.gmra.mrb[8].mxu0 %v772_v42 }
  0x34   :  { %488 = vmatmul.mubr.bf16.gmra.mrb[8].mxu1 %v773_v43  ;;  %430 = vmatprep.mubr.bf16.mxu0 %v774_v44 }
  0x35   :  { %495 = vmatprep.mubr.bf16.mxu1 %v776_v45 }
  0x3b   :  { %431 = vmatmul.mubr.bf16.gmra.mrb[12].mxu0 %v778_v46 }
  0x3c   :  { %496 = vmatmul.mubr.bf16.gmra.mrb[12].mxu1 %v779_v47 }
  0xf6   :  { %v660_v48 = vpop.f32.mrb[0].mxu0 }
  0xf7   :  { %v700_v49 = vpop.f32.mrb[0].mxu1  ;;  %v661_v51 = vpop.f32.mrb[1].mxu0 }
  0xf8   :  { %v662_v52 = vadd.f32 %v661_v51, %v660_v48  ;;  %v701_v53 = vpop.f32.mrb[1].mxu1  ;;  %v663_v54 = vpop.f32.mrb[2].mxu0 }
  0xf9   :  { %v702_v55 = vadd.f32 %v701_v53, %v700_v49  ;;  %v703_v56 = vpop.f32.mrb[2].mxu1  ;;  %v664_v57 = vpop.f32.mrb[3].mxu0 }
  0xfa   :  { %v409_v58 = vadd.f32 %v662_v52, %v947_v50  ;;  %v665_v59 = vadd.f32 %v664_v57, %v663_v54  ;;  %v704_v60 = vpop.f32.mrb[3].mxu1 }
  0xfb   :  { %v705_v61 = vadd.f32 %v704_v60, %v703_v56 }
  0xfc   :  { %v474_v62 = vadd.f32 %v702_v55, %v409_v58  ;;  %v412_v63 = vadd.f32 %v665_v59, %v947_v50 }
  0xfe   :  { %v477_v0 = vadd.f32 %v705_v61, %v412_v63  ;;  %v666_v1 = vpop.f32.mrb[4].mxu0  ;;  %v504_v4 = vmax.f32 %v474_v62, 0.0 }
  0xff   :  { %v706_v2 = vpop.f32.mrb[4].mxu1  ;;  %v667_v3 = vpop.f32.mrb[5].mxu0 }
 0x100   :  { %v505_v5 = vmax.f32 %v477_v0, 0.0  ;;  %v668_v6 = vadd.f32 %v667_v3, %v666_v1  ;;  %v707_v7 = vpop.f32.mrb[5].mxu1  ;;  %v669_v8 = vpop.f32.mrb[6].mxu0 }
 0x101   :  { %v708_v9 = vadd.f32 %v707_v7, %v706_v2  ;;  %v709_v10 = vpop.f32.mrb[6].mxu1  ;;  %v670_v11 = vpop.f32.mrb[7].mxu0 }
 0x102   :  { %v624_v12 = vpack.c.bf16 %v505_v5, %v504_v4  ;;  %v417_v13 = vadd.f32 %v668_v6, %v947_v50  ;;  %v671_v14 = vadd.f32 %v670_v11, %v669_v8  ;;  %v710_v15 = vpop.f32.mrb[7].mxu1 }
 0x103   :  { %v711_v16 = vadd.f32 %v710_v15, %v709_v10 }
 0x104   :  { %625 = vst [vmem:[%s972_s3] sm:$0xff] %v624_v12   ;;  %v482_v17 = vadd.f32 %v708_v9, %v417_v13  ;;  %v420_v18 = vadd.f32 %v671_v14, %v947_v50 }
 0x106   :  { %v485_v19 = vadd.f32 %v711_v16, %v420_v18  ;;  %v672_v20 = vpop.f32.mrb[8].mxu0  ;;  %v506_v23 = vmax.f32 %v482_v17, 0.0 }
 0x107   :  { %v712_v21 = vpop.f32.mrb[8].mxu1  ;;  %v673_v22 = vpop.f32.mrb[9].mxu0 }
 0x108   :  { %v507_v24 = vmax.f32 %v485_v19, 0.0  ;;  %v674_v25 = vadd.f32 %v673_v22, %v672_v20  ;;  %v713_v26 = vpop.f32.mrb[9].mxu1  ;;  %v675_v27 = vpop.f32.mrb[10].mxu0 }
 0x109   :  { %v714_v28 = vadd.f32 %v713_v26, %v712_v21  ;;  %v715_v29 = vpop.f32.mrb[10].mxu1  ;;  %v676_v30 = vpop.f32.mrb[11].mxu0 }
 0x10a   :  { %v629_v31 = vpack.c.bf16 %v507_v24, %v506_v23  ;;  %v425_v32 = vadd.f32 %v674_v25, %v947_v50  ;;  %v677_v33 = vadd.f32 %v676_v30, %v675_v27  ;;  %v716_v34 = vpop.f32.mrb[11].mxu1 }
 0x10b   :  { %v717_v35 = vadd.f32 %v716_v34, %v715_v29 }
 0x10c   :  { %641 = vst [vmem:[%s972_s3 + $0x8] sm:$0xff] %v629_v31   ;;  %v490_v36 = vadd.f32 %v714_v28, %v425_v32  ;;  %v428_v37 = vadd.f32 %v677_v33, %v947_v50 }
 0x10e   :  { %v493_v38 = vadd.f32 %v717_v35, %v428_v37  ;;  %v678_v39 = vpop.f32.mrb[12].mxu0  ;;  %v508_v42 = vmax.f32 %v490_v36, 0.0 }
 0x10f   :  { %v718_v40 = vpop.f32.mrb[12].mxu1  ;;  %v679_v41 = vpop.f32.mrb[13].mxu0 }
 0x110   :  { %v509_v43 = vmax.f32 %v493_v38, 0.0  ;;  %v680_v44 = vadd.f32 %v679_v41, %v678_v39  ;;  %v719_v45 = vpop.f32.mrb[13].mxu1  ;;  %v681_v46 = vpop.f32.mrb[14].mxu0 }
 0x111   :  { %v720_v47 = vadd.f32 %v719_v45, %v718_v40  ;;  %v721_v48 = vpop.f32.mrb[14].mxu1  ;;  %v682_v49 = vpop.f32.mrb[15].mxu0 }
 0x112   :  { %v634_v51 = vpack.c.bf16 %v509_v43, %v508_v42  ;;  %v433_v52 = vadd.f32 %v680_v44, %v947_v50  ;;  %v683_v53 = vadd.f32 %v682_v49, %v681_v46  ;;  %v722_v54 = vpop.f32.mrb[15].mxu1 }
 0x113   :  { %v723_v55 = vadd.f32 %v722_v54, %v721_v48 }
 0x114   :  { %642 = vst [vmem:[%s972_s3 + $0x10] sm:$0xff] %v634_v51   ;;  %v498_v56 = vadd.f32 %v720_v47, %v433_v52  ;;  %v436_v57 = vadd.f32 %v683_v53, %v947_v50 }
 0x116   :  { %v501_v58 = vadd.f32 %v723_v55, %v436_v57  ;;  %v510_v59 = vmax.f32 %v498_v56, 0.0 }
 0x118   :  { %v511_v60 = vmax.f32 %v501_v58, 0.0 }
 0x11a   :  { %v639_v61 = vpack.c.bf16 %v511_v60, %v510_v59 }
 0x11c   :  { %643 = vst [vmem:[%s972_s3 + $0x18] sm:$0xff] %v639_v61  }

// kernel: agent_forward.5
= control target key start
LH: loop header
LB: loop body
LE: loop exit
PB: predicated region body
PF: predicated region fallthrough
CT: control target
= control target key end

     0   :  { %v7232_v35 = vmov 0.0   ;;  %vm7233_vm0 = vmmov 0   ;;  %vm392_vm1 = vcmask 523264   ;;  %s9692_s1 = inlined_call_operand.vmem [shape: bf16[576,64], index: 1, kind: input, shape index: {}]   ;;  %s9693_s0 = inlined_call_operand.vmem [shape: bf16[9,8,576], index: 0, kind: input, shape index: {}]   ;;  %s9694_s3 = inlined_call_operand.vmem [shape: bf16[9,64,1024], index: 3, kind: input, shape index: {}]   ;;  %s9695_s2 = inlined_call_operand.vmem [shape: f32[1,64], index: 2, kind: input, shape index: {}]   ;;  %s9696_s5 = inlined_call_operand.vmem [shape: f32[1024,128], index: 5, kind: input, shape index: {}]   ;;  %s9697_s4 = inlined_call_operand.vmem [shape: f32[1,1024], index: 4, kind: input, shape index: {}]   ;;  %s9698_s6 = inlined_call_operand.vmem [shape: f32[1,128], index: 6, kind: input, shape index: {}]   ;;  %s9699_s7 = inlined_call_operand.vmem [shape: f32[8,128], index: 7, kind: output, shape index: {}]  }
   0x1   :  { %v7278_v0 = vld [vmem:[%s9692_s1 + $0x40] sm:$0xff]   ;;  %v7301_v4 = vld [vmem:[%s9692_s1 + $0x48] sm:$0xff]   ;;  %v7325_v8 = vld [vmem:[%s9692_s1 + $0x50] sm:$0xff]  }
   0x2   :  { %v7283_v1 = vld [vmem:[%s9692_s1] sm:$0xff]   ;;  %6121 = vmatprep.subr.bf16.mxu0 %v7278_v0  ;;  %v7307_v5 = vld [vmem:[%s9692_s1 + $0x8] sm:$0xff]   ;;  %v7331_v9 = vld [vmem:[%s9692_s1 + $0x10] sm:$0xff]  }
   0x3   :  { %v7289_v2 = vld [vmem:[%s9692_s1 + $0xc0] sm:$0xff]   ;;  %6122 = vmatpush3.bf16.msra.mxu0 %v7283_v1  ;;  %v7313_v6 = vld [vmem:[%s9692_s1 + $0xc8] sm:$0xff]   ;;  %v7337_v10 = vld [vmem:[%s9692_s1 + $0xd0] sm:$0xff]  }
   0x4   :  { %v7295_v3 = vld [vmem:[%s9692_s1 + $0x80] sm:$0xff]   ;;  %6143 = vmatprep.subr.bf16.mxu1 %v7289_v2  ;;  %6123 = vmatprep.subr.bf16.mxu0 %v7301_v4  ;;  %v7319_v7 = vld [vmem:[%s9692_s1 + $0x88] sm:$0xff]   ;;  %v7343_v11 = vld [vmem:[%s9692_s1 + $0x90] sm:$0xff]  }
   0x5   :  { %6144 = vmatpush3.bf16.msra.mxu1 %v7295_v3  ;;  %v7349_v12 = vld [vmem:[%s9692_s1 + $0x58] sm:$0xff]   ;;  %v7373_v16 = vld [vmem:[%s9692_s1 + $0x60] sm:$0xff]   ;;  %v7397_v20 = vld [vmem:[%s9692_s1 + $0x68] sm:$0xff]  }
   0x6   :  { %6145 = vmatprep.subr.bf16.mxu1 %v7313_v6  ;;  %v7355_v13 = vld [vmem:[%s9692_s1 + $0x18] sm:$0xff]   ;;  %v7379_v17 = vld [vmem:[%s9692_s1 + $0x20] sm:$0xff]   ;;  %v7403_v21 = vld [vmem:[%s9692_s1 + $0x28] sm:$0xff]  }
   0x7   :  { %6124 = vmatpush3.bf16.msra.mxu0 %v7307_v5  ;;  %v7361_v14 = vld [vmem:[%s9692_s1 + $0xd8] sm:$0xff]   ;;  %v7385_v18 = vld [vmem:[%s9692_s1 + $0xe0] sm:$0xff]   ;;  %v7409_v22 = vld [vmem:[%s9692_s1 + $0xe8] sm:$0xff]  }
   0x8   :  { %6125 = vmatprep.subr.bf16.mxu0 %v7325_v8  ;;  %v7367_v15 = vld [vmem:[%s9692_s1 + $0x98] sm:$0xff]   ;;  %v7391_v19 = vld [vmem:[%s9692_s1 + $0xa0] sm:$0xff]   ;;  %v7415_v23 = vld [vmem:[%s9692_s1 + $0xa8] sm:$0xff]  }
   0x9   :  { %6146 = vmatpush3.bf16.msra.mxu1 %v7319_v7  ;;  %v7421_v24 = vld [vmem:[%s9692_s1 + $0x70] sm:$0xff]   ;;  %v7445_v28 = vld [vmem:[%s9692_s1 + $0x78] sm:$0xff]   ;;  %v150_v31 = vld [vmem:[%s9693_s0] sm:$0xff] }
   0xa   :  { %6147 = vmatprep.subr.bf16.mxu1 %v7337_v10  ;;  %v7427_v25 = vld [vmem:[%s9692_s1 + $0x30] sm:$0xff]   ;;  %v7451_v29 = vld [vmem:[%s9692_s1 + $0x38] sm:$0xff]   ;;  %v5426_v32 = vcombine.low %v150_v31, %v150_v31  ;;  %v5427_v33 = vcombine.high %v150_v31, %v150_v31  ;;  %v151_v36 = vld [vmem:[%s9693_s0 + $0x8] sm:$0xff] }
   0xb   :  { %6126 = vmatpush3.bf16.msra.mxu0 %v7331_v9  ;;  %v7433_v26 = vld [vmem:[%s9692_s1 + $0xf0] sm:$0xff]   ;;  %v7457_v30 = vld [vmem:[%s9692_s1 + $0xf8] sm:$0xff]   ;;  %v5428_v37 = vcombine.low %v151_v36, %v151_v36  ;;  %v5429_v38 = vcombine.high %v151_v36, %v151_v36  ;;  %v7476_v39 = vld [vmem:[%s9692_s1 + $0x100] sm:$0xff]  }
   0xc   :  { %6127 = vmatprep.subr.bf16.mxu0 %v7349_v12  ;;  %v7439_v27 = vld [vmem:[%s9692_s1 + $0xb0] sm:$0xff]   ;;  %v7467_v34 = vld [vmem:[%s9692_s1 + $0xb8] sm:$0xff]   ;;  %428 = vmatprep.mubr.bf16.mxu0 %v5427_v33  ;;  %v7483_v40 = vld [vmem:[%s9692_s1 + $0x108] sm:$0xff]  }
   0xd   :  { %6148 = vmatpush3.bf16.msra.mxu1 %v7343_v11  ;;  %468 = vmatprep.mubr.bf16.mxu1 %v5429_v38  ;;  %v7492_v41 = vld [vmem:[%s9692_s1 + $0x110] sm:$0xff]   ;;  %v7499_v42 = vld [vmem:[%s9692_s1 + $0x118] sm:$0xff]   ;;  %v518_v44 = vld [vmem:[%s9694_s3] sm:$0xff] }
   0xe   :  { %6149 = vmatprep.subr.bf16.mxu1 %v7361_v14  ;;  %v7117_v43 = vld [vmem:[%s9693_s0 + $0x10] ss:$0 sps:$4 sm:$0xff]   ;;  %v522_v45 = vld [vmem:[%s9694_s3 + $0x20] sm:$0xff]  ;;  %v519_v46 = vld [vmem:[%s9694_s3 + $0x8] sm:$0xff] }
   0xf   :  { %6128 = vmatpush3.bf16.msra.mxu0 %v7355_v13  ;;  %v5468_v47 = vcombine.low %v518_v44, %v522_v45  ;;  %v5469_v48 = vcombine.high %v518_v44, %v522_v45  ;;  %v523_v49 = vld [vmem:[%s9694_s3 + $0x28] sm:$0xff]  ;;  %v526_v50 = vld [vmem:[%s9694_s3 + $0x40] sm:$0xff] }
  0x10   :  { %6129 = vmatprep.subr.bf16.mxu0 %v7373_v16  ;;  %v530_v51 = vld [vmem:[%s9694_s3 + $0x60] sm:$0xff]  ;;  %v5470_v52 = vcombine.low %v519_v46, %v523_v49  ;;  %v5471_v53 = vcombine.high %v519_v46, %v523_v49  ;;  %v527_v55 = vld [vmem:[%s9694_s3 + $0x48] sm:$0xff]  ;;  %v520_v49 = vld [vmem:[%s9694_s3 + $0x10] sm:$0xff] }
  0x11   :  { %6150 = vmatpush3.bf16.msra.mxu1 %v7367_v15  ;;  %v5477_v54 = vcombine.high %v526_v50, %v530_v51  ;;  %v531_v56 = vld [vmem:[%s9694_s3 + $0x68] sm:$0xff]  ;;  %v534_v57 = vld [vmem:[%s9694_s3 + $0x80] sm:$0xff]  ;;  %v5476_v62 = vcombine.low %v526_v50, %v530_v51  ;;  %v524_v50 = vld [vmem:[%s9694_s3 + $0x30] sm:$0xff] }
  0x12   :  { %6151 = vmatprep.subr.bf16.mxu1 %v7385_v18  ;;  %v5479_v58 = vcombine.high %v527_v55, %v531_v56  ;;  %v538_v59 = vld [vmem:[%s9694_s3 + $0xa0] sm:$0xff]  ;;  %v535_v60 = vld [vmem:[%s9694_s3 + $0x88] sm:$0xff]  ;;  %v5478_v63 = vcombine.low %v527_v55, %v531_v56  ;;  %v521_v51 = vld [vmem:[%s9694_s3 + $0x18] sm:$0xff] }
  0x13   :  { %6130 = vmatpush3.bf16.msra.mxu0 %v7379_v17  ;;  %v539_v61 = vld [vmem:[%s9694_s3 + $0xa8] sm:$0xff]  ;;  %v5485_v31 = vcombine.high %v534_v57, %v538_v59  ;;  %v5484_v33 = vcombine.low %v534_v57, %v538_v59  ;;  %v546_v38 = vld [vmem:[%s9694_s3 + $0xe0] sm:$0xff]  ;;  %v7234_v57 = vmov 0  }
  0x14   :  { %6131 = vmatprep.subr.bf16.mxu0 %v7397_v20  ;;  %v5486_v36 = vcombine.low %v535_v60, %v539_v61  ;;  %v547_v45 = vld [vmem:[%s9694_s3 + $0xe8] sm:$0xff]  ;;  %v7572_v59 = vld [vmem:[%s9695_s2] ss:$0 sm:$0xff] }
  0x15   :  { %6152 = vmatpush3.bf16.msra.mxu1 %v7391_v19 }
  0x16   :  { %6153 = vmatprep.subr.bf16.mxu1 %v7409_v22 }
  0x17   :  { %6132 = vmatpush3.bf16.msra.mxu0 %v7403_v21 }
  0x18   :  { %6133 = vmatprep.subr.bf16.mxu0 %v7421_v24 }
  0x19   :  { %6154 = vmatpush3.bf16.msra.mxu1 %v7415_v23 }
  0x1a   :  { %6155 = vmatprep.subr.bf16.mxu1 %v7433_v26 }
  0x1b   :  { %6134 = vmatpush3.bf16.msra.mxu0 %v7427_v25 }
  0x1c   :  { %6135 = vmatprep.subr.bf16.mxu0 %v7445_v28 }
  0x1d   :  { %6156 = vmatpush3.bf16.msra.mxu1 %v7439_v27 }
  0x1e   :  { %6157 = vmatprep.subr.bf16.mxu1 %v7457_v30 }
  0x1f   :  { %6136 = vmatpush3.bf16.msra.mxu0 %v7451_v29 }
  0x20   :  { %6702 = vmatprep.subr.bf16.mxu0 %v7232_v35 }
  0x21   :  { %6158 = vmatpush3.bf16.msra.mxu1 %v7467_v34 }
  0x22   :  { %429 = vmatmul.mubr.bf16.vlgmr.msra.gmra.mrb[0].mxu0 %v5426_v32  ;;  %713 = vmatprep.subr.bf16.mxu1 %v5469_v48  ;;  %v5487_v32 = vcombine.high %v535_v60, %v539_v61 }
  0x23   :  { %6703 = vmatpush3.bf16.msra.mxu0 %v7476_v39  ;;  %6710 = vmatprep.mubr.msk.bf16.mxu0 %vm7233_vm0, %v7232_v35 }
  0x24   :  { %469 = vmatmul.mubr.bf16.vlgmr.msra.gmra.mrb[0].mxu1 %v5428_v37  ;;  %6704 = vmatprep.subr.bf16.mxu0 %v7232_v35  ;;  %v542_v37 = vld [vmem:[%s9694_s3 + $0xc0] sm:$0xff] }
  0x25   :  { %714 = vmatpush1.bf16.msra.mxu1 %v5468_v47  ;;  %v5493_v44 = vcombine.high %v542_v37, %v546_v38  ;;  %v5492_v46 = vcombine.low %v542_v37, %v546_v38  ;;  %745 = vmatprep.mubr.bf16.mxu1 %v7234_v57 }
  0x26   :  { %715 = vmatprep.subr.bf16.mxu1 %v5477_v54  ;;  %v5472_v54 = vcombine.low %v520_v49, %v524_v50 }
  0x27   :  { %6705 = vmatpush3.bf16.msra.mxu0 %v7483_v40 }
  0x28   :  { %6706 = vmatprep.subr.bf16.mxu0 %v7232_v35 }
  0x29   :  { %716 = vmatpush1.bf16.msra.mxu1 %v5476_v62 }
  0x2a   :  { %717 = vmatprep.subr.bf16.mxu1 %v5485_v31 }
  0x2b   :  { %6707 = vmatpush3.bf16.msra.mxu0 %v7492_v41 }
  0x2c   :  { %6708 = vmatprep.subr.bf16.mxu0 %v7232_v35 }
  0x2d   :  { %718 = vmatpush1.bf16.msra.mxu1 %v5484_v33 }
  0x2e   :  { %719 = vmatprep.subr.bf16.mxu1 %v5493_v44 }
  0x2f   :  { %6709 = vmatpush3.bf16.msra.mxu0 %v7499_v42 }
  0x30   :  { %754 = vmatprep.subr.bf16.mxu0 %v5471_v53  ;;  %v525_v53 = vld [vmem:[%s9694_s3 + $0x38] sm:$0xff] }
  0x31   :  { %720 = vmatpush1.bf16.msra.mxu1 %v5492_v46  ;;  %v5474_v55 = vcombine.low %v521_v51, %v525_v53  ;;  %v5475_v56 = vcombine.high %v521_v51, %v525_v53  ;;  %v533_v51 = vld [vmem:[%s9694_s3 + $0x78] sm:$0xff] }
  0x32   :  { %6711 = vmatmul.mubr.msk.bf16.vlgmr.msra.gmra.mrb[4].mxu0 %vm392_vm1, %v7117_v43  ;;  %v543_v43 = vld [vmem:[%s9694_s3 + $0xc8] sm:$0xff] }
  0x33   :  { %755 = vmatpush1.bf16.msra.mxu0 %v5470_v52  ;;  %v5494_v47 = vcombine.low %v543_v43, %v547_v45  ;;  %v5495_v48 = vcombine.high %v543_v43, %v547_v45  ;;  %v5473_v52 = vcombine.high %v520_v49, %v524_v50  ;;  %786 = vmatprep.mubr.bf16.mxu0 %v7234_v57  ;;  %v532_v49 = vld [vmem:[%s9694_s3 + $0x70] sm:$0xff]  ;;  %v529_v50 = vld [vmem:[%s9694_s3 + $0x58] sm:$0xff] }
  0x34   :  { %756 = vmatprep.subr.bf16.mxu0 %v5479_v58 }
  0x35   :  { %795 = vmatprep.subr.bf16.mxu1 %v5473_v52 }
  0x37   :  { %757 = vmatpush1.bf16.msra.mxu0 %v5478_v63 }
  0x38   :  { %758 = vmatprep.subr.bf16.mxu0 %v5487_v32 }
  0x3b   :  { %759 = vmatpush1.bf16.msra.mxu0 %v5486_v36 }
  0x3c   :  { %760 = vmatprep.subr.bf16.mxu0 %v5495_v48 }
  0x3f   :  { %761 = vmatpush1.bf16.msra.mxu0 %v5494_v47  ;;  %v528_v47 = vld [vmem:[%s9694_s3 + $0x50] sm:$0xff] }
  0x40   :  { %836 = vmatprep.subr.bf16.mxu0 %v5475_v56 }
  0xf5   :  { %v6137_v58 = vpop.f32.mrb[0].mxu0 }
  0xf6   :  { %v6138_v60 = vpop.f32.mrb[1].mxu0 }
  0xf7   :  { %v6139_v61 = vadd.f32 %v6138_v60, %v6137_v58  ;;  %v6140_v62 = vpop.f32.mrb[2].mxu0  ;;  %v6159_v63 = vpop.f32.mrb[0].mxu1  ;;  %v5481_v58 = vcombine.high %v528_v47, %v532_v49  ;;  %v5483_v60 = vcombine.high %v529_v50, %v533_v51 }
  0xf8   :  { %v6141_v31 = vpop.f32.mrb[3].mxu0  ;;  %v6160_v32 = vpop.f32.mrb[1].mxu1  ;;  %v540_v62 = vld [vmem:[%s9694_s3 + $0xb0] sm:$0xff] }
  0xf9   :  { %v431_v33 = vadd.f32 %v6139_v61, %v7572_v59  ;;  %v6161_v36 = vadd.f32 %v6160_v32, %v6159_v63  ;;  %v6162_v37 = vpop.f32.mrb[2].mxu1  ;;  %v536_v61 = vld [vmem:[%s9694_s3 + $0x90] sm:$0xff]  ;;  %v537_v63 = vld [vmem:[%s9694_s3 + $0x98] sm:$0xff]  ;;  %v5480_v32 = vcombine.low %v528_v47, %v532_v49 }
  0xfa   :  { %v6163_v38 = vpop.f32.mrb[3].mxu1  ;;  %v541_v31 = vld [vmem:[%s9694_s3 + $0xb8] sm:$0xff] }
  0xfb   :  { %v471_v43 = vadd.f32 %v6161_v36, %v431_v33  ;;  %v5482_v33 = vcombine.low %v529_v50, %v533_v51  ;;  %v5489_v36 = vcombine.high %v536_v61, %v540_v62  ;;  %v5491_v37 = vcombine.high %v537_v63, %v541_v31  ;;  %v544_v38 = vld [vmem:[%s9694_s3 + $0xd0] sm:$0xff]  ;;  %v5505_v51 = vld [vmem:[%s9693_s0 + $0x1c] sm:$0xff] }
  0xfc   :  { %v5504_v50 = vld [vmem:[%s9693_s0 + $0x14] sm:$0xff] }
 0x105   :  { %v510_v44 = vpop.f32.mrb[4].mxu0 }
 0x106   :  { %v511_v45 = vadd.f32 %v510_v44, %v471_v43  ;;  %v6712_v46 = vpop.f32.mrb[5].mxu0  ;;  %v548_v43 = vld [vmem:[%s9694_s3 + $0xf0] sm:$0xff]  ;;  %v545_v44 = vld [vmem:[%s9694_s3 + $0xd8] sm:$0xff] }
 0x107   :  { %v513_v48 = vpop.f32.mrb[6].mxu0  ;;  %v5497_v46 = vcombine.high %v544_v38, %v548_v43 }
 0x108   :  { %v516_v52 = vmax.f32 %v511_v45, 0.0  ;;  %v6713_v53 = vpop.f32.mrb[7].mxu0  ;;  %v5490_v45 = vcombine.low %v537_v63, %v541_v31  ;;  %v5496_v48 = vcombine.low %v544_v38, %v548_v43  ;;  %v5514_v63 = vld [vmem:[%s9694_s3 + $0x108] sm:$0xff] }
 0x109   :  { %v5510_v53 = vcombine.high %v5505_v51, %v5505_v51 }
 0x10a   :  { %v517_v56 = vpack.c.bf16 %v516_v52, %v516_v52  ;;  %v5508_v52 = vcombine.high %v5504_v50, %v5504_v50 }
 0x10c   :  { %5500 = vmatmul.mubr.msk.bf16.vlgmr.msra.gmra.mrb[4].mxu1 %vm392_vm1, %v517_v56  ;;  %5501 = vmatmul.mubr.msk.bf16.vlgmr.msra.gmra.mrb[8].mxu0 %vm392_vm1, %v517_v56 }
 0x10d   :  { %796 = vmatpush1.bf16.msra.mxu1 %v5472_v54  ;;  %837 = vmatpush1.bf16.msra.mxu0 %v5474_v55  ;;  %v549_v54 = vld [vmem:[%s9694_s3 + $0xf8] sm:$0xff]  ;;  %v5488_v55 = vcombine.low %v536_v61, %v540_v62  ;;  %v5513_v61 = vld [vmem:[%s9694_s3 + $0x100] sm:$0xff] }
 0x10e   :  { %797 = vmatprep.subr.bf16.mxu1 %v5481_v58  ;;  %838 = vmatprep.subr.bf16.mxu0 %v5483_v60  ;;  %v5499_v47 = vcombine.high %v545_v44, %v549_v54  ;;  %v5498_v49 = vcombine.low %v545_v44, %v549_v54  ;;  %v5509_v58 = vcombine.low %v5505_v51, %v5505_v51  ;;  %v7122_v60 = vld [vmem:[%s9693_s0 + $0x24] ss:$0 sps:$4 sm:$0xff]   ;;  %v5522_v54 = vld [vmem:[%s9694_s3 + $0x148] sm:$0xff] }
 0x10f   :  { %827 = vmatprep.mubr.bf16.mxu1 %v7234_v57  ;;  %868 = vmatprep.mubr.bf16.mxu0 %v7234_v57  ;;  %v5517_v62 = vld [vmem:[%s9694_s3 + $0x120] sm:$0xff] }
 0x110   :  { %v5545_v31 = vcombine.low %v5513_v61, %v5517_v62 }
 0x111   :  { %798 = vmatpush1.bf16.msra.mxu1 %v5480_v32  ;;  %839 = vmatpush1.bf16.msra.mxu0 %v5482_v33  ;;  %v5546_v32 = vcombine.high %v5513_v61, %v5517_v62  ;;  %v5518_v33 = vld [vmem:[%s9694_s3 + $0x128] sm:$0xff]  ;;  %v5541_v61 = vld [vmem:[%s9694_s3 + $0x1e0] sm:$0xff] }
 0x112   :  { %799 = vmatprep.subr.bf16.mxu1 %v5489_v36  ;;  %840 = vmatprep.subr.bf16.mxu0 %v5491_v37  ;;  %v5521_v36 = vld [vmem:[%s9694_s3 + $0x140] sm:$0xff]  ;;  %v5547_v38 = vcombine.low %v5514_v63, %v5518_v33  ;;  %v5548_v43 = vcombine.high %v5514_v63, %v5518_v33  ;;  %v5538_v62 = vld [vmem:[%s9694_s3 + $0x1c8] sm:$0xff] }
 0x113   :  { %v5525_v37 = vld [vmem:[%s9694_s3 + $0x160] sm:$0xff] }
 0x114   :  { %v5554_v44 = vcombine.high %v5521_v36, %v5525_v37 }
 0x115   :  { %800 = vmatpush1.bf16.msra.mxu1 %v5488_v55  ;;  %841 = vmatpush1.bf16.msra.mxu0 %v5490_v45  ;;  %v5526_v55 = vld [vmem:[%s9694_s3 + $0x168] sm:$0xff]  ;;  %v5529_v45 = vld [vmem:[%s9694_s3 + $0x180] sm:$0xff] }
 0x116   :  { %801 = vmatprep.subr.bf16.mxu1 %v5497_v46  ;;  %842 = vmatprep.subr.bf16.mxu0 %v5499_v47  ;;  %v5556_v46 = vcombine.high %v5522_v54, %v5526_v55  ;;  %v5533_v47 = vld [vmem:[%s9694_s3 + $0x1a0] sm:$0xff]  ;;  %v5555_v51 = vcombine.low %v5522_v54, %v5526_v55  ;;  %v5520_v54 = vld [vmem:[%s9694_s3 + $0x138] sm:$0xff] }
 0x119   :  { %802 = vmatpush1.bf16.msra.mxu1 %v5496_v48  ;;  %843 = vmatpush1.bf16.msra.mxu0 %v5498_v49  ;;  %v5530_v48 = vld [vmem:[%s9694_s3 + $0x188] sm:$0xff] }
 0x11a   :  { %6170 = vmatprep.subr.bf16.mxu1 %v7278_v0  ;;  %6192 = vmatprep.subr.bf16.mxu0 %v7289_v2  ;;  %v5534_v49 = vld [vmem:[%s9694_s3 + $0x1a8] sm:$0xff] }
 0x11c   :  { %5502 = vmatmul.mubr.msk.bf16.vlgmr.msra.gmra.mrb[8].mxu1 %vm392_vm1, %v517_v56  ;;  %5503 = vmatmul.mubr.msk.bf16.vlgmr.msra.gmra.mrb[12].mxu0 %vm392_vm1, %v517_v56  ;;  %v5507_v56 = vcombine.low %v5504_v50, %v5504_v50  ;;  %v5553_v50 = vcombine.low %v5521_v36, %v5525_v37  ;;  %v5515_v37 = vld [vmem:[%s9694_s3 + $0x110] sm:$0xff] }
 0x11d   :  { %6171 = vmatpush3.bf16.msra.mxu1 %v7283_v1  ;;  %6193 = vmatpush3.bf16.msra.mxu0 %v7295_v3 }
 0x11e   :  { %6172 = vmatprep.subr.bf16.mxu1 %v7301_v4  ;;  %6194 = vmatprep.subr.bf16.mxu0 %v7313_v6 }
 0x11f   :  { %941 = vmatprep.mubr.bf16.mxu1 %v5508_v52  ;;  %981 = vmatprep.mubr.bf16.mxu0 %v5510_v53  ;;  %v5562_v52 = vcombine.high %v5529_v45, %v5533_v47  ;;  %v5564_v53 = vcombine.high %v5530_v48, %v5534_v49 }
 0x121   :  { %6173 = vmatpush3.bf16.msra.mxu1 %v7307_v5  ;;  %6195 = vmatpush3.bf16.msra.mxu0 %v7319_v7 }
 0x122   :  { %6174 = vmatprep.subr.bf16.mxu1 %v7325_v8  ;;  %6196 = vmatprep.subr.bf16.mxu0 %v7337_v10 }
 0x125   :  { %6175 = vmatpush3.bf16.msra.mxu1 %v7331_v9  ;;  %6197 = vmatpush3.bf16.msra.mxu0 %v7343_v11 }
 0x126   :  { %6176 = vmatprep.subr.bf16.mxu1 %v7349_v12  ;;  %6198 = vmatprep.subr.bf16.mxu0 %v7361_v14 }
 0x129   :  { %6177 = vmatpush3.bf16.msra.mxu1 %v7355_v13  ;;  %6199 = vmatpush3.bf16.msra.mxu0 %v7367_v15 }
 0x12a   :  { %6178 = vmatprep.subr.bf16.mxu1 %v7373_v16  ;;  %6200 = vmatprep.subr.bf16.mxu0 %v7385_v18 }
 0x12d   :  { %6179 = vmatpush3.bf16.msra.mxu1 %v7379_v17  ;;  %6201 = vmatpush3.bf16.msra.mxu0 %v7391_v19 }
 0x12e   :  { %6180 = vmatprep.subr.bf16.mxu1 %v7397_v20  ;;  %6202 = vmatprep.subr.bf16.mxu0 %v7409_v22 }
 0x131   :  { %6181 = vmatpush3.bf16.msra.mxu1 %v7403_v21  ;;  %6203 = vmatpush3.bf16.msra.mxu0 %v7415_v23 }
 0x132   :  { %6182 = vmatprep.subr.bf16.mxu1 %v7421_v24  ;;  %6204 = vmatprep.subr.bf16.mxu0 %v7433_v26 }
 0x135   :  { %6183 = vmatpush3.bf16.msra.mxu1 %v7427_v25  ;;  %6205 = vmatpush3.bf16.msra.mxu0 %v7439_v27 }
 0x136   :  { %6184 = vmatprep.subr.bf16.mxu1 %v7445_v28  ;;  %6206 = vmatprep.subr.bf16.mxu0 %v7457_v30 }
 0x139   :  { %6185 = vmatpush3.bf16.msra.mxu1 %v7451_v29  ;;  %6207 = vmatpush3.bf16.msra.mxu0 %v7467_v34 }
 0x13a   :  { %6714 = vmatprep.subr.bf16.mxu1 %v7232_v35  ;;  %1268 = vmatprep.subr.bf16.mxu0 %v5548_v43  ;;  %v5516_v43 = vld [vmem:[%s9694_s3 + $0x118] sm:$0xff] }
 0x13c   :  { %942 = vmatmul.mubr.bf16.vlgmr.msra.gmra.mrb[12].mxu1 %v5507_v56  ;;  %982 = vmatmul.mubr.bf16.vlgmr.msra.gmra.mrb[16].mxu0 %v5509_v58  ;;  %v5561_v56 = vcombine.low %v5529_v45, %v5533_v47  ;;  %v5563_v58 = vcombine.low %v5530_v48, %v5534_v49  ;;  %v5551_v45 = vcombine.low %v5516_v43, %v5520_v54 }
 0x13d   :  { %6715 = vmatpush3.bf16.msra.mxu1 %v7476_v39  ;;  %6722 = vmatprep.mubr.msk.bf16.mxu1 %vm7233_vm0, %v7232_v35 }
 0x13e   :  { %6716 = vmatprep.subr.bf16.mxu1 %v7232_v35  ;;  %1300 = vmatprep.mubr.bf16.mxu0 %v7234_v57 }
 0x13f   :  { %1269 = vmatpush1.bf16.msra.mxu0 %v5547_v38  ;;  %v5519_v38 = vld [vmem:[%s9694_s3 + $0x130] sm:$0xff] }
 0x140   :  { %1270 = vmatprep.subr.bf16.mxu0 %v5556_v46  ;;  %v5549_v55 = vcombine.low %v5515_v37, %v5519_v38  ;;  %v5552_v46 = vcombine.high %v5516_v43, %v5520_v54  ;;  %v5528_v43 = vld [vmem:[%s9694_s3 + $0x178] sm:$0xff] }
 0x141   :  { %6717 = vmatpush3.bf16.msra.mxu1 %v7483_v40 }
 0x142   :  { %6718 = vmatprep.subr.bf16.mxu1 %v7232_v35 }
 0x143   :  { %1271 = vmatpush1.bf16.msra.mxu0 %v5555_v51 }
 0x144   :  { %1272 = vmatprep.subr.bf16.mxu0 %v5564_v53 }
 0x145   :  { %6719 = vmatpush3.bf16.msra.mxu1 %v7492_v41 }
 0x146   :  { %6720 = vmatprep.subr.bf16.mxu1 %v7232_v35 }
 0x147   :  { %1273 = vmatpush1.bf16.msra.mxu0 %v5563_v58 }
 0x149   :  { %6721 = vmatpush3.bf16.msra.mxu1 %v7499_v42 }
 0x14a   :  { %1227 = vmatprep.subr.bf16.mxu1 %v5546_v32 }
 0x14c   :  { %6723 = vmatmul.mubr.msk.bf16.vlgmr.msra.gmra.mrb[16].mxu1 %vm392_vm1, %v7122_v60  ;;  %v5537_v60 = vld [vmem:[%s9694_s3 + $0x1c0] sm:$0xff] }
 0x14d   :  { %1259 = vmatprep.mubr.bf16.mxu1 %v7234_v57  ;;  %1228 = vmatpush1.bf16.msra.mxu1 %v5545_v31  ;;  %v5570_v63 = vcombine.high %v5537_v60, %v5541_v61  ;;  %v5542_v31 = vld [vmem:[%s9694_s3 + $0x1e8] sm:$0xff]  ;;  %v5569_v32 = vcombine.low %v5537_v60, %v5541_v61 }
 0x14e   :  { %1229 = vmatprep.subr.bf16.mxu1 %v5554_v44  ;;  %v5571_v33 = vcombine.low %v5538_v62, %v5542_v31  ;;  %v5572_v36 = vcombine.high %v5538_v62, %v5542_v31  ;;  %v5550_v44 = vcombine.high %v5515_v37, %v5519_v38  ;;  %v5527_v37 = vld [vmem:[%s9694_s3 + $0x170] sm:$0xff]  ;;  %v5524_v38 = vld [vmem:[%s9694_s3 + $0x158] sm:$0xff] }
 0x150   :  { %1274 = vmatprep.subr.bf16.mxu0 %v5572_v36 }
 0x151   :  { %1230 = vmatpush1.bf16.msra.mxu1 %v5553_v50  ;;  %1275 = vmatpush1.bf16.msra.mxu0 %v5571_v33  ;;  %v5523_v33 = vld [vmem:[%s9694_s3 + $0x150] sm:$0xff] }
 0x152   :  { %1231 = vmatprep.subr.bf16.mxu1 %v5562_v52  ;;  %1350 = vmatprep.subr.bf16.mxu0 %v5552_v46 }
 0x155   :  { %1232 = vmatpush1.bf16.msra.mxu1 %v5561_v56 }
 0x156   :  { %1233 = vmatprep.subr.bf16.mxu1 %v5570_v63 }
 0x159   :  { %1234 = vmatpush1.bf16.msra.mxu1 %v5569_v32 }
 0x15a   :  { %1309 = vmatprep.subr.bf16.mxu1 %v5550_v44 }
 0x20f   :  { %v6186_v47 = vpop.f32.mrb[12].mxu1  ;;  %v6208_v48 = vpop.f32.mrb[16].mxu0 }
 0x210   :  { %v6187_v49 = vpop.f32.mrb[13].mxu1  ;;  %v6209_v50 = vpop.f32.mrb[17].mxu0 }
 0x211   :  { %v6188_v51 = vadd.f32 %v6187_v49, %v6186_v47  ;;  %v6189_v52 = vpop.f32.mrb[14].mxu1  ;;  %v6210_v53 = vadd.f32 %v6209_v50, %v6208_v48  ;;  %v6211_v56 = vpop.f32.mrb[18].mxu0  ;;  %v5558_v47 = vcombine.high %v5523_v33, %v5527_v37  ;;  %v5560_v48 = vcombine.high %v5524_v38, %v5528_v43  ;;  %v5531_v49 = vld [vmem:[%s9694_s3 + $0x190] sm:$0xff] }
 0x212   :  { %v6190_v58 = vpop.f32.mrb[15].mxu1  ;;  %v6212_v60 = vpop.f32.mrb[19].mxu0  ;;  %v5535_v50 = vld [vmem:[%s9694_s3 + $0x1b0] sm:$0xff]  ;;  %v5536_v52 = vld [vmem:[%s9694_s3 + $0x1b8] sm:$0xff]  ;;  %v5559_v56 = vcombine.low %v5524_v38, %v5528_v43  ;;  %v5581_v38 = vld [vmem:[%s9693_s0 + $0x28] sm:$0xff] }
 0x213   :  { %v944_v61 = vadd.f32 %v6188_v51, %v7572_v59  ;;  %v5532_v51 = vld [vmem:[%s9694_s3 + $0x198] sm:$0xff]  ;;  %v5566_v58 = vcombine.high %v5531_v49, %v5535_v50  ;;  %v5582_v43 = vld [vmem:[%s9693_s0 + $0x30] sm:$0xff] }
 0x214   :  { %v5568_v60 = vcombine.high %v5532_v51, %v5536_v52 }
 0x215   :  { %v984_v62 = vadd.f32 %v6210_v53, %v944_v61  ;;  %v5557_v53 = vcombine.low %v5523_v33, %v5527_v37  ;;  %v5539_v61 = vld [vmem:[%s9694_s3 + $0x1d0] sm:$0xff] }
 0x21f   :  { %v1023_v63 = vpop.f32.mrb[16].mxu1 }
 0x220   :  { %v1024_v31 = vadd.f32 %v1023_v63, %v984_v62  ;;  %v6724_v32 = vpop.f32.mrb[17].mxu1  ;;  %v5543_v62 = vld [vmem:[%s9694_s3 + $0x1f0] sm:$0xff]  ;;  %v5540_v63 = vld [vmem:[%s9694_s3 + $0x1d8] sm:$0xff] }
 0x221   :  { %v1026_v36 = vpop.f32.mrb[18].mxu1  ;;  %v5574_v32 = vcombine.high %v5539_v61, %v5543_v62 }
 0x222   :  { %v1029_v44 = vmax.f32 %v1024_v31, 0.0  ;;  %v6725_v54 = vpop.f32.mrb[19].mxu1  ;;  %v5567_v31 = vcombine.low %v5532_v51, %v5536_v52  ;;  %v5573_v36 = vcombine.low %v5539_v61, %v5543_v62 }
 0x223   :  { %v5587_v54 = vcombine.high %v5582_v43, %v5582_v43 }
 0x224   :  { %v1030_v46 = vpack.c.bf16 %v1029_v44, %v1029_v44  ;;  %v5585_v44 = vcombine.high %v5581_v38, %v5581_v38 }
 0x226   :  { %5577 = vmatmul.mubr.msk.bf16.vlgmr.msra.gmra.mrb[4].mxu1 %vm392_vm1, %v1030_v46  ;;  %5578 = vmatmul.mubr.msk.bf16.vlgmr.msra.gmra.mrb[8].mxu0 %vm392_vm1, %v1030_v46 }
 0x227   :  { %1310 = vmatpush1.bf16.msra.mxu1 %v5549_v55  ;;  %1351 = vmatpush1.bf16.msra.mxu0 %v5551_v45  ;;  %v5544_v55 = vld [vmem:[%s9694_s3 + $0x1f8] sm:$0xff]  ;;  %v5565_v45 = vcombine.low %v5531_v49, %v5535_v50 }
 0x228   :  { %1311 = vmatprep.subr.bf16.mxu1 %v5558_v47  ;;  %1352 = vmatprep.subr.bf16.mxu0 %v5560_v48  ;;  %v5576_v33 = vcombine.high %v5540_v63, %v5544_v55  ;;  %v5575_v37 = vcombine.low %v5540_v63, %v5544_v55  ;;  %v5593_v47 = vld [vmem:[%s9694_s3 + $0x218] sm:$0xff] }
 0x229   :  { %1341 = vmatprep.mubr.bf16.mxu1 %v7234_v57  ;;  %1382 = vmatprep.mubr.bf16.mxu0 %v7234_v57  ;;  %v5597_v49 = vld [vmem:[%s9694_s3 + $0x238] sm:$0xff] }
 0x22a   :  { %v5628_v51 = vcombine.low %v5593_v47, %v5597_v49  ;;  %v5629_v52 = vcombine.high %v5593_v47, %v5597_v49  ;;  %v8002_v47 = vld [vmem:[%s9692_s1 + $0xd0] sm:$0xff]  }
 0x22b   :  { %1312 = vmatpush1.bf16.msra.mxu1 %v5557_v53  ;;  %1353 = vmatpush1.bf16.msra.mxu0 %v5559_v56  ;;  %v8014_v49 = vld [vmem:[%s9692_s1 + $0x90] sm:$0xff]  }
 0x22c   :  { %1313 = vmatprep.subr.bf16.mxu1 %v5566_v58  ;;  %1354 = vmatprep.subr.bf16.mxu0 %v5568_v60 }
 0x22f   :  { %1314 = vmatpush1.bf16.msra.mxu1 %v5565_v45  ;;  %1355 = vmatpush1.bf16.msra.mxu0 %v5567_v31 }
 0x230   :  { %1315 = vmatprep.subr.bf16.mxu1 %v5574_v32  ;;  %1356 = vmatprep.subr.bf16.mxu0 %v5576_v33 }
 0x233   :  { %1316 = vmatpush1.bf16.msra.mxu1 %v5573_v36  ;;  %1357 = vmatpush1.bf16.msra.mxu0 %v5575_v37 }
 0x234   :  { %6219 = vmatprep.subr.bf16.mxu0 %v7278_v0  ;;  %6241 = vmatprep.subr.bf16.mxu1 %v7289_v2  ;;  %v5584_v0 = vcombine.low %v5581_v38, %v5581_v38  ;;  %v7127_v2 = vld [vmem:[%s9693_s0 + $0x38] ss:$0 sps:$4 sm:$0xff]  }
 0x236   :  { %5579 = vmatmul.mubr.msk.bf16.vlgmr.msra.gmra.mrb[8].mxu1 %vm392_vm1, %v1030_v46  ;;  %5580 = vmatmul.mubr.msk.bf16.vlgmr.msra.gmra.mrb[12].mxu0 %vm392_vm1, %v1030_v46  ;;  %v5596_v46 = vld [vmem:[%s9694_s3 + $0x230] sm:$0xff] }
 0x237   :  { %6220 = vmatpush3.bf16.msra.mxu0 %v7283_v1  ;;  %6242 = vmatpush3.bf16.msra.mxu1 %v7295_v3  ;;  %v5586_v1 = vcombine.low %v5582_v43, %v5582_v43  ;;  %v5590_v3 = vld [vmem:[%s9694_s3 + $0x200] sm:$0xff]  ;;  %v5600_v43 = vld [vmem:[%s9694_s3 + $0x250] sm:$0xff] }
 0x238   :  { %6221 = vmatprep.subr.bf16.mxu0 %v7301_v4  ;;  %6243 = vmatprep.subr.bf16.mxu1 %v7313_v6  ;;  %v5594_v4 = vld [vmem:[%s9694_s3 + $0x220] sm:$0xff] }
 0x239   :  { %1455 = vmatprep.mubr.bf16.mxu0 %v5585_v44  ;;  %1495 = vmatprep.mubr.bf16.mxu1 %v5587_v54  ;;  %v5622_v6 = vcombine.low %v5590_v3, %v5594_v4  ;;  %v5604_v54 = vld [vmem:[%s9694_s3 + $0x270] sm:$0xff] }
 0x23b   :  { %6222 = vmatpush3.bf16.msra.mxu0 %v7307_v5  ;;  %6244 = vmatpush3.bf16.msra.mxu1 %v7319_v7  ;;  %v5591_v5 = vld [vmem:[%s9694_s3 + $0x208] sm:$0xff]  ;;  %v5623_v7 = vcombine.high %v5590_v3, %v5594_v4  ;;  %v5635_v4 = vcombine.high %v5600_v43, %v5604_v54 }
 0x23c   :  { %6223 = vmatprep.subr.bf16.mxu0 %v7325_v8  ;;  %6245 = vmatprep.subr.bf16.mxu1 %v7337_v10  ;;  %v5595_v8 = vld [vmem:[%s9694_s3 + $0x228] sm:$0xff]  ;;  %v5602_v10 = vld [vmem:[%s9694_s3 + $0x260] sm:$0xff] }
 0x23f   :  { %6224 = vmatpush3.bf16.msra.mxu0 %v7331_v9  ;;  %6246 = vmatpush3.bf16.msra.mxu1 %v7343_v11  ;;  %v5598_v9 = vld [vmem:[%s9694_s3 + $0x240] sm:$0xff]  ;;  %v5624_v11 = vcombine.low %v5591_v5, %v5595_v8 }
 0x240   :  { %6225 = vmatprep.subr.bf16.mxu0 %v7349_v12  ;;  %6247 = vmatprep.subr.bf16.mxu1 %v7361_v14  ;;  %v5625_v12 = vcombine.high %v5591_v5, %v5595_v8  ;;  %v5599_v14 = vld [vmem:[%s9694_s3 + $0x248] sm:$0xff]  ;;  %v5609_v8 = vld [vmem:[%s9694_s3 + $0x298] sm:$0xff] }
 0x243   :  { %6226 = vmatpush3.bf16.msra.mxu0 %v7355_v13  ;;  %6248 = vmatpush3.bf16.msra.mxu1 %v7367_v15  ;;  %v5631_v13 = vcombine.high %v5598_v9, %v5602_v10  ;;  %v5603_v15 = vld [vmem:[%s9694_s3 + $0x268] sm:$0xff] }
 0x244   :  { %6227 = vmatprep.subr.bf16.mxu0 %v7373_v16  ;;  %6249 = vmatprep.subr.bf16.mxu1 %v7385_v18  ;;  %v5606_v16 = vld [vmem:[%s9694_s3 + $0x280] sm:$0xff] }
 0x245   :  { %v5610_v18 = vld [vmem:[%s9694_s3 + $0x2a0] sm:$0xff] }
 0x247   :  { %6228 = vmatpush3.bf16.msra.mxu0 %v7379_v17  ;;  %6250 = vmatpush3.bf16.msra.mxu1 %v7391_v19  ;;  %v5633_v17 = vcombine.high %v5599_v14, %v5603_v15  ;;  %v5607_v19 = vld [vmem:[%s9694_s3 + $0x288] sm:$0xff] }
 0x248   :  { %6229 = vmatprep.subr.bf16.mxu0 %v7397_v20  ;;  %6251 = vmatprep.subr.bf16.mxu1 %v7409_v22  ;;  %v5611_v20 = vld [vmem:[%s9694_s3 + $0x2a8] sm:$0xff]  ;;  %v5632_v22 = vcombine.low %v5599_v14, %v5603_v15  ;;  %v5616_v14 = vld [vmem:[%s9694_s3 + $0x2d0] sm:$0xff] }
 0x249   :  { %v5620_v15 = vld [vmem:[%s9694_s3 + $0x2f0] sm:$0xff] }
 0x24b   :  { %6230 = vmatpush3.bf16.msra.mxu0 %v7403_v21  ;;  %6252 = vmatpush3.bf16.msra.mxu1 %v7415_v23  ;;  %v5630_v21 = vcombine.low %v5598_v9, %v5602_v10  ;;  %v5639_v23 = vcombine.high %v5606_v16, %v5610_v18  ;;  %v5613_v9 = vld [vmem:[%s9694_s3 + $0x2b8] sm:$0xff]  ;;  %v5634_v10 = vcombine.low %v5600_v43, %v5604_v54 }
 0x24c   :  { %6231 = vmatprep.subr.bf16.mxu0 %v7421_v24  ;;  %6253 = vmatprep.subr.bf16.mxu1 %v7433_v26  ;;  %v5641_v24 = vcombine.high %v5607_v19, %v5611_v20  ;;  %v5640_v26 = vcombine.low %v5607_v19, %v5611_v20  ;;  %v5644_v19 = vcombine.low %v5609_v8, %v5613_v9  ;;  %v8132_v54 = vld [vmem:[%s9692_s1 + $0x38] sm:$0xff]  }
 0x24d   :  { %v5651_v20 = vcombine.high %v5616_v14, %v5620_v15 }
 0x24f   :  { %6232 = vmatpush3.bf16.msra.mxu0 %v7427_v25  ;;  %6254 = vmatpush3.bf16.msra.mxu1 %v7439_v27  ;;  %v5638_v25 = vcombine.low %v5606_v16, %v5610_v18  ;;  %v5614_v27 = vld [vmem:[%s9694_s3 + $0x2c0] sm:$0xff]  ;;  %v5617_v16 = vld [vmem:[%s9694_s3 + $0x2d8] sm:$0xff] }
 0x250   :  { %6233 = vmatprep.subr.bf16.mxu0 %v7445_v28  ;;  %6255 = vmatprep.subr.bf16.mxu1 %v7457_v30  ;;  %v5618_v28 = vld [vmem:[%s9694_s3 + $0x2e0] sm:$0xff] }
 0x251   :  { %v5647_v30 = vcombine.high %v5614_v27, %v5618_v28 }
 0x253   :  { %6234 = vmatpush3.bf16.msra.mxu0 %v7451_v29  ;;  %6256 = vmatpush3.bf16.msra.mxu1 %v7467_v34  ;;  %v5615_v29 = vld [vmem:[%s9694_s3 + $0x2c8] sm:$0xff] }
 0x254   :  { %6726 = vmatprep.subr.bf16.mxu0 %v7232_v35  ;;  %1741 = vmatprep.subr.bf16.mxu1 %v5623_v7  ;;  %v5619_v34 = vld [vmem:[%s9694_s3 + $0x2e8] sm:$0xff]  ;;  %v5612_v7 = vld [vmem:[%s9694_s3 + $0x2b0] sm:$0xff] }
 0x256   :  { %1456 = vmatmul.mubr.bf16.vlgmr.msra.gmra.mrb[20].mxu0 %v5584_v0  ;;  %1496 = vmatmul.mubr.bf16.vlgmr.msra.gmra.mrb[20].mxu1 %v5586_v1  ;;  %v5601_v0 = vld [vmem:[%s9694_s3 + $0x258] sm:$0xff] }
 0x257   :  { %6727 = vmatpush3.bf16.msra.mxu0 %v7476_v39  ;;  %6734 = vmatprep.mubr.msk.bf16.mxu0 %vm7233_vm0, %v7232_v35  ;;  %v5646_v39 = vcombine.low %v5614_v27, %v5618_v28  ;;  %v7948_v27 = vld [vmem:[%s9692_s1 + $0xc0] sm:$0xff]  }
 0x258   :  { %6728 = vmatprep.subr.bf16.mxu0 %v7232_v35  ;;  %1773 = vmatprep.mubr.bf16.mxu1 %v7234_v57 }
 0x259   :  { %1742 = vmatpush1.bf16.msra.mxu1 %v5622_v6  ;;  %v5608_v6 = vld [vmem:[%s9694_s3 + $0x290] sm:$0xff] }
 0x25a   :  { %1743 = vmatprep.subr.bf16.mxu1 %v5631_v13  ;;  %v5645_v13 = vcombine.high %v5609_v8, %v5613_v9  ;;  %v5642_v18 = vcombine.low %v5608_v6, %v5612_v7 }
 0x25b   :  { %6729 = vmatpush3.bf16.msra.mxu0 %v7483_v40  ;;  %v5648_v40 = vcombine.low %v5615_v29, %v5619_v34 }
 0x25c   :  { %6730 = vmatprep.subr.bf16.mxu0 %v7232_v35 }
 0x25d   :  { %1744 = vmatpush1.bf16.msra.mxu1 %v5630_v21 }
 0x25e   :  { %1745 = vmatprep.subr.bf16.mxu1 %v5639_v23 }
 0x25f   :  { %6731 = vmatpush3.bf16.msra.mxu0 %v7492_v41  ;;  %v5649_v41 = vcombine.high %v5615_v29, %v5619_v34  ;;  %v7966_v34 = vld [vmem:[%s9692_s1 + $0x80] sm:$0xff]  }
 0x260   :  { %6732 = vmatprep.subr.bf16.mxu0 %v7232_v35 }
 0x261   :  { %1746 = vmatpush1.bf16.msra.mxu1 %v5638_v25  ;;  %v7937_v25 = vld [vmem:[%s9693_s0 + $0x44] sm:$0xff] }
 0x262   :  { %1747 = vmatprep.subr.bf16.mxu1 %v5647_v30  ;;  %v5664_v29 = vcombine.high %v7937_v25, %v7937_v25  ;;  %v7960_v30 = vld [vmem:[%s9692_s1] sm:$0xff]  }
 0x263   :  { %6733 = vmatpush3.bf16.msra.mxu0 %v7499_v42  ;;  %v5592_v42 = vld [vmem:[%s9694_s3 + $0x210] sm:$0xff] }
 0x264   :  { %1782 = vmatprep.subr.bf16.mxu0 %v5625_v12  ;;  %v5627_v48 = vcombine.high %v5592_v42, %v5596_v46  ;;  %v5626_v50 = vcombine.low %v5592_v42, %v5596_v46  ;;  %v5643_v12 = vcombine.high %v5608_v6, %v5612_v7  ;;  %v7990_v42 = vld [vmem:[%s9692_s1 + $0x88] sm:$0xff]   ;;  %v7996_v46 = vld [vmem:[%s9692_s1 + $0x50] sm:$0xff]   ;;  %v5671_v6 = vld [vmem:[%s9694_s3 + $0x320] sm:$0xff] }
 0x265   :  { %1748 = vmatpush1.bf16.msra.mxu1 %v5646_v39  ;;  %v7972_v39 = vld [vmem:[%s9692_s1 + $0x48] sm:$0xff]  }
 0x266   :  { %6735 = vmatmul.mubr.msk.bf16.vlgmr.msra.gmra.mrb[24].mxu0 %vm392_vm1, %v7127_v2  ;;  %1823 = vmatprep.subr.bf16.mxu1 %v5627_v48  ;;  %v8008_v48 = vld [vmem:[%s9692_s1 + $0x10] sm:$0xff]   ;;  %v5668_v7 = vld [vmem:[%s9694_s3 + $0x308] sm:$0xff] }
 0x267   :  { %1814 = vmatprep.mubr.bf16.mxu0 %v7234_v57  ;;  %1783 = vmatpush1.bf16.msra.mxu0 %v5624_v11 }
 0x268   :  { %1784 = vmatprep.subr.bf16.mxu0 %v5633_v17  ;;  %v5621_v17 = vld [vmem:[%s9694_s3 + $0x2f8] sm:$0xff] }
 0x269   :  { %v5653_v21 = vcombine.high %v5617_v16, %v5621_v17  ;;  %v5652_v23 = vcombine.low %v5617_v16, %v5621_v17  ;;  %v5676_v16 = vld [vmem:[%s9694_s3 + $0x348] sm:$0xff] }
 0x26a   :  { %v5680_v17 = vld [vmem:[%s9694_s3 + $0x368] sm:$0xff] }
 0x26b   :  { %1785 = vmatpush1.bf16.msra.mxu0 %v5632_v22  ;;  %v5650_v22 = vcombine.low %v5616_v14, %v5620_v15 }
 0x26c   :  { %1786 = vmatprep.subr.bf16.mxu0 %v5641_v24  ;;  %v7932_v24 = vld [vmem:[%s9693_s0 + $0x3c] sm:$0xff] }
 0x26d   :  { %v5662_v28 = vcombine.high %v7932_v24, %v7932_v24  ;;  %v5661_v43 = vcombine.low %v7932_v24, %v7932_v24  ;;  %v5709_v24 = vcombine.low %v5676_v16, %v5680_v17 }
 0x26f   :  { %1787 = vmatpush1.bf16.msra.mxu0 %v5640_v26  ;;  %v7942_v26 = vld [vmem:[%s9692_s1 + $0x40] sm:$0xff]  }
 0x270   :  { %1788 = vmatprep.subr.bf16.mxu0 %v5649_v41  ;;  %v7984_v41 = vld [vmem:[%s9692_s1 + $0x8] sm:$0xff]  }
 0x273   :  { %1789 = vmatpush1.bf16.msra.mxu0 %v5648_v40  ;;  %v7978_v40 = vld [vmem:[%s9692_s1 + $0xc8] sm:$0xff]  }
 0x274   :  { %1864 = vmatprep.subr.bf16.mxu0 %v5629_v52  ;;  %v8032_v52 = vld [vmem:[%s9692_s1 + $0x18] sm:$0xff]  }
 0x329   :  { %v6235_v53 = vpop.f32.mrb[20].mxu0  ;;  %v6257_v56 = vpop.f32.mrb[20].mxu1 }
 0x32a   :  { %v6236_v58 = vpop.f32.mrb[21].mxu0  ;;  %v6258_v60 = vpop.f32.mrb[21].mxu1 }
 0x32b   :  { %v6237_v61 = vadd.f32 %v6236_v58, %v6235_v53  ;;  %v6238_v62 = vpop.f32.mrb[22].mxu0  ;;  %v6259_v63 = vadd.f32 %v6258_v60, %v6257_v56  ;;  %v6260_v55 = vpop.f32.mrb[22].mxu1  ;;  %v8038_v53 = vld [vmem:[%s9692_s1 + $0x98] sm:$0xff]   ;;  %v8044_v56 = vld [vmem:[%s9692_s1 + $0x60] sm:$0xff]  }
 0x32c   :  { %v6239_v45 = vpop.f32.mrb[23].mxu0  ;;  %v6261_v31 = vpop.f32.mrb[23].mxu1  ;;  %v8050_v58 = vld [vmem:[%s9692_s1 + $0xe0] sm:$0xff]   ;;  %v8068_v62 = vld [vmem:[%s9692_s1 + $0x68] sm:$0xff]  }
 0x32d   :  { %v1458_v32 = vadd.f32 %v6237_v61, %v7572_v59  ;;  %v5605_v59 = vld [vmem:[%s9694_s3 + $0x278] sm:$0xff]  ;;  %v8056_v60 = vld [vmem:[%s9692_s1 + $0x20] sm:$0xff]   ;;  %v8080_v55 = vld [vmem:[%s9692_s1 + $0x28] sm:$0xff]  }
 0x32e   :  { %v5637_v5 = vcombine.high %v5601_v0, %v5605_v59  ;;  %v5636_v11 = vcombine.low %v5601_v0, %v5605_v59  ;;  %v8062_v61 = vld [vmem:[%s9692_s1 + $0xa0] sm:$0xff]   ;;  %v8086_v45 = vld [vmem:[%s9692_s1 + $0xa8] sm:$0xff]   ;;  %v8092_v31 = vld [vmem:[%s9692_s1 + $0x70] sm:$0xff]  }
 0x32f   :  { %v1498_v33 = vadd.f32 %v6259_v63, %v1458_v32  ;;  %v8074_v63 = vld [vmem:[%s9692_s1 + $0xe8] sm:$0xff]   ;;  %v8098_v32 = vld [vmem:[%s9692_s1 + $0xf0] sm:$0xff]   ;;  %v8138_v0 = vld [vmem:[%s9692_s1 + $0xb8] sm:$0xff]  }
 0x330   :  { %v8145_v59 = vld [vmem:[%s9692_s1 + $0x100] sm:$0xff]  }
 0x339   :  { %v1537_v36 = vpop.f32.mrb[24].mxu0 }
 0x33a   :  { %v1538_v37 = vadd.f32 %v1537_v36, %v1498_v33  ;;  %v6736_v38 = vpop.f32.mrb[25].mxu0  ;;  %v8104_v33 = vld [vmem:[%s9692_s1 + $0x30] sm:$0xff]  }
 0x33b   :  { %v1540_v44 = vpop.f32.mrb[26].mxu0  ;;  %v8110_v36 = vld [vmem:[%s9692_s1 + $0xb0] sm:$0xff]   ;;  %v8122_v38 = vld [vmem:[%s9692_s1 + $0xf8] sm:$0xff]  }
 0x33c   :  { %v1543_v1 = vmax.f32 %v1538_v37, 0.0  ;;  %v6737_v2 = vpop.f32.mrb[27].mxu0  ;;  %v8116_v37 = vld [vmem:[%s9692_s1 + $0x78] sm:$0xff]   ;;  %v5663_v44 = vcombine.low %v7937_v25, %v7937_v25 }
 0x33d   :  { %v8162_v2 = vld [vmem:[%s9692_s1 + $0x110] sm:$0xff]  }
 0x33e   :  { %v1544_v3 = vpack.c.bf16 %v1543_v1, %v1543_v1  ;;  %v8155_v1 = vld [vmem:[%s9692_s1 + $0x108] sm:$0xff]  }
 0x340   :  { %5654 = vmatmul.mubr.msk.bf16.vlgmr.msra.gmra.mrb[4].mxu1 %vm392_vm1, %v1544_v3  ;;  %5655 = vmatmul.mubr.msk.bf16.vlgmr.msra.gmra.mrb[8].mxu0 %vm392_vm1, %v1544_v3 }
 0x341   :  { %1824 = vmatpush1.bf16.msra.mxu1 %v5626_v50  ;;  %1865 = vmatpush1.bf16.msra.mxu0 %v5628_v51  ;;  %v8020_v50 = vld [vmem:[%s9692_s1 + $0x58] sm:$0xff]  }
 0x342   :  { %1825 = vmatprep.subr.bf16.mxu1 %v5635_v4  ;;  %1866 = vmatprep.subr.bf16.mxu0 %v5637_v5  ;;  %v8026_v51 = vld [vmem:[%s9692_s1 + $0xd8] sm:$0xff]   ;;  %v5667_v5 = vld [vmem:[%s9694_s3 + $0x300] sm:$0xff] }
 0x343   :  { %1855 = vmatprep.mubr.bf16.mxu1 %v7234_v57  ;;  %1896 = vmatprep.mubr.bf16.mxu0 %v7234_v57  ;;  %v8172_v4 = vld [vmem:[%s9692_s1 + $0x118] sm:$0xff]   ;;  %v5699_v8 = vcombine.low %v5667_v5, %v5671_v6  ;;  %v5700_v9 = vcombine.high %v5667_v5, %v5671_v6  ;;  %v5692_v5 = vld [vmem:[%s9694_s3 + $0x3c8] sm:$0xff] }
 0x345   :  { %1826 = vmatpush1.bf16.msra.mxu1 %v5634_v10  ;;  %1867 = vmatpush1.bf16.msra.mxu0 %v5636_v11  ;;  %v5672_v10 = vld [vmem:[%s9694_s3 + $0x328] sm:$0xff]  ;;  %v5675_v11 = vld [vmem:[%s9694_s3 + $0x340] sm:$0xff] }
 0x346   :  { %1827 = vmatprep.subr.bf16.mxu1 %v5643_v12  ;;  %1868 = vmatprep.subr.bf16.mxu0 %v5645_v13  ;;  %v5679_v12 = vld [vmem:[%s9694_s3 + $0x360] sm:$0xff]  ;;  %v5701_v13 = vcombine.low %v5668_v7, %v5672_v10  ;;  %v5702_v14 = vcombine.high %v5668_v7, %v5672_v10  ;;  %v5696_v7 = vld [vmem:[%s9694_s3 + $0x3e8] sm:$0xff] }
 0x347   :  { %v5708_v15 = vcombine.high %v5675_v11, %v5679_v12  ;;  %v5726_v10 = vcombine.high %v5692_v5, %v5696_v7 }
 0x349   :  { %1828 = vmatpush1.bf16.msra.mxu1 %v5642_v18  ;;  %1869 = vmatpush1.bf16.msra.mxu0 %v5644_v19  ;;  %v5683_v18 = vld [vmem:[%s9694_s3 + $0x380] sm:$0xff]  ;;  %v5710_v19 = vcombine.high %v5676_v16, %v5680_v17 }
 0x34a   :  { %1829 = vmatprep.subr.bf16.mxu1 %v5651_v20  ;;  %1870 = vmatprep.subr.bf16.mxu0 %v5653_v21  ;;  %v5687_v20 = vld [vmem:[%s9694_s3 + $0x3a0] sm:$0xff]  ;;  %v5684_v21 = vld [vmem:[%s9694_s3 + $0x388] sm:$0xff] }
 0x34b   :  { %v5716_v25 = vcombine.high %v5683_v18, %v5687_v20 }
 0x34d   :  { %1830 = vmatpush1.bf16.msra.mxu1 %v5650_v22  ;;  %1871 = vmatpush1.bf16.msra.mxu0 %v5652_v23  ;;  %v5688_v22 = vld [vmem:[%s9694_s3 + $0x3a8] sm:$0xff]  ;;  %v5707_v23 = vcombine.low %v5675_v11, %v5679_v12  ;;  %v5669_v11 = vld [vmem:[%s9694_s3 + $0x310] sm:$0xff] }
 0x34e   :  { %6268 = vmatprep.subr.bf16.mxu1 %v7942_v26  ;;  %6290 = vmatprep.subr.bf16.mxu0 %v7948_v27  ;;  %v5673_v12 = vld [vmem:[%s9694_s3 + $0x330] sm:$0xff] }
 0x34f   :  { %v5703_v16 = vcombine.low %v5669_v11, %v5673_v12 }
 0x350   :  { %5656 = vmatmul.mubr.msk.bf16.vlgmr.msra.gmra.mrb[8].mxu1 %vm392_vm1, %v1544_v3  ;;  %5657 = vmatmul.mubr.msk.bf16.vlgmr.msra.gmra.mrb[12].mxu0 %vm392_vm1, %v1544_v3  ;;  %v7132_v3 = vld [vmem:[%s9693_s0 + $0x4c] ss:$0 sps:$4 sm:$0xff]  }
 0x351   :  { %6269 = vmatpush3.bf16.msra.mxu1 %v7960_v30  ;;  %6291 = vmatpush3.bf16.msra.mxu0 %v7966_v34 }
 0x352   :  { %6270 = vmatprep.subr.bf16.mxu1 %v7972_v39  ;;  %6292 = vmatprep.subr.bf16.mxu0 %v7978_v40 }
 0x353   :  { %1969 = vmatprep.mubr.bf16.mxu1 %v5662_v28  ;;  %2009 = vmatprep.mubr.bf16.mxu0 %v5664_v29  ;;  %v5718_v28 = vcombine.high %v5684_v21, %v5688_v22  ;;  %v5715_v29 = vcombine.low %v5683_v18, %v5687_v20 }
 0x355   :  { %6271 = vmatpush3.bf16.msra.mxu1 %v7984_v41  ;;  %6293 = vmatpush3.bf16.msra.mxu0 %v7990_v42 }
 0x356   :  { %6272 = vmatprep.subr.bf16.mxu1 %v7996_v46  ;;  %6294 = vmatprep.subr.bf16.mxu0 %v8002_v47 }
 0x359   :  { %6273 = vmatpush3.bf16.msra.mxu1 %v8008_v48  ;;  %6295 = vmatpush3.bf16.msra.mxu0 %v8014_v49 }
 0x35a   :  { %6274 = vmatprep.subr.bf16.mxu1 %v8020_v50  ;;  %6296 = vmatprep.subr.bf16.mxu0 %v8026_v51 }
 0x35d   :  { %6275 = vmatpush3.bf16.msra.mxu1 %v8032_v52  ;;  %6297 = vmatpush3.bf16.msra.mxu0 %v8038_v53 }
 0x35e   :  { %6276 = vmatprep.subr.bf16.mxu1 %v8044_v56  ;;  %6298 = vmatprep.subr.bf16.mxu0 %v8050_v58 }
 0x361   :  { %6277 = vmatpush3.bf16.msra.mxu1 %v8056_v60  ;;  %6299 = vmatpush3.bf16.msra.mxu0 %v8062_v61 }
 0x362   :  { %6278 = vmatprep.subr.bf16.mxu1 %v8068_v62  ;;  %6300 = vmatprep.subr.bf16.mxu0 %v8074_v63 }
 0x365   :  { %6279 = vmatpush3.bf16.msra.mxu1 %v8080_v55  ;;  %6301 = vmatpush3.bf16.msra.mxu0 %v8086_v45 }
 0x366   :  { %6280 = vmatprep.subr.bf16.mxu1 %v8092_v31  ;;  %6302 = vmatprep.subr.bf16.mxu0 %v8098_v32 }
 0x369   :  { %6281 = vmatpush3.bf16.msra.mxu1 %v8104_v33  ;;  %6303 = vmatpush3.bf16.msra.mxu0 %v8110_v36 }
 0x36a   :  { %6282 = vmatprep.subr.bf16.mxu1 %v8116_v37  ;;  %6304 = vmatprep.subr.bf16.mxu0 %v8122_v38 }
 0x36d   :  { %6283 = vmatpush3.bf16.msra.mxu1 %v8132_v54  ;;  %6305 = vmatpush3.bf16.msra.mxu0 %v8138_v0 }
 0x36e   :  { %6738 = vmatprep.subr.bf16.mxu1 %v7232_v35  ;;  %2296 = vmatprep.subr.bf16.mxu0 %v5702_v14  ;;  %v5704_v14 = vcombine.high %v5669_v11, %v5673_v12  ;;  %v5681_v11 = vld [vmem:[%s9694_s3 + $0x370] sm:$0xff]  ;;  %v5678_v12 = vld [vmem:[%s9694_s3 + $0x358] sm:$0xff] }
 0x370   :  { %1970 = vmatmul.mubr.bf16.vlgmr.msra.gmra.mrb[24].mxu1 %v5661_v43  ;;  %2010 = vmatmul.mubr.bf16.vlgmr.msra.gmra.mrb[28].mxu0 %v5663_v44  ;;  %v5717_v43 = vcombine.low %v5684_v21, %v5688_v22  ;;  %v5691_v44 = vld [vmem:[%s9694_s3 + $0x3c0] sm:$0xff] }
 0x371   :  { %6739 = vmatpush3.bf16.msra.mxu1 %v8145_v59  ;;  %6746 = vmatprep.mubr.msk.bf16.mxu1 %vm7233_vm0, %v7232_v35 }
 0x372   :  { %6740 = vmatprep.subr.bf16.mxu1 %v7232_v35  ;;  %2328 = vmatprep.mubr.bf16.mxu0 %v7234_v57 }
 0x373   :  { %2297 = vmatpush1.bf16.msra.mxu0 %v5701_v13  ;;  %v5670_v13 = vld [vmem:[%s9694_s3 + $0x318] sm:$0xff] }
 0x374   :  { %2298 = vmatprep.subr.bf16.mxu0 %v5710_v19 }
 0x375   :  { %6741 = vmatpush3.bf16.msra.mxu1 %v8155_v1 }
 0x376   :  { %6742 = vmatprep.subr.bf16.mxu1 %v7232_v35 }
 0x377   :  { %2299 = vmatpush1.bf16.msra.mxu0 %v5709_v24 }
 0x378   :  { %2300 = vmatprep.subr.bf16.mxu0 %v5718_v28 }
 0x379   :  { %6743 = vmatpush3.bf16.msra.mxu1 %v8162_v2 }
 0x37a   :  { %6744 = vmatprep.subr.bf16.mxu1 %v7232_v35 }
 0x37b   :  { %2301 = vmatpush1.bf16.msra.mxu0 %v5717_v43 }
 0x37c   :  { %2302 = vmatprep.subr.bf16.mxu0 %v5726_v10 }
 0x37d   :  { %6745 = vmatpush3.bf16.msra.mxu1 %v8172_v4 }
 0x37e   :  { %2255 = vmatprep.subr.bf16.mxu1 %v5700_v9  ;;  %v5725_v9 = vcombine.low %v5692_v5, %v5696_v7 }
 0x380   :  { %6747 = vmatmul.mubr.msk.bf16.vlgmr.msra.gmra.mrb[28].mxu1 %vm392_vm1, %v7132_v3  ;;  %v5695_v3 = vld [vmem:[%s9694_s3 + $0x3e0] sm:$0xff]  ;;  %2303 = vmatpush1.bf16.msra.mxu0 %v5725_v9  ;;  %v5677_v9 = vld [vmem:[%s9694_s3 + $0x350] sm:$0xff] }
 0x381   :  { %2287 = vmatprep.mubr.bf16.mxu1 %v7234_v57  ;;  %2256 = vmatpush1.bf16.msra.mxu1 %v5699_v8  ;;  %v5724_v6 = vcombine.high %v5691_v44, %v5695_v3  ;;  %v5723_v8 = vcombine.low %v5691_v44, %v5695_v3  ;;  %v8240_v44 = vld [vmem:[%s9695_s2] ss:$0 sm:$0xff] }
 0x382   :  { %2257 = vmatprep.subr.bf16.mxu1 %v5708_v15  ;;  %v5674_v15 = vld [vmem:[%s9694_s3 + $0x338] sm:$0xff] }
 0x383   :  { %v5705_v17 = vcombine.low %v5670_v13, %v5674_v15  ;;  %v5706_v18 = vcombine.high %v5670_v13, %v5674_v15  ;;  %v5682_v13 = vld [vmem:[%s9694_s3 + $0x378] sm:$0xff] }
 0x385   :  { %2258 = vmatpush1.bf16.msra.mxu1 %v5707_v23  ;;  %2378 = vmatprep.subr.bf16.mxu0 %v5706_v18 }
 0x386   :  { %2259 = vmatprep.subr.bf16.mxu1 %v5716_v25 }
 0x389   :  { %2260 = vmatpush1.bf16.msra.mxu1 %v5715_v29 }
 0x38a   :  { %2261 = vmatprep.subr.bf16.mxu1 %v5724_v6 }
 0x38d   :  { %2262 = vmatpush1.bf16.msra.mxu1 %v5723_v8 }
 0x38e   :  { %2337 = vmatprep.subr.bf16.mxu1 %v5704_v14 }
 0x443   :  { %v6284_v19 = vpop.f32.mrb[24].mxu1  ;;  %v6306_v20 = vpop.f32.mrb[28].mxu0 }
 0x444   :  { %v6285_v21 = vpop.f32.mrb[25].mxu1  ;;  %v6307_v22 = vpop.f32.mrb[29].mxu0 }
 0x445   :  { %v6286_v23 = vadd.f32 %v6285_v21, %v6284_v19  ;;  %v6287_v24 = vpop.f32.mrb[26].mxu1  ;;  %v6308_v25 = vadd.f32 %v6307_v22, %v6306_v20  ;;  %v6309_v28 = vpop.f32.mrb[30].mxu0  ;;  %v5712_v19 = vcombine.high %v5677_v9, %v5681_v11  ;;  %v5714_v20 = vcombine.high %v5678_v12, %v5682_v13  ;;  %v5685_v21 = vld [vmem:[%s9694_s3 + $0x390] sm:$0xff] }
 0x446   :  { %v6288_v29 = vpop.f32.mrb[27].mxu1  ;;  %v6310_v43 = vpop.f32.mrb[31].mxu0  ;;  %v5689_v22 = vld [vmem:[%s9694_s3 + $0x3b0] sm:$0xff]  ;;  %v5690_v24 = vld [vmem:[%s9694_s3 + $0x3b8] sm:$0xff]  ;;  %v5713_v28 = vcombine.low %v5678_v12, %v5682_v13 }
 0x447   :  { %v1972_v3 = vadd.f32 %v8240_v44, %v6286_v23  ;;  %v5686_v23 = vld [vmem:[%s9694_s3 + $0x398] sm:$0xff]  ;;  %v5720_v29 = vcombine.high %v5685_v21, %v5689_v22  ;;  %v5735_v12 = vld [vmem:[%s9693_s0 + $0x50] sm:$0xff] }
 0x448   :  { %v5722_v43 = vcombine.high %v5686_v23, %v5690_v24  ;;  %v5736_v13 = vld [vmem:[%s9693_s0 + $0x58] sm:$0xff] }
 0x449   :  { %v2012_v5 = vadd.f32 %v6308_v25, %v1972_v3  ;;  %v5711_v25 = vcombine.low %v5677_v9, %v5681_v11  ;;  %v5693_v3 = vld [vmem:[%s9694_s3 + $0x3d0] sm:$0xff] }
 0x453   :  { %v2051_v6 = vpop.f32.mrb[28].mxu1 }
 0x454   :  { %v2052_v7 = vadd.f32 %v2051_v6, %v2012_v5  ;;  %v6748_v8 = vpop.f32.mrb[29].mxu1  ;;  %v5697_v5 = vld [vmem:[%s9694_s3 + $0x3f0] sm:$0xff]  ;;  %v5694_v6 = vld [vmem:[%s9694_s3 + $0x3d8] sm:$0xff] }
 0x455   :  { %v2054_v10 = vpop.f32.mrb[30].mxu1  ;;  %v5728_v8 = vcombine.high %v5693_v3, %v5697_v5 }
 0x456   :  { %v2057_v14 = vmax.f32 %v2052_v7, 0.0  ;;  %v6749_v15 = vpop.f32.mrb[31].mxu1  ;;  %v5721_v7 = vcombine.low %v5686_v23, %v5690_v24  ;;  %v5727_v10 = vcombine.low %v5693_v3, %v5697_v5  ;;  %v5745_v23 = vld [vmem:[%s9694_s3 + $0x408] sm:$0xff] }
 0x457   :  { %v5741_v15 = vcombine.high %v5736_v13, %v5736_v13 }
 0x458   :  { %v2058_v18 = vpack.c.bf16 %v2057_v14, %v2057_v14  ;;  %v5739_v14 = vcombine.high %v5735_v12, %v5735_v12 }
 0x45a   :  { %5731 = vmatmul.mubr.msk.bf16.vlgmr.msra.gmra.mrb[4].mxu1 %vm392_vm1, %v2058_v18  ;;  %5732 = vmatmul.mubr.msk.bf16.vlgmr.msra.gmra.mrb[8].mxu0 %vm392_vm1, %v2058_v18 }
 0x45b   :  { %2338 = vmatpush1.bf16.msra.mxu1 %v5703_v16  ;;  %2379 = vmatpush1.bf16.msra.mxu0 %v5705_v17  ;;  %v5698_v16 = vld [vmem:[%s9694_s3 + $0x3f8] sm:$0xff]  ;;  %v5719_v17 = vcombine.low %v5685_v21, %v5689_v22  ;;  %v5744_v21 = vld [vmem:[%s9694_s3 + $0x400] sm:$0xff] }
 0x45c   :  { %2339 = vmatprep.subr.bf16.mxu1 %v5712_v19  ;;  %2380 = vmatprep.subr.bf16.mxu0 %v5714_v20  ;;  %v5730_v9 = vcombine.high %v5694_v6, %v5698_v16  ;;  %v5729_v11 = vcombine.low %v5694_v6, %v5698_v16  ;;  %v5740_v19 = vcombine.low %v5736_v13, %v5736_v13  ;;  %v7137_v20 = vld [vmem:[%s9693_s0 + $0x60] ss:$0 sps:$4 sm:$0xff]   ;;  %v5753_v16 = vld [vmem:[%s9694_s3 + $0x448] sm:$0xff] }
 0x45d   :  { %2369 = vmatprep.mubr.bf16.mxu1 %v7234_v57  ;;  %2410 = vmatprep.mubr.bf16.mxu0 %v7234_v57  ;;  %v5748_v22 = vld [vmem:[%s9694_s3 + $0x420] sm:$0xff] }
 0x45e   :  { %v5776_v24 = vcombine.low %v5744_v21, %v5748_v22 }
 0x45f   :  { %2340 = vmatpush1.bf16.msra.mxu1 %v5711_v25  ;;  %2381 = vmatpush1.bf16.msra.mxu0 %v5713_v28  ;;  %v5777_v25 = vcombine.high %v5744_v21, %v5748_v22  ;;  %v5749_v28 = vld [vmem:[%s9694_s3 + $0x428] sm:$0xff]  ;;  %v5772_v21 = vld [vmem:[%s9694_s3 + $0x4e0] sm:$0xff] }
 0x460   :  { %2341 = vmatprep.subr.bf16.mxu1 %v5720_v29  ;;  %2382 = vmatprep.subr.bf16.mxu0 %v5722_v43  ;;  %v5752_v29 = vld [vmem:[%s9694_s3 + $0x440] sm:$0xff]  ;;  %v5778_v3 = vcombine.low %v5745_v23, %v5749_v28  ;;  %v5779_v5 = vcombine.high %v5745_v23, %v5749_v28  ;;  %v5769_v22 = vld [vmem:[%s9694_s3 + $0x4c8] sm:$0xff] }
 0x461   :  { %v5756_v43 = vld [vmem:[%s9694_s3 + $0x460] sm:$0xff] }
 0x462   :  { %v5785_v6 = vcombine.high %v5752_v29, %v5756_v43 }
 0x463   :  { %2342 = vmatpush1.bf16.msra.mxu1 %v5719_v17  ;;  %2383 = vmatpush1.bf16.msra.mxu0 %v5721_v7  ;;  %v5757_v17 = vld [vmem:[%s9694_s3 + $0x468] sm:$0xff]  ;;  %v5760_v7 = vld [vmem:[%s9694_s3 + $0x480] sm:$0xff] }
 0x464   :  { %2343 = vmatprep.subr.bf16.mxu1 %v5728_v8  ;;  %2384 = vmatprep.subr.bf16.mxu0 %v5730_v9  ;;  %v5787_v8 = vcombine.high %v5753_v16, %v5757_v17  ;;  %v5764_v9 = vld [vmem:[%s9694_s3 + $0x4a0] sm:$0xff]  ;;  %v5786_v13 = vcombine.low %v5753_v16, %v5757_v17  ;;  %v5751_v16 = vld [vmem:[%s9694_s3 + $0x438] sm:$0xff] }
 0x467   :  { %2344 = vmatpush1.bf16.msra.mxu1 %v5727_v10  ;;  %2385 = vmatpush1.bf16.msra.mxu0 %v5729_v11  ;;  %v5761_v10 = vld [vmem:[%s9694_s3 + $0x488] sm:$0xff] }
 0x468   :  { %6317 = vmatprep.subr.bf16.mxu0 %v7942_v26  ;;  %6339 = vmatprep.subr.bf16.mxu1 %v7948_v27  ;;  %v5765_v11 = vld [vmem:[%s9694_s3 + $0x4a8] sm:$0xff] }
 0x46a   :  { %5733 = vmatmul.mubr.msk.bf16.vlgmr.msra.gmra.mrb[8].mxu1 %vm392_vm1, %v2058_v18  ;;  %5734 = vmatmul.mubr.msk.bf16.vlgmr.msra.gmra.mrb[12].mxu0 %vm392_vm1, %v2058_v18  ;;  %v5738_v18 = vcombine.low %v5735_v12, %v5735_v12  ;;  %v5784_v12 = vcombine.low %v5752_v29, %v5756_v43  ;;  %v5746_v43 = vld [vmem:[%s9694_s3 + $0x410] sm:$0xff] }
 0x46b   :  { %6318 = vmatpush3.bf16.msra.mxu0 %v7960_v30  ;;  %6340 = vmatpush3.bf16.msra.mxu1 %v7966_v34 }
 0x46c   :  { %6319 = vmatprep.subr.bf16.mxu0 %v7972_v39  ;;  %6341 = vmatprep.subr.bf16.mxu1 %v7978_v40 }
 0x46d   :  { %2483 = vmatprep.mubr.bf16.mxu0 %v5739_v14  ;;  %2523 = vmatprep.mubr.bf16.mxu1 %v5741_v15  ;;  %v5793_v14 = vcombine.high %v5760_v7, %v5764_v9  ;;  %v5795_v15 = vcombine.high %v5761_v10, %v5765_v11 }
 0x46f   :  { %6320 = vmatpush3.bf16.msra.mxu0 %v7984_v41  ;;  %6342 = vmatpush3.bf16.msra.mxu1 %v7990_v42 }
 0x470   :  { %6321 = vmatprep.subr.bf16.mxu0 %v7996_v46  ;;  %6343 = vmatprep.subr.bf16.mxu1 %v8002_v47 }
 0x473   :  { %6322 = vmatpush3.bf16.msra.mxu0 %v8008_v48  ;;  %6344 = vmatpush3.bf16.msra.mxu1 %v8014_v49 }
 0x474   :  { %6323 = vmatprep.subr.bf16.mxu0 %v8020_v50  ;;  %6345 = vmatprep.subr.bf16.mxu1 %v8026_v51 }
 0x477   :  { %6324 = vmatpush3.bf16.msra.mxu0 %v8032_v52  ;;  %6346 = vmatpush3.bf16.msra.mxu1 %v8038_v53 }
 0x478   :  { %6325 = vmatprep.subr.bf16.mxu0 %v8044_v56  ;;  %6347 = vmatprep.subr.bf16.mxu1 %v8050_v58 }
 0x47b   :  { %6326 = vmatpush3.bf16.msra.mxu0 %v8056_v60  ;;  %6348 = vmatpush3.bf16.msra.mxu1 %v8062_v61 }
 0x47c   :  { %6327 = vmatprep.subr.bf16.mxu0 %v8068_v62  ;;  %6349 = vmatprep.subr.bf16.mxu1 %v8074_v63 }
 0x47f   :  { %6328 = vmatpush3.bf16.msra.mxu0 %v8080_v55  ;;  %6350 = vmatpush3.bf16.msra.mxu1 %v8086_v45 }
 0x480   :  { %6329 = vmatprep.subr.bf16.mxu0 %v8092_v31  ;;  %6351 = vmatprep.subr.bf16.mxu1 %v8098_v32 }
 0x483   :  { %6330 = vmatpush3.bf16.msra.mxu0 %v8104_v33  ;;  %6352 = vmatpush3.bf16.msra.mxu1 %v8110_v36 }
 0x484   :  { %6331 = vmatprep.subr.bf16.mxu0 %v8116_v37  ;;  %6353 = vmatprep.subr.bf16.mxu1 %v8122_v38 }
 0x487   :  { %6332 = vmatpush3.bf16.msra.mxu0 %v8132_v54  ;;  %6354 = vmatpush3.bf16.msra.mxu1 %v8138_v0 }
 0x488   :  { %6750 = vmatprep.subr.bf16.mxu0 %v7232_v35  ;;  %2769 = vmatprep.subr.bf16.mxu1 %v5777_v25 }
 0x48a   :  { %2484 = vmatmul.mubr.bf16.vlgmr.msra.gmra.mrb[32].mxu0 %v5738_v18  ;;  %2524 = vmatmul.mubr.bf16.vlgmr.msra.gmra.mrb[32].mxu1 %v5740_v19  ;;  %v5792_v18 = vcombine.low %v5760_v7, %v5764_v9  ;;  %v5794_v19 = vcombine.low %v5761_v10, %v5765_v11 }
 0x48b   :  { %6751 = vmatpush3.bf16.msra.mxu0 %v8145_v59  ;;  %6758 = vmatprep.mubr.msk.bf16.mxu0 %vm7233_vm0, %v7232_v35 }
 0x48c   :  { %6752 = vmatprep.subr.bf16.mxu0 %v7232_v35  ;;  %2801 = vmatprep.mubr.bf16.mxu1 %v7234_v57 }
 0x48d   :  { %2770 = vmatpush1.bf16.msra.mxu1 %v5776_v24  ;;  %v5773_v24 = vld [vmem:[%s9694_s3 + $0x4e8] sm:$0xff] }
 0x48e   :  { %2771 = vmatprep.subr.bf16.mxu1 %v5785_v6  ;;  %v5802_v28 = vcombine.low %v5769_v22, %v5773_v24  ;;  %v5803_v29 = vcombine.high %v5769_v22, %v5773_v24 }
 0x48f   :  { %6753 = vmatpush3.bf16.msra.mxu0 %v8155_v1 }
 0x490   :  { %6754 = vmatprep.subr.bf16.mxu0 %v7232_v35 }
 0x491   :  { %2772 = vmatpush1.bf16.msra.mxu1 %v5784_v12 }
 0x492   :  { %2773 = vmatprep.subr.bf16.mxu1 %v5793_v14 }
 0x493   :  { %6755 = vmatpush3.bf16.msra.mxu0 %v8162_v2 }
 0x494   :  { %6756 = vmatprep.subr.bf16.mxu0 %v7232_v35 }
 0x495   :  { %2774 = vmatpush1.bf16.msra.mxu1 %v5792_v18 }
 0x497   :  { %6757 = vmatpush3.bf16.msra.mxu0 %v8172_v4 }
 0x498   :  { %2810 = vmatprep.subr.bf16.mxu0 %v5779_v5  ;;  %v5747_v5 = vld [vmem:[%s9694_s3 + $0x418] sm:$0xff] }
 0x499   :  { %v5782_v7 = vcombine.low %v5747_v5, %v5751_v16 }
 0x49a   :  { %6759 = vmatmul.mubr.msk.bf16.vlgmr.msra.gmra.mrb[36].mxu0 %vm392_vm1, %v7137_v20  ;;  %v5768_v20 = vld [vmem:[%s9694_s3 + $0x4c0] sm:$0xff] }
 0x49b   :  { %2842 = vmatprep.mubr.bf16.mxu0 %v7234_v57  ;;  %2811 = vmatpush1.bf16.msra.mxu0 %v5778_v3  ;;  %v5801_v23 = vcombine.high %v5768_v20, %v5772_v21  ;;  %v5800_v25 = vcombine.low %v5768_v20, %v5772_v21  ;;  %v5750_v3 = vld [vmem:[%s9694_s3 + $0x430] sm:$0xff] }
 0x49c   :  { %2812 = vmatprep.subr.bf16.mxu0 %v5787_v8  ;;  %v5781_v6 = vcombine.high %v5746_v43, %v5750_v3  ;;  %v5780_v17 = vcombine.low %v5746_v43, %v5750_v3  ;;  %v5783_v8 = vcombine.high %v5747_v5, %v5751_v16  ;;  %v5758_v43 = vld [vmem:[%s9694_s3 + $0x470] sm:$0xff]  ;;  %v5755_v3 = vld [vmem:[%s9694_s3 + $0x458] sm:$0xff] }
 0x49d   :  { %2775 = vmatprep.subr.bf16.mxu1 %v5801_v23  ;;  %v5759_v5 = vld [vmem:[%s9694_s3 + $0x478] sm:$0xff] }
 0x49e   :  { %2776 = vmatpush1.bf16.msra.mxu1 %v5800_v25 }
 0x49f   :  { %2813 = vmatpush1.bf16.msra.mxu0 %v5786_v13  ;;  %2851 = vmatprep.subr.bf16.mxu1 %v5781_v6 }
 0x4a0   :  { %2814 = vmatprep.subr.bf16.mxu0 %v5795_v15 }
 0x4a3   :  { %2815 = vmatpush1.bf16.msra.mxu0 %v5794_v19 }
 0x4a4   :  { %2816 = vmatprep.subr.bf16.mxu0 %v5803_v29 }
 0x4a7   :  { %2817 = vmatpush1.bf16.msra.mxu0 %v5802_v28  ;;  %v5754_v28 = vld [vmem:[%s9694_s3 + $0x450] sm:$0xff] }
 0x4a8   :  { %2892 = vmatprep.subr.bf16.mxu0 %v5783_v8 }
 0x55d   :  { %v6333_v9 = vpop.f32.mrb[32].mxu0  ;;  %v6355_v10 = vpop.f32.mrb[32].mxu1 }
 0x55e   :  { %v6334_v11 = vpop.f32.mrb[33].mxu0  ;;  %v6356_v12 = vpop.f32.mrb[33].mxu1 }
 0x55f   :  { %v6335_v13 = vadd.f32 %v6334_v11, %v6333_v9  ;;  %v6336_v14 = vpop.f32.mrb[34].mxu0  ;;  %v6357_v15 = vadd.f32 %v6356_v12, %v6355_v10  ;;  %v6358_v18 = vpop.f32.mrb[34].mxu1  ;;  %v5789_v9 = vcombine.high %v5754_v28, %v5758_v43  ;;  %v5791_v10 = vcombine.high %v5755_v3, %v5759_v5  ;;  %v5762_v11 = vld [vmem:[%s9694_s3 + $0x490] sm:$0xff] }
 0x560   :  { %v6337_v19 = vpop.f32.mrb[35].mxu0  ;;  %v6359_v20 = vpop.f32.mrb[35].mxu1  ;;  %v5766_v12 = vld [vmem:[%s9694_s3 + $0x4b0] sm:$0xff]  ;;  %v5767_v14 = vld [vmem:[%s9694_s3 + $0x4b8] sm:$0xff]  ;;  %v5790_v18 = vcombine.low %v5755_v3, %v5759_v5  ;;  %v5812_v3 = vld [vmem:[%s9693_s0 + $0x64] sm:$0xff] }
 0x561   :  { %v2486_v21 = vadd.f32 %v8240_v44, %v6335_v13  ;;  %v5763_v13 = vld [vmem:[%s9694_s3 + $0x498] sm:$0xff]  ;;  %v5797_v19 = vcombine.high %v5762_v11, %v5766_v12  ;;  %v5813_v5 = vld [vmem:[%s9693_s0 + $0x6c] sm:$0xff] }
 0x562   :  { %v5799_v20 = vcombine.high %v5763_v13, %v5767_v14 }
 0x563   :  { %v2526_v22 = vadd.f32 %v6357_v15, %v2486_v21  ;;  %v5788_v15 = vcombine.low %v5754_v28, %v5758_v43  ;;  %v5770_v21 = vld [vmem:[%s9694_s3 + $0x4d0] sm:$0xff] }
 0x56d   :  { %v2565_v23 = vpop.f32.mrb[36].mxu0 }
 0x56e   :  { %v2566_v24 = vadd.f32 %v2565_v23, %v2526_v22  ;;  %v6760_v25 = vpop.f32.mrb[37].mxu0  ;;  %v5774_v22 = vld [vmem:[%s9694_s3 + $0x4f0] sm:$0xff]  ;;  %v5771_v23 = vld [vmem:[%s9694_s3 + $0x4d8] sm:$0xff] }
 0x56f   :  { %v2568_v29 = vpop.f32.mrb[38].mxu0  ;;  %v5805_v25 = vcombine.high %v5770_v21, %v5774_v22 }
 0x570   :  { %v2571_v6 = vmax.f32 %v2566_v24, 0.0  ;;  %v6761_v16 = vpop.f32.mrb[39].mxu0  ;;  %v5798_v24 = vcombine.low %v5763_v13, %v5767_v14  ;;  %v5804_v29 = vcombine.low %v5770_v21, %v5774_v22 }
 0x571   :  { %v5818_v16 = vcombine.high %v5813_v5, %v5813_v5 }
 0x572   :  { %v2572_v8 = vpack.c.bf16 %v2571_v6, %v2571_v6  ;;  %v5816_v6 = vcombine.high %v5812_v3, %v5812_v3 }
 0x574   :  { %5808 = vmatmul.mubr.msk.bf16.vlgmr.msra.gmra.mrb[4].mxu1 %vm392_vm1, %v2572_v8  ;;  %5809 = vmatmul.mubr.msk.bf16.vlgmr.msra.gmra.mrb[8].mxu0 %vm392_vm1, %v2572_v8 }
 0x575   :  { %2852 = vmatpush1.bf16.msra.mxu1 %v5780_v17  ;;  %2893 = vmatpush1.bf16.msra.mxu0 %v5782_v7  ;;  %v5775_v17 = vld [vmem:[%s9694_s3 + $0x4f8] sm:$0xff]  ;;  %v5796_v7 = vcombine.low %v5762_v11, %v5766_v12 }
 0x576   :  { %2853 = vmatprep.subr.bf16.mxu1 %v5789_v9  ;;  %2894 = vmatprep.subr.bf16.mxu0 %v5791_v10  ;;  %v5807_v28 = vcombine.high %v5771_v23, %v5775_v17  ;;  %v5806_v43 = vcombine.low %v5771_v23, %v5775_v17  ;;  %v5824_v9 = vld [vmem:[%s9694_s3 + $0x518] sm:$0xff] }
 0x577   :  { %2883 = vmatprep.mubr.bf16.mxu1 %v7234_v57  ;;  %2924 = vmatprep.mubr.bf16.mxu0 %v7234_v57  ;;  %v5828_v11 = vld [vmem:[%s9694_s3 + $0x538] sm:$0xff] }
 0x578   :  { %v5859_v13 = vcombine.low %v5824_v9, %v5828_v11  ;;  %v5860_v14 = vcombine.high %v5824_v9, %v5828_v11  ;;  %v8670_v9 = vld [vmem:[%s9692_s1 + $0xd0] sm:$0xff]  }
 0x579   :  { %2854 = vmatpush1.bf16.msra.mxu1 %v5788_v15  ;;  %2895 = vmatpush1.bf16.msra.mxu0 %v5790_v18  ;;  %v8682_v11 = vld [vmem:[%s9692_s1 + $0x90] sm:$0xff]  }
 0x57a   :  { %2855 = vmatprep.subr.bf16.mxu1 %v5797_v19  ;;  %2896 = vmatprep.subr.bf16.mxu0 %v5799_v20 }
 0x57d   :  { %2856 = vmatpush1.bf16.msra.mxu1 %v5796_v7  ;;  %2897 = vmatpush1.bf16.msra.mxu0 %v5798_v24 }
 0x57e   :  { %2857 = vmatprep.subr.bf16.mxu1 %v5805_v25  ;;  %2898 = vmatprep.subr.bf16.mxu0 %v5807_v28 }
 0x581   :  { %2858 = vmatpush1.bf16.msra.mxu1 %v5804_v29  ;;  %2899 = vmatpush1.bf16.msra.mxu0 %v5806_v43 }
 0x582   :  { %6366 = vmatprep.subr.bf16.mxu1 %v7942_v26  ;;  %6388 = vmatprep.subr.bf16.mxu0 %v7948_v27  ;;  %v5815_v26 = vcombine.low %v5812_v3, %v5812_v3  ;;  %v5817_v27 = vcombine.low %v5813_v5, %v5813_v5  ;;  %v5831_v5 = vld [vmem:[%s9694_s3 + $0x550] sm:$0xff] }
 0x584   :  { %5810 = vmatmul.mubr.msk.bf16.vlgmr.msra.gmra.mrb[8].mxu1 %vm392_vm1, %v2572_v8  ;;  %5811 = vmatmul.mubr.msk.bf16.vlgmr.msra.gmra.mrb[12].mxu0 %vm392_vm1, %v2572_v8  ;;  %v5827_v8 = vld [vmem:[%s9694_s3 + $0x530] sm:$0xff] }
 0x585   :  { %6367 = vmatpush3.bf16.msra.mxu1 %v7960_v30  ;;  %6389 = vmatpush3.bf16.msra.mxu0 %v7966_v34  ;;  %v7142_v30 = vld [vmem:[%s9693_s0 + $0x74] ss:$0 sps:$4 sm:$0xff]   ;;  %v5821_v34 = vld [vmem:[%s9694_s3 + $0x500] sm:$0xff] }
 0x586   :  { %6368 = vmatprep.subr.bf16.mxu1 %v7972_v39  ;;  %6390 = vmatprep.subr.bf16.mxu0 %v7978_v40  ;;  %v5825_v39 = vld [vmem:[%s9694_s3 + $0x520] sm:$0xff]  ;;  %v5822_v40 = vld [vmem:[%s9694_s3 + $0x508] sm:$0xff] }
 0x587   :  { %2997 = vmatprep.mubr.bf16.mxu1 %v5816_v6  ;;  %3037 = vmatprep.mubr.bf16.mxu0 %v5818_v16  ;;  %v5835_v16 = vld [vmem:[%s9694_s3 + $0x570] sm:$0xff] }
 0x589   :  { %6369 = vmatpush3.bf16.msra.mxu1 %v7984_v41  ;;  %6391 = vmatpush3.bf16.msra.mxu0 %v7990_v42  ;;  %v5853_v41 = vcombine.low %v5821_v34, %v5825_v39  ;;  %v5854_v42 = vcombine.high %v5821_v34, %v5825_v39  ;;  %v5866_v39 = vcombine.high %v5831_v5, %v5835_v16 }
 0x58a   :  { %6370 = vmatprep.subr.bf16.mxu1 %v7996_v46  ;;  %6392 = vmatprep.subr.bf16.mxu0 %v8002_v47  ;;  %v5826_v46 = vld [vmem:[%s9694_s3 + $0x528] sm:$0xff]  ;;  %v5829_v47 = vld [vmem:[%s9694_s3 + $0x540] sm:$0xff] }
 0x58d   :  { %6371 = vmatpush3.bf16.msra.mxu1 %v8008_v48  ;;  %6393 = vmatpush3.bf16.msra.mxu0 %v8014_v49  ;;  %v5833_v48 = vld [vmem:[%s9694_s3 + $0x560] sm:$0xff]  ;;  %v5855_v49 = vcombine.low %v5822_v40, %v5826_v46 }
 0x58e   :  { %6372 = vmatprep.subr.bf16.mxu1 %v8020_v50  ;;  %6394 = vmatprep.subr.bf16.mxu0 %v8026_v51  ;;  %v5856_v50 = vcombine.high %v5822_v40, %v5826_v46  ;;  %v5862_v51 = vcombine.high %v5829_v47, %v5833_v48  ;;  %v5840_v46 = vld [vmem:[%s9694_s3 + $0x598] sm:$0xff] }
 0x591   :  { %6373 = vmatpush3.bf16.msra.mxu1 %v8032_v52  ;;  %6395 = vmatpush3.bf16.msra.mxu0 %v8038_v53  ;;  %v5830_v52 = vld [vmem:[%s9694_s3 + $0x548] sm:$0xff] }
 0x592   :  { %6374 = vmatprep.subr.bf16.mxu1 %v8044_v56  ;;  %6396 = vmatprep.subr.bf16.mxu0 %v8050_v58  ;;  %v5834_v53 = vld [vmem:[%s9694_s3 + $0x568] sm:$0xff]  ;;  %v5837_v56 = vld [vmem:[%s9694_s3 + $0x580] sm:$0xff] }
 0x593   :  { %v5864_v58 = vcombine.high %v5830_v52, %v5834_v53 }
 0x595   :  { %6375 = vmatpush3.bf16.msra.mxu1 %v8056_v60  ;;  %6397 = vmatpush3.bf16.msra.mxu0 %v8062_v61  ;;  %v5841_v60 = vld [vmem:[%s9694_s3 + $0x5a0] sm:$0xff]  ;;  %v5838_v61 = vld [vmem:[%s9694_s3 + $0x588] sm:$0xff] }
 0x596   :  { %6376 = vmatprep.subr.bf16.mxu1 %v8068_v62  ;;  %6398 = vmatprep.subr.bf16.mxu0 %v8074_v63  ;;  %v5842_v62 = vld [vmem:[%s9694_s3 + $0x5a8] sm:$0xff]  ;;  %v5861_v63 = vcombine.low %v5829_v47, %v5833_v48  ;;  %v5844_v47 = vld [vmem:[%s9694_s3 + $0x5b8] sm:$0xff]  ;;  %v5865_v48 = vcombine.low %v5831_v5, %v5835_v16 }
 0x597   :  { %v8800_v16 = vld [vmem:[%s9692_s1 + $0x38] sm:$0xff]  }
 0x599   :  { %6377 = vmatpush3.bf16.msra.mxu1 %v8080_v55  ;;  %6399 = vmatpush3.bf16.msra.mxu0 %v8086_v45  ;;  %v5863_v55 = vcombine.low %v5830_v52, %v5834_v53  ;;  %v5870_v45 = vcombine.high %v5837_v56, %v5841_v60  ;;  %v5847_v52 = vld [vmem:[%s9694_s3 + $0x5d0] sm:$0xff] }
 0x59a   :  { %6378 = vmatprep.subr.bf16.mxu1 %v8092_v31  ;;  %6400 = vmatprep.subr.bf16.mxu0 %v8098_v32  ;;  %v5872_v31 = vcombine.high %v5838_v61, %v5842_v62  ;;  %v5869_v32 = vcombine.low %v5837_v56, %v5841_v60  ;;  %v5851_v53 = vld [vmem:[%s9694_s3 + $0x5f0] sm:$0xff]  ;;  %v5848_v56 = vld [vmem:[%s9694_s3 + $0x5d8] sm:$0xff] }
 0x59d   :  { %6379 = vmatpush3.bf16.msra.mxu1 %v8104_v33  ;;  %6401 = vmatpush3.bf16.msra.mxu0 %v8110_v36  ;;  %v5871_v33 = vcombine.low %v5838_v61, %v5842_v62  ;;  %v5845_v36 = vld [vmem:[%s9694_s3 + $0x5c0] sm:$0xff]  ;;  %v5875_v61 = vcombine.low %v5840_v46, %v5844_v47  ;;  %v5882_v62 = vcombine.high %v5847_v52, %v5851_v53 }
 0x59e   :  { %6380 = vmatprep.subr.bf16.mxu1 %v8116_v37  ;;  %6402 = vmatprep.subr.bf16.mxu0 %v8122_v38  ;;  %v5849_v37 = vld [vmem:[%s9694_s3 + $0x5e0] sm:$0xff]  ;;  %v5846_v38 = vld [vmem:[%s9694_s3 + $0x5c8] sm:$0xff] }
 0x5a1   :  { %6381 = vmatpush3.bf16.msra.mxu1 %v8132_v54  ;;  %6403 = vmatpush3.bf16.msra.mxu0 %v8138_v0  ;;  %v5878_v54 = vcombine.high %v5845_v36, %v5849_v37  ;;  %v5850_v0 = vld [vmem:[%s9694_s3 + $0x5e8] sm:$0xff] }
 0x5a2   :  { %6762 = vmatprep.subr.bf16.mxu1 %v7232_v35  ;;  %3324 = vmatprep.subr.bf16.mxu0 %v5856_v50 }
 0x5a4   :  { %2998 = vmatmul.mubr.bf16.vlgmr.msra.gmra.mrb[36].mxu1 %v5815_v26  ;;  %3038 = vmatmul.mubr.bf16.vlgmr.msra.gmra.mrb[40].mxu0 %v5817_v27  ;;  %v5832_v26 = vld [vmem:[%s9694_s3 + $0x558] sm:$0xff] }
 0x5a5   :  { %6763 = vmatpush3.bf16.msra.mxu1 %v8145_v59  ;;  %6770 = vmatprep.mubr.msk.bf16.mxu1 %vm7233_vm0, %v7232_v35  ;;  %v5877_v59 = vcombine.low %v5845_v36, %v5849_v37  ;;  %v8616_v36 = vld [vmem:[%s9692_s1 + $0xc0] sm:$0xff]  }
 0x5a6   :  { %6764 = vmatprep.subr.bf16.mxu1 %v7232_v35  ;;  %3356 = vmatprep.mubr.bf16.mxu0 %v7234_v57 }
 0x5a7   :  { %3325 = vmatpush1.bf16.msra.mxu0 %v5855_v49 }
 0x5a8   :  { %3326 = vmatprep.subr.bf16.mxu0 %v5864_v58  ;;  %v5852_v58 = vld [vmem:[%s9694_s3 + $0x5f8] sm:$0xff] }
 0x5a9   :  { %6765 = vmatpush3.bf16.msra.mxu1 %v8155_v1  ;;  %v5879_v1 = vcombine.low %v5846_v38, %v5850_v0 }
 0x5aa   :  { %6766 = vmatprep.subr.bf16.mxu1 %v7232_v35 }
 0x5ab   :  { %3327 = vmatpush1.bf16.msra.mxu0 %v5863_v55  ;;  %v5881_v55 = vcombine.low %v5847_v52, %v5851_v53 }
 0x5ac   :  { %3328 = vmatprep.subr.bf16.mxu0 %v5872_v31  ;;  %v8600_v31 = vld [vmem:[%s9693_s0 + $0x78] sm:$0xff] }
 0x5ad   :  { %6767 = vmatpush3.bf16.msra.mxu1 %v8162_v2  ;;  %v5880_v2 = vcombine.high %v5846_v38, %v5850_v0  ;;  %v5893_v37 = vcombine.high %v8600_v31, %v8600_v31  ;;  %v8634_v0 = vld [vmem:[%s9692_s1 + $0x80] sm:$0xff]   ;;  %v5892_v5 = vcombine.low %v8600_v31, %v8600_v31 }
 0x5ae   :  { %6768 = vmatprep.subr.bf16.mxu1 %v7232_v35 }
 0x5af   :  { %3329 = vmatpush1.bf16.msra.mxu0 %v5871_v33  ;;  %v8610_v33 = vld [vmem:[%s9692_s1 + $0x40] sm:$0xff]  }
 0x5b0   :  { %3330 = vmatprep.subr.bf16.mxu0 %v5880_v2  ;;  %v8652_v2 = vld [vmem:[%s9692_s1 + $0x8] sm:$0xff]  }
 0x5b1   :  { %6769 = vmatpush3.bf16.msra.mxu1 %v8172_v4  ;;  %v5823_v4 = vld [vmem:[%s9694_s3 + $0x510] sm:$0xff] }
 0x5b2   :  { %3283 = vmatprep.subr.bf16.mxu1 %v5854_v42  ;;  %v5858_v10 = vcombine.high %v5823_v4, %v5827_v8  ;;  %v5857_v12 = vcombine.low %v5823_v4, %v5827_v8  ;;  %v5843_v42 = vld [vmem:[%s9694_s3 + $0x5b0] sm:$0xff]  ;;  %v8658_v4 = vld [vmem:[%s9692_s1 + $0x88] sm:$0xff]  }
 0x5b3   :  { %3331 = vmatpush1.bf16.msra.mxu0 %v5879_v1  ;;  %v8646_v1 = vld [vmem:[%s9692_s1 + $0xc8] sm:$0xff]   ;;  %v8664_v8 = vld [vmem:[%s9692_s1 + $0x50] sm:$0xff]  }
 0x5b4   :  { %6771 = vmatmul.mubr.msk.bf16.vlgmr.msra.gmra.mrb[40].mxu1 %vm392_vm1, %v7142_v30  ;;  %3406 = vmatprep.subr.bf16.mxu0 %v5860_v14  ;;  %v8700_v14 = vld [vmem:[%s9692_s1 + $0x18] sm:$0xff]  }
 0x5b5   :  { %3315 = vmatprep.mubr.bf16.mxu1 %v7234_v57  ;;  %3284 = vmatpush1.bf16.msra.mxu1 %v5853_v41  ;;  %v5839_v41 = vld [vmem:[%s9694_s3 + $0x590] sm:$0xff] }
 0x5b6   :  { %3285 = vmatprep.subr.bf16.mxu1 %v5862_v51  ;;  %v5874_v50 = vcombine.high %v5839_v41, %v5843_v42  ;;  %v5876_v51 = vcombine.high %v5840_v46, %v5844_v47  ;;  %v5873_v60 = vcombine.low %v5839_v41, %v5843_v42  ;;  %v5902_v41 = vld [vmem:[%s9694_s3 + $0x620] sm:$0xff]  ;;  %v5899_v42 = vld [vmem:[%s9694_s3 + $0x608] sm:$0xff] }
 0x5b9   :  { %3286 = vmatpush1.bf16.msra.mxu1 %v5861_v63  ;;  %v5884_v63 = vcombine.high %v5848_v56, %v5852_v58 }
 0x5ba   :  { %3287 = vmatprep.subr.bf16.mxu1 %v5870_v45  ;;  %v5883_v45 = vcombine.low %v5848_v56, %v5852_v58  ;;  %v5907_v56 = vld [vmem:[%s9694_s3 + $0x648] sm:$0xff] }
 0x5bb   :  { %v5911_v58 = vld [vmem:[%s9694_s3 + $0x668] sm:$0xff] }
 0x5bc   :  { %v5940_v31 = vcombine.low %v5907_v56, %v5911_v58 }
 0x5bd   :  { %3288 = vmatpush1.bf16.msra.mxu1 %v5869_v32  ;;  %v8605_v32 = vld [vmem:[%s9693_s0 + $0x80] sm:$0xff] }
 0x5be   :  { %3289 = vmatprep.subr.bf16.mxu1 %v5878_v54  ;;  %v5895_v38 = vcombine.high %v8605_v32, %v8605_v32  ;;  %v8628_v54 = vld [vmem:[%s9692_s1] sm:$0xff]  }
 0x5c1   :  { %3290 = vmatpush1.bf16.msra.mxu1 %v5877_v59  ;;  %v8640_v59 = vld [vmem:[%s9692_s1 + $0x48] sm:$0xff]  }
 0x5c2   :  { %3365 = vmatprep.subr.bf16.mxu1 %v5858_v10  ;;  %v8676_v10 = vld [vmem:[%s9692_s1 + $0x10] sm:$0xff]  }
 0x677   :  { %v6382_v15 = vpop.f32.mrb[36].mxu1  ;;  %v6404_v18 = vpop.f32.mrb[40].mxu0 }
 0x678   :  { %v6383_v19 = vpop.f32.mrb[37].mxu1  ;;  %v6405_v20 = vpop.f32.mrb[41].mxu0 }
 0x679   :  { %v6384_v21 = vadd.f32 %v6383_v19, %v6382_v15  ;;  %v6385_v22 = vpop.f32.mrb[38].mxu1  ;;  %v6406_v23 = vadd.f32 %v6405_v20, %v6404_v18  ;;  %v6407_v17 = vpop.f32.mrb[42].mxu0  ;;  %v8706_v15 = vld [vmem:[%s9692_s1 + $0x98] sm:$0xff]   ;;  %v8712_v18 = vld [vmem:[%s9692_s1 + $0x60] sm:$0xff]  }
 0x67a   :  { %v6386_v7 = vpop.f32.mrb[39].mxu1  ;;  %v6408_v24 = vpop.f32.mrb[43].mxu0  ;;  %v8718_v19 = vld [vmem:[%s9692_s1 + $0xe0] sm:$0xff]   ;;  %v8736_v22 = vld [vmem:[%s9692_s1 + $0x68] sm:$0xff]  }
 0x67b   :  { %v3000_v25 = vadd.f32 %v8240_v44, %v6384_v21  ;;  %v5836_v44 = vld [vmem:[%s9694_s3 + $0x578] sm:$0xff]  ;;  %v8724_v20 = vld [vmem:[%s9692_s1 + $0x20] sm:$0xff]   ;;  %v8748_v17 = vld [vmem:[%s9692_s1 + $0x28] sm:$0xff]  }
 0x67c   :  { %v5868_v40 = vcombine.high %v5832_v26, %v5836_v44  ;;  %v5867_v49 = vcombine.low %v5832_v26, %v5836_v44  ;;  %v8730_v21 = vld [vmem:[%s9692_s1 + $0xa0] sm:$0xff]   ;;  %v8754_v7 = vld [vmem:[%s9692_s1 + $0xa8] sm:$0xff]   ;;  %v8760_v24 = vld [vmem:[%s9692_s1 + $0x70] sm:$0xff]  }
 0x67d   :  { %v3040_v28 = vadd.f32 %v6406_v23, %v3000_v25  ;;  %v8742_v23 = vld [vmem:[%s9692_s1 + $0xe8] sm:$0xff]   ;;  %v8766_v25 = vld [vmem:[%s9692_s1 + $0xf0] sm:$0xff]   ;;  %v8806_v26 = vld [vmem:[%s9692_s1 + $0xb8] sm:$0xff]  }
 0x67e   :  { %v8813_v44 = vld [vmem:[%s9692_s1 + $0x100] sm:$0xff]  }
 0x687   :  { %v3079_v29 = vpop.f32.mrb[40].mxu1 }
 0x688   :  { %v3080_v43 = vadd.f32 %v3079_v29, %v3040_v28  ;;  %v6772_v3 = vpop.f32.mrb[41].mxu1  ;;  %v8772_v28 = vld [vmem:[%s9692_s1 + $0x30] sm:$0xff]  }
 0x689   :  { %v3082_v6 = vpop.f32.mrb[42].mxu1  ;;  %v8778_v29 = vld [vmem:[%s9692_s1 + $0xb0] sm:$0xff]   ;;  %v8790_v3 = vld [vmem:[%s9692_s1 + $0xf8] sm:$0xff]  }
 0x68a   :  { %v3085_v27 = vmax.f32 %v3080_v43, 0.0  ;;  %v6773_v30 = vpop.f32.mrb[43].mxu1  ;;  %v8784_v43 = vld [vmem:[%s9692_s1 + $0x78] sm:$0xff]   ;;  %v5894_v6 = vcombine.low %v8605_v32, %v8605_v32 }
 0x68b   :  { %v8830_v30 = vld [vmem:[%s9692_s1 + $0x110] sm:$0xff]  }
 0x68c   :  { %v3086_v34 = vpack.c.bf16 %v3085_v27, %v3085_v27  ;;  %v8823_v27 = vld [vmem:[%s9692_s1 + $0x108] sm:$0xff]  }
 0x68e   :  { %5885 = vmatmul.mubr.msk.bf16.vlgmr.msra.gmra.mrb[4].mxu1 %vm392_vm1, %v3086_v34  ;;  %5886 = vmatmul.mubr.msk.bf16.vlgmr.msra.gmra.mrb[8].mxu0 %vm392_vm1, %v3086_v34 }
 0x68f   :  { %3366 = vmatpush1.bf16.msra.mxu1 %v5857_v12  ;;  %3407 = vmatpush1.bf16.msra.mxu0 %v5859_v13  ;;  %v8688_v12 = vld [vmem:[%s9692_s1 + $0x58] sm:$0xff]  }
 0x690   :  { %3367 = vmatprep.subr.bf16.mxu1 %v5866_v39  ;;  %3408 = vmatprep.subr.bf16.mxu0 %v5868_v40  ;;  %v8694_v13 = vld [vmem:[%s9692_s1 + $0xd8] sm:$0xff]   ;;  %v5898_v40 = vld [vmem:[%s9694_s3 + $0x600] sm:$0xff] }
 0x691   :  { %3397 = vmatprep.mubr.bf16.mxu1 %v7234_v57  ;;  %3438 = vmatprep.mubr.bf16.mxu0 %v7234_v57  ;;  %v8840_v39 = vld [vmem:[%s9692_s1 + $0x118] sm:$0xff]   ;;  %v5930_v46 = vcombine.low %v5898_v40, %v5902_v41  ;;  %v5931_v47 = vcombine.high %v5898_v40, %v5902_v41  ;;  %v5923_v40 = vld [vmem:[%s9694_s3 + $0x6c8] sm:$0xff] }
 0x693   :  { %3368 = vmatpush1.bf16.msra.mxu1 %v5865_v48  ;;  %3409 = vmatpush1.bf16.msra.mxu0 %v5867_v49  ;;  %v5903_v48 = vld [vmem:[%s9694_s3 + $0x628] sm:$0xff]  ;;  %v5906_v49 = vld [vmem:[%s9694_s3 + $0x640] sm:$0xff] }
 0x694   :  { %3369 = vmatprep.subr.bf16.mxu1 %v5874_v50  ;;  %3410 = vmatprep.subr.bf16.mxu0 %v5876_v51  ;;  %v5910_v50 = vld [vmem:[%s9694_s3 + $0x660] sm:$0xff]  ;;  %v5932_v51 = vcombine.low %v5899_v42, %v5903_v48  ;;  %v5933_v52 = vcombine.high %v5899_v42, %v5903_v48  ;;  %v5927_v42 = vld [vmem:[%s9694_s3 + $0x6e8] sm:$0xff] }
 0x695   :  { %v5939_v53 = vcombine.high %v5906_v49, %v5910_v50  ;;  %v5957_v48 = vcombine.high %v5923_v40, %v5927_v42 }
 0x697   :  { %3370 = vmatpush1.bf16.msra.mxu1 %v5873_v60  ;;  %3411 = vmatpush1.bf16.msra.mxu0 %v5875_v61  ;;  %v5914_v60 = vld [vmem:[%s9694_s3 + $0x680] sm:$0xff]  ;;  %v5941_v61 = vcombine.high %v5907_v56, %v5911_v58 }
 0x698   :  { %3371 = vmatprep.subr.bf16.mxu1 %v5882_v62  ;;  %3412 = vmatprep.subr.bf16.mxu0 %v5884_v63  ;;  %v5918_v62 = vld [vmem:[%s9694_s3 + $0x6a0] sm:$0xff]  ;;  %v5915_v63 = vld [vmem:[%s9694_s3 + $0x688] sm:$0xff] }
 0x699   :  { %v5947_v32 = vcombine.high %v5914_v60, %v5918_v62 }
 0x69b   :  { %3372 = vmatpush1.bf16.msra.mxu1 %v5881_v55  ;;  %3413 = vmatpush1.bf16.msra.mxu0 %v5883_v45  ;;  %v5919_v55 = vld [vmem:[%s9694_s3 + $0x6a8] sm:$0xff]  ;;  %v5938_v45 = vcombine.low %v5906_v49, %v5910_v50  ;;  %v5900_v49 = vld [vmem:[%s9694_s3 + $0x610] sm:$0xff] }
 0x69c   :  { %6415 = vmatprep.subr.bf16.mxu0 %v8610_v33  ;;  %6437 = vmatprep.subr.bf16.mxu1 %v8616_v36  ;;  %v5904_v50 = vld [vmem:[%s9694_s3 + $0x630] sm:$0xff] }
 0x69d   :  { %v5934_v56 = vcombine.low %v5900_v49, %v5904_v50 }
 0x69e   :  { %5887 = vmatmul.mubr.msk.bf16.vlgmr.msra.gmra.mrb[8].mxu1 %vm392_vm1, %v3086_v34  ;;  %5888 = vmatmul.mubr.msk.bf16.vlgmr.msra.gmra.mrb[12].mxu0 %vm392_vm1, %v3086_v34  ;;  %v7147_v34 = vld [vmem:[%s9693_s0 + $0x88] ss:$0 sps:$4 sm:$0xff]  }
 0x69f   :  { %6416 = vmatpush3.bf16.msra.mxu0 %v8628_v54  ;;  %6438 = vmatpush3.bf16.msra.mxu1 %v8634_v0 }
 0x6a0   :  { %6417 = vmatprep.subr.bf16.mxu0 %v8640_v59  ;;  %6439 = vmatprep.subr.bf16.mxu1 %v8646_v1 }
 0x6a1   :  { %3511 = vmatprep.mubr.bf16.mxu0 %v5893_v37  ;;  %3551 = vmatprep.mubr.bf16.mxu1 %v5895_v38  ;;  %v5949_v37 = vcombine.high %v5915_v63, %v5919_v55  ;;  %v5946_v38 = vcombine.low %v5914_v60, %v5918_v62 }
 0x6a3   :  { %6418 = vmatpush3.bf16.msra.mxu0 %v8652_v2  ;;  %6440 = vmatpush3.bf16.msra.mxu1 %v8658_v4 }
 0x6a4   :  { %6419 = vmatprep.subr.bf16.mxu0 %v8664_v8  ;;  %6441 = vmatprep.subr.bf16.mxu1 %v8670_v9 }
 0x6a7   :  { %6420 = vmatpush3.bf16.msra.mxu0 %v8676_v10  ;;  %6442 = vmatpush3.bf16.msra.mxu1 %v8682_v11 }
 0x6a8   :  { %6421 = vmatprep.subr.bf16.mxu0 %v8688_v12  ;;  %6443 = vmatprep.subr.bf16.mxu1 %v8694_v13 }
 0x6ab   :  { %6422 = vmatpush3.bf16.msra.mxu0 %v8700_v14  ;;  %6444 = vmatpush3.bf16.msra.mxu1 %v8706_v15 }
 0x6ac   :  { %6423 = vmatprep.subr.bf16.mxu0 %v8712_v18  ;;  %6445 = vmatprep.subr.bf16.mxu1 %v8718_v19 }
 0x6af   :  { %6424 = vmatpush3.bf16.msra.mxu0 %v8724_v20  ;;  %6446 = vmatpush3.bf16.msra.mxu1 %v8730_v21 }
 0x6b0   :  { %6425 = vmatprep.subr.bf16.mxu0 %v8736_v22  ;;  %6447 = vmatprep.subr.bf16.mxu1 %v8742_v23 }
 0x6b3   :  { %6426 = vmatpush3.bf16.msra.mxu0 %v8748_v17  ;;  %6448 = vmatpush3.bf16.msra.mxu1 %v8754_v7 }
 0x6b4   :  { %6427 = vmatprep.subr.bf16.mxu0 %v8760_v24  ;;  %6449 = vmatprep.subr.bf16.mxu1 %v8766_v25 }
 0x6b7   :  { %6428 = vmatpush3.bf16.msra.mxu0 %v8772_v28  ;;  %6450 = vmatpush3.bf16.msra.mxu1 %v8778_v29 }
 0x6b8   :  { %6429 = vmatprep.subr.bf16.mxu0 %v8784_v43  ;;  %6451 = vmatprep.subr.bf16.mxu1 %v8790_v3 }
 0x6bb   :  { %6430 = vmatpush3.bf16.msra.mxu0 %v8800_v16  ;;  %6452 = vmatpush3.bf16.msra.mxu1 %v8806_v26 }
 0x6bc   :  { %6774 = vmatprep.subr.bf16.mxu0 %v7232_v35  ;;  %3797 = vmatprep.subr.bf16.mxu1 %v5931_v47  ;;  %v5956_v47 = vcombine.low %v5923_v40, %v5927_v42 }
 0x6be   :  { %3512 = vmatmul.mubr.bf16.vlgmr.msra.gmra.mrb[44].mxu0 %v5892_v5  ;;  %3552 = vmatmul.mubr.bf16.vlgmr.msra.gmra.mrb[44].mxu1 %v5894_v6  ;;  %v5948_v5 = vcombine.low %v5915_v63, %v5919_v55  ;;  %v5922_v6 = vld [vmem:[%s9694_s3 + $0x6c0] sm:$0xff] }
 0x6bf   :  { %6775 = vmatpush3.bf16.msra.mxu0 %v8813_v44  ;;  %6782 = vmatprep.mubr.msk.bf16.mxu0 %vm7233_vm0, %v7232_v35 }
 0x6c0   :  { %6776 = vmatprep.subr.bf16.mxu0 %v7232_v35  ;;  %3829 = vmatprep.mubr.bf16.mxu1 %v7234_v57 }
 0x6c1   :  { %3798 = vmatpush1.bf16.msra.mxu1 %v5930_v46 }
 0x6c2   :  { %3799 = vmatprep.subr.bf16.mxu1 %v5939_v53  ;;  %v5905_v53 = vld [vmem:[%s9694_s3 + $0x638] sm:$0xff] }
 0x6c3   :  { %6777 = vmatpush3.bf16.msra.mxu0 %v8823_v27 }
 0x6c4   :  { %6778 = vmatprep.subr.bf16.mxu0 %v7232_v35 }
 0x6c5   :  { %3800 = vmatpush1.bf16.msra.mxu1 %v5938_v45 }
 0x6c6   :  { %3801 = vmatprep.subr.bf16.mxu1 %v5947_v32 }
 0x6c7   :  { %6779 = vmatpush3.bf16.msra.mxu0 %v8830_v30 }
 0x6c8   :  { %6780 = vmatprep.subr.bf16.mxu0 %v7232_v35 }
 0x6c9   :  { %3802 = vmatpush1.bf16.msra.mxu1 %v5946_v38 }
 0x6cb   :  { %6781 = vmatpush3.bf16.msra.mxu0 %v8840_v39 }
 0x6cc   :  { %3838 = vmatprep.subr.bf16.mxu0 %v5933_v52  ;;  %v5935_v52 = vcombine.high %v5900_v49, %v5904_v50  ;;  %v5912_v49 = vld [vmem:[%s9694_s3 + $0x670] sm:$0xff]  ;;  %v5909_v50 = vld [vmem:[%s9694_s3 + $0x658] sm:$0xff] }
 0x6ce   :  { %6783 = vmatmul.mubr.msk.bf16.vlgmr.msra.gmra.mrb[48].mxu0 %vm392_vm1, %v7147_v34  ;;  %v5926_v34 = vld [vmem:[%s9694_s3 + $0x6e0] sm:$0xff] }
 0x6cf   :  { %3870 = vmatprep.mubr.bf16.mxu0 %v7234_v57  ;;  %3839 = vmatpush1.bf16.msra.mxu0 %v5932_v51  ;;  %v5955_v41 = vcombine.high %v5922_v6, %v5926_v34  ;;  %v5954_v46 = vcombine.low %v5922_v6, %v5926_v34  ;;  %v5901_v51 = vld [vmem:[%s9694_s3 + $0x618] sm:$0xff]  ;;  %v8908_v6 = vld [vmem:[%s9695_s2] ss:$0 sm:$0xff] }
 0x6d0   :  { %3840 = vmatprep.subr.bf16.mxu0 %v5941_v61  ;;  %v5936_v58 = vcombine.low %v5901_v51, %v5905_v53  ;;  %v5937_v60 = vcombine.high %v5901_v51, %v5905_v53  ;;  %v5913_v51 = vld [vmem:[%s9694_s3 + $0x678] sm:$0xff] }
 0x6d1   :  { %3803 = vmatprep.subr.bf16.mxu1 %v5955_v41 }
 0x6d2   :  { %3804 = vmatpush1.bf16.msra.mxu1 %v5954_v46 }
 0x6d3   :  { %3841 = vmatpush1.bf16.msra.mxu0 %v5940_v31  ;;  %3879 = vmatprep.subr.bf16.mxu1 %v5935_v52 }
 0x6d4   :  { %3842 = vmatprep.subr.bf16.mxu0 %v5949_v37 }
 0x6d7   :  { %3843 = vmatpush1.bf16.msra.mxu0 %v5948_v5 }
 0x6d8   :  { %3844 = vmatprep.subr.bf16.mxu0 %v5957_v48 }
 0x6db   :  { %3845 = vmatpush1.bf16.msra.mxu0 %v5956_v47  ;;  %v5908_v47 = vld [vmem:[%s9694_s3 + $0x650] sm:$0xff] }
 0x6dc   :  { %3920 = vmatprep.subr.bf16.mxu0 %v5937_v60 }
 0x791   :  { %v6431_v61 = vpop.f32.mrb[44].mxu0  ;;  %v6453_v62 = vpop.f32.mrb[44].mxu1 }
 0x792   :  { %v6432_v63 = vpop.f32.mrb[45].mxu0  ;;  %v6454_v55 = vpop.f32.mrb[45].mxu1 }
 0x793   :  { %v6433_v45 = vadd.f32 %v6432_v63, %v6431_v61  ;;  %v6434_v31 = vpop.f32.mrb[46].mxu0  ;;  %v6455_v32 = vadd.f32 %v6454_v55, %v6453_v62  ;;  %v6456_v37 = vpop.f32.mrb[46].mxu1  ;;  %v5943_v61 = vcombine.high %v5908_v47, %v5912_v49  ;;  %v5945_v62 = vcombine.high %v5909_v50, %v5913_v51  ;;  %v5916_v63 = vld [vmem:[%s9694_s3 + $0x690] sm:$0xff] }
 0x794   :  { %v6435_v38 = vpop.f32.mrb[47].mxu0  ;;  %v6457_v5 = vpop.f32.mrb[47].mxu1  ;;  %v5920_v55 = vld [vmem:[%s9694_s3 + $0x6b0] sm:$0xff]  ;;  %v5921_v31 = vld [vmem:[%s9694_s3 + $0x6b8] sm:$0xff]  ;;  %v5944_v37 = vcombine.low %v5909_v50, %v5913_v51 }
 0x795   :  { %v3514_v34 = vadd.f32 %v8908_v6, %v6433_v45  ;;  %v5917_v45 = vld [vmem:[%s9694_s3 + $0x698] sm:$0xff]  ;;  %v5951_v38 = vcombine.high %v5916_v63, %v5920_v55  ;;  %v5966_v50 = vld [vmem:[%s9693_s0 + $0x8c] sm:$0xff] }
 0x796   :  { %v5953_v5 = vcombine.high %v5917_v45, %v5921_v31  ;;  %v5967_v51 = vld [vmem:[%s9693_s0 + $0x94] sm:$0xff] }
 0x797   :  { %v3554_v40 = vadd.f32 %v6455_v32, %v3514_v34  ;;  %v5942_v32 = vcombine.low %v5908_v47, %v5912_v49  ;;  %v5924_v34 = vld [vmem:[%s9694_s3 + $0x6d0] sm:$0xff] }
 0x7a1   :  { %v3593_v41 = vpop.f32.mrb[48].mxu0 }
 0x7a2   :  { %v3594_v42 = vadd.f32 %v3593_v41, %v3554_v40  ;;  %v6784_v46 = vpop.f32.mrb[49].mxu0  ;;  %v5928_v40 = vld [vmem:[%s9694_s3 + $0x6f0] sm:$0xff]  ;;  %v5925_v41 = vld [vmem:[%s9694_s3 + $0x6d8] sm:$0xff] }
 0x7a3   :  { %v3596_v48 = vpop.f32.mrb[50].mxu0  ;;  %v5959_v46 = vcombine.high %v5924_v34, %v5928_v40 }
 0x7a4   :  { %v3599_v52 = vmax.f32 %v3594_v42, 0.0  ;;  %v6785_v53 = vpop.f32.mrb[51].mxu0  ;;  %v5952_v42 = vcombine.low %v5917_v45, %v5921_v31  ;;  %v5958_v48 = vcombine.low %v5924_v34, %v5928_v40  ;;  %v5976_v45 = vld [vmem:[%s9694_s3 + $0x708] sm:$0xff] }
 0x7a5   :  { %v5972_v53 = vcombine.high %v5967_v51, %v5967_v51 }
 0x7a6   :  { %v3600_v60 = vpack.c.bf16 %v3599_v52, %v3599_v52  ;;  %v5970_v52 = vcombine.high %v5966_v50, %v5966_v50 }
 0x7a8   :  { %5962 = vmatmul.mubr.msk.bf16.vlgmr.msra.gmra.mrb[4].mxu1 %vm392_vm1, %v3600_v60  ;;  %5963 = vmatmul.mubr.msk.bf16.vlgmr.msra.gmra.mrb[8].mxu0 %vm392_vm1, %v3600_v60 }
 0x7a9   :  { %3880 = vmatpush1.bf16.msra.mxu1 %v5934_v56  ;;  %3921 = vmatpush1.bf16.msra.mxu0 %v5936_v58  ;;  %v5929_v56 = vld [vmem:[%s9694_s3 + $0x6f8] sm:$0xff]  ;;  %v5950_v58 = vcombine.low %v5916_v63, %v5920_v55  ;;  %v5975_v63 = vld [vmem:[%s9694_s3 + $0x700] sm:$0xff] }
 0x7aa   :  { %3881 = vmatprep.subr.bf16.mxu1 %v5943_v61  ;;  %3922 = vmatprep.subr.bf16.mxu0 %v5945_v62  ;;  %v5961_v47 = vcombine.high %v5925_v41, %v5929_v56  ;;  %v5960_v49 = vcombine.low %v5925_v41, %v5929_v56  ;;  %v5971_v61 = vcombine.low %v5967_v51, %v5967_v51  ;;  %v7152_v62 = vld [vmem:[%s9693_s0 + $0x9c] ss:$0 sps:$4 sm:$0xff]   ;;  %v5979_v55 = vld [vmem:[%s9694_s3 + $0x720] sm:$0xff]  ;;  %v5984_v56 = vld [vmem:[%s9694_s3 + $0x748] sm:$0xff] }
 0x7ab   :  { %3911 = vmatprep.mubr.bf16.mxu1 %v7234_v57  ;;  %3952 = vmatprep.mubr.bf16.mxu0 %v7234_v57  ;;  %v6007_v31 = vcombine.low %v5975_v63, %v5979_v55 }
 0x7ad   :  { %3882 = vmatpush1.bf16.msra.mxu1 %v5942_v32  ;;  %3923 = vmatpush1.bf16.msra.mxu0 %v5944_v37  ;;  %v6008_v32 = vcombine.high %v5975_v63, %v5979_v55  ;;  %v5980_v37 = vld [vmem:[%s9694_s3 + $0x728] sm:$0xff]  ;;  %v6003_v63 = vld [vmem:[%s9694_s3 + $0x7e0] sm:$0xff] }
 0x7ae   :  { %3883 = vmatprep.subr.bf16.mxu1 %v5951_v38  ;;  %3924 = vmatprep.subr.bf16.mxu0 %v5953_v5  ;;  %v5983_v38 = vld [vmem:[%s9694_s3 + $0x740] sm:$0xff]  ;;  %v6009_v34 = vcombine.low %v5976_v45, %v5980_v37  ;;  %v6010_v40 = vcombine.high %v5976_v45, %v5980_v37  ;;  %v6000_v55 = vld [vmem:[%s9694_s3 + $0x7c8] sm:$0xff] }
 0x7af   :  { %v5987_v5 = vld [vmem:[%s9694_s3 + $0x760] sm:$0xff] }
 0x7b0   :  { %v6016_v41 = vcombine.high %v5983_v38, %v5987_v5 }
 0x7b1   :  { %3884 = vmatpush1.bf16.msra.mxu1 %v5950_v58  ;;  %3925 = vmatpush1.bf16.msra.mxu0 %v5952_v42  ;;  %v5988_v58 = vld [vmem:[%s9694_s3 + $0x768] sm:$0xff]  ;;  %v5991_v42 = vld [vmem:[%s9694_s3 + $0x780] sm:$0xff] }
 0x7b2   :  { %3885 = vmatprep.subr.bf16.mxu1 %v5959_v46  ;;  %3926 = vmatprep.subr.bf16.mxu0 %v5961_v47  ;;  %v6018_v46 = vcombine.high %v5984_v56, %v5988_v58  ;;  %v5995_v47 = vld [vmem:[%s9694_s3 + $0x7a0] sm:$0xff]  ;;  %v6017_v51 = vcombine.low %v5984_v56, %v5988_v58  ;;  %v5982_v56 = vld [vmem:[%s9694_s3 + $0x738] sm:$0xff] }
 0x7b5   :  { %3886 = vmatpush1.bf16.msra.mxu1 %v5958_v48  ;;  %3927 = vmatpush1.bf16.msra.mxu0 %v5960_v49  ;;  %v5992_v48 = vld [vmem:[%s9694_s3 + $0x788] sm:$0xff] }
 0x7b6   :  { %6464 = vmatprep.subr.bf16.mxu1 %v8610_v33  ;;  %6486 = vmatprep.subr.bf16.mxu0 %v8616_v36  ;;  %v5996_v49 = vld [vmem:[%s9694_s3 + $0x7a8] sm:$0xff] }
 0x7b8   :  { %5964 = vmatmul.mubr.msk.bf16.vlgmr.msra.gmra.mrb[8].mxu1 %vm392_vm1, %v3600_v60  ;;  %5965 = vmatmul.mubr.msk.bf16.vlgmr.msra.gmra.mrb[12].mxu0 %vm392_vm1, %v3600_v60  ;;  %v5969_v60 = vcombine.low %v5966_v50, %v5966_v50  ;;  %v6015_v50 = vcombine.low %v5983_v38, %v5987_v5  ;;  %v5977_v5 = vld [vmem:[%s9694_s3 + $0x710] sm:$0xff] }
 0x7b9   :  { %6465 = vmatpush3.bf16.msra.mxu1 %v8628_v54  ;;  %6487 = vmatpush3.bf16.msra.mxu0 %v8634_v0 }
 0x7ba   :  { %6466 = vmatprep.subr.bf16.mxu1 %v8640_v59  ;;  %6488 = vmatprep.subr.bf16.mxu0 %v8646_v1 }
 0x7bb   :  { %4025 = vmatprep.mubr.bf16.mxu1 %v5970_v52  ;;  %4065 = vmatprep.mubr.bf16.mxu0 %v5972_v53  ;;  %v6024_v52 = vcombine.high %v5991_v42, %v5995_v47  ;;  %v6026_v53 = vcombine.high %v5992_v48, %v5996_v49 }
 0x7bd   :  { %6467 = vmatpush3.bf16.msra.mxu1 %v8652_v2  ;;  %6489 = vmatpush3.bf16.msra.mxu0 %v8658_v4 }
 0x7be   :  { %6468 = vmatprep.subr.bf16.mxu1 %v8664_v8  ;;  %6490 = vmatprep.subr.bf16.mxu0 %v8670_v9 }
 0x7c1   :  { %6469 = vmatpush3.bf16.msra.mxu1 %v8676_v10  ;;  %6491 = vmatpush3.bf16.msra.mxu0 %v8682_v11 }
 0x7c2   :  { %6470 = vmatprep.subr.bf16.mxu1 %v8688_v12  ;;  %6492 = vmatprep.subr.bf16.mxu0 %v8694_v13 }
 0x7c5   :  { %6471 = vmatpush3.bf16.msra.mxu1 %v8700_v14  ;;  %6493 = vmatpush3.bf16.msra.mxu0 %v8706_v15 }
 0x7c6   :  { %6472 = vmatprep.subr.bf16.mxu1 %v8712_v18  ;;  %6494 = vmatprep.subr.bf16.mxu0 %v8718_v19 }
 0x7c9   :  { %6473 = vmatpush3.bf16.msra.mxu1 %v8724_v20  ;;  %6495 = vmatpush3.bf16.msra.mxu0 %v8730_v21 }
 0x7ca   :  { %6474 = vmatprep.subr.bf16.mxu1 %v8736_v22  ;;  %6496 = vmatprep.subr.bf16.mxu0 %v8742_v23 }
 0x7cd   :  { %6475 = vmatpush3.bf16.msra.mxu1 %v8748_v17  ;;  %6497 = vmatpush3.bf16.msra.mxu0 %v8754_v7 }
 0x7ce   :  { %6476 = vmatprep.subr.bf16.mxu1 %v8760_v24  ;;  %6498 = vmatprep.subr.bf16.mxu0 %v8766_v25 }
 0x7d1   :  { %6477 = vmatpush3.bf16.msra.mxu1 %v8772_v28  ;;  %6499 = vmatpush3.bf16.msra.mxu0 %v8778_v29 }
 0x7d2   :  { %6478 = vmatprep.subr.bf16.mxu1 %v8784_v43  ;;  %6500 = vmatprep.subr.bf16.mxu0 %v8790_v3 }
 0x7d5   :  { %6479 = vmatpush3.bf16.msra.mxu1 %v8800_v16  ;;  %6501 = vmatpush3.bf16.msra.mxu0 %v8806_v26 }
 0x7d6   :  { %6786 = vmatprep.subr.bf16.mxu1 %v7232_v35  ;;  %4352 = vmatprep.subr.bf16.mxu0 %v6010_v40  ;;  %v5978_v40 = vld [vmem:[%s9694_s3 + $0x718] sm:$0xff] }
 0x7d8   :  { %4026 = vmatmul.mubr.bf16.vlgmr.msra.gmra.mrb[48].mxu1 %v5969_v60  ;;  %4066 = vmatmul.mubr.bf16.vlgmr.msra.gmra.mrb[52].mxu0 %v5971_v61  ;;  %v6023_v60 = vcombine.low %v5991_v42, %v5995_v47  ;;  %v6025_v61 = vcombine.low %v5992_v48, %v5996_v49  ;;  %v6013_v42 = vcombine.low %v5978_v40, %v5982_v56 }
 0x7d9   :  { %6787 = vmatpush3.bf16.msra.mxu1 %v8813_v44  ;;  %6794 = vmatprep.mubr.msk.bf16.mxu1 %vm7233_vm0, %v7232_v35 }
 0x7da   :  { %6788 = vmatprep.subr.bf16.mxu1 %v7232_v35  ;;  %4384 = vmatprep.mubr.bf16.mxu0 %v7234_v57 }
 0x7db   :  { %4353 = vmatpush1.bf16.msra.mxu0 %v6009_v34  ;;  %v5981_v34 = vld [vmem:[%s9694_s3 + $0x730] sm:$0xff] }
 0x7dc   :  { %4354 = vmatprep.subr.bf16.mxu0 %v6018_v46  ;;  %v6011_v58 = vcombine.low %v5977_v5, %v5981_v34  ;;  %v6014_v46 = vcombine.high %v5978_v40, %v5982_v56  ;;  %v5990_v40 = vld [vmem:[%s9694_s3 + $0x778] sm:$0xff] }
 0x7dd   :  { %6789 = vmatpush3.bf16.msra.mxu1 %v8823_v27 }
 0x7de   :  { %6790 = vmatprep.subr.bf16.mxu1 %v7232_v35 }
 0x7df   :  { %4355 = vmatpush1.bf16.msra.mxu0 %v6017_v51 }
 0x7e0   :  { %4356 = vmatprep.subr.bf16.mxu0 %v6026_v53 }
 0x7e1   :  { %6791 = vmatpush3.bf16.msra.mxu1 %v8830_v30 }
 0x7e2   :  { %6792 = vmatprep.subr.bf16.mxu1 %v7232_v35 }
 0x7e3   :  { %4357 = vmatpush1.bf16.msra.mxu0 %v6025_v61 }
 0x7e5   :  { %6793 = vmatpush3.bf16.msra.mxu1 %v8840_v39 }
 0x7e6   :  { %4311 = vmatprep.subr.bf16.mxu1 %v6008_v32 }
 0x7e8   :  { %6795 = vmatmul.mubr.msk.bf16.vlgmr.msra.gmra.mrb[52].mxu1 %vm392_vm1, %v7152_v62  ;;  %v5999_v62 = vld [vmem:[%s9694_s3 + $0x7c0] sm:$0xff] }
 0x7e9   :  { %4343 = vmatprep.mubr.bf16.mxu1 %v7234_v57  ;;  %4312 = vmatpush1.bf16.msra.mxu1 %v6007_v31  ;;  %v6032_v45 = vcombine.high %v5999_v62, %v6003_v63  ;;  %v6004_v31 = vld [vmem:[%s9694_s3 + $0x7e8] sm:$0xff]  ;;  %v6031_v32 = vcombine.low %v5999_v62, %v6003_v63 }
 0x7ea   :  { %4313 = vmatprep.subr.bf16.mxu1 %v6016_v41  ;;  %v6033_v37 = vcombine.low %v6000_v55, %v6004_v31  ;;  %v6034_v38 = vcombine.high %v6000_v55, %v6004_v31  ;;  %v6012_v41 = vcombine.high %v5977_v5, %v5981_v34  ;;  %v5989_v5 = vld [vmem:[%s9694_s3 + $0x770] sm:$0xff]  ;;  %v5986_v34 = vld [vmem:[%s9694_s3 + $0x758] sm:$0xff] }
 0x7ec   :  { %4358 = vmatprep.subr.bf16.mxu0 %v6034_v38 }
 0x7ed   :  { %4314 = vmatpush1.bf16.msra.mxu1 %v6015_v50  ;;  %4359 = vmatpush1.bf16.msra.mxu0 %v6033_v37  ;;  %v5985_v37 = vld [vmem:[%s9694_s3 + $0x750] sm:$0xff] }
 0x7ee   :  { %4315 = vmatprep.subr.bf16.mxu1 %v6024_v52  ;;  %4434 = vmatprep.subr.bf16.mxu0 %v6014_v46 }
 0x7f1   :  { %4316 = vmatpush1.bf16.msra.mxu1 %v6023_v60 }
 0x7f2   :  { %4317 = vmatprep.subr.bf16.mxu1 %v6032_v45 }
 0x7f5   :  { %4318 = vmatpush1.bf16.msra.mxu1 %v6031_v32 }
 0x7f6   :  { %4393 = vmatprep.subr.bf16.mxu1 %v6012_v41 }
 0x8ab   :  { %v6480_v47 = vpop.f32.mrb[48].mxu1  ;;  %v6502_v48 = vpop.f32.mrb[52].mxu0 }
 0x8ac   :  { %v6481_v49 = vpop.f32.mrb[49].mxu1  ;;  %v6503_v50 = vpop.f32.mrb[53].mxu0 }
 0x8ad   :  { %v6482_v51 = vadd.f32 %v6481_v49, %v6480_v47  ;;  %v6483_v52 = vpop.f32.mrb[50].mxu1  ;;  %v6504_v53 = vadd.f32 %v6503_v50, %v6502_v48  ;;  %v6505_v60 = vpop.f32.mrb[54].mxu0  ;;  %v6020_v47 = vcombine.high %v5985_v37, %v5989_v5  ;;  %v6022_v48 = vcombine.high %v5986_v34, %v5990_v40  ;;  %v5993_v49 = vld [vmem:[%s9694_s3 + $0x790] sm:$0xff] }
 0x8ae   :  { %v6484_v61 = vpop.f32.mrb[51].mxu1  ;;  %v6506_v62 = vpop.f32.mrb[55].mxu0  ;;  %v5997_v50 = vld [vmem:[%s9694_s3 + $0x7b0] sm:$0xff]  ;;  %v5998_v52 = vld [vmem:[%s9694_s3 + $0x7b8] sm:$0xff]  ;;  %v6021_v60 = vcombine.low %v5986_v34, %v5990_v40  ;;  %v6043_v34 = vld [vmem:[%s9693_s0 + $0xa0] sm:$0xff] }
 0x8af   :  { %v4028_v63 = vadd.f32 %v8908_v6, %v6482_v51  ;;  %v5994_v51 = vld [vmem:[%s9694_s3 + $0x798] sm:$0xff]  ;;  %v6028_v61 = vcombine.high %v5993_v49, %v5997_v50  ;;  %v6044_v40 = vld [vmem:[%s9693_s0 + $0xa8] sm:$0xff] }
 0x8b0   :  { %v6030_v62 = vcombine.high %v5994_v51, %v5998_v52 }
 0x8b1   :  { %v4068_v55 = vadd.f32 %v6504_v53, %v4028_v63  ;;  %v6019_v53 = vcombine.low %v5985_v37, %v5989_v5  ;;  %v6001_v63 = vld [vmem:[%s9694_s3 + $0x7d0] sm:$0xff] }
 0x8bb   :  { %v4107_v45 = vpop.f32.mrb[52].mxu1 }
 0x8bc   :  { %v4108_v31 = vadd.f32 %v4107_v45, %v4068_v55  ;;  %v6796_v32 = vpop.f32.mrb[53].mxu1  ;;  %v6005_v55 = vld [vmem:[%s9694_s3 + $0x7f0] sm:$0xff]  ;;  %v6002_v45 = vld [vmem:[%s9694_s3 + $0x7d8] sm:$0xff] }
 0x8bd   :  { %v4110_v38 = vpop.f32.mrb[54].mxu1  ;;  %v6036_v32 = vcombine.high %v6001_v63, %v6005_v55 }
 0x8be   :  { %v4113_v41 = vmax.f32 %v4108_v31, 0.0  ;;  %v6797_v56 = vpop.f32.mrb[55].mxu1  ;;  %v6029_v31 = vcombine.low %v5994_v51, %v5998_v52  ;;  %v6035_v38 = vcombine.low %v6001_v63, %v6005_v55 }
 0x8bf   :  { %v6049_v56 = vcombine.high %v6044_v40, %v6044_v40 }
 0x8c0   :  { %v4114_v46 = vpack.c.bf16 %v4113_v41, %v4113_v41  ;;  %v6047_v41 = vcombine.high %v6043_v34, %v6043_v34 }
 0x8c2   :  { %6039 = vmatmul.mubr.msk.bf16.vlgmr.msra.gmra.mrb[4].mxu1 %vm392_vm1, %v4114_v46  ;;  %6040 = vmatmul.mubr.msk.bf16.vlgmr.msra.gmra.mrb[8].mxu0 %vm392_vm1, %v4114_v46 }
 0x8c3   :  { %4394 = vmatpush1.bf16.msra.mxu1 %v6011_v58  ;;  %4435 = vmatpush1.bf16.msra.mxu0 %v6013_v42  ;;  %v6006_v58 = vld [vmem:[%s9694_s3 + $0x7f8] sm:$0xff]  ;;  %v6027_v42 = vcombine.low %v5993_v49, %v5997_v50 }
 0x8c4   :  { %4395 = vmatprep.subr.bf16.mxu1 %v6020_v47  ;;  %4436 = vmatprep.subr.bf16.mxu0 %v6022_v48  ;;  %v6038_v37 = vcombine.high %v6002_v45, %v6006_v58  ;;  %v6037_v5 = vcombine.low %v6002_v45, %v6006_v58  ;;  %v6059_v48 = vld [vmem:[%s9694_s3 + $0x838] sm:$0xff] }
 0x8c5   :  { %4425 = vmatprep.mubr.bf16.mxu1 %v7234_v57  ;;  %4466 = vmatprep.mubr.bf16.mxu0 %v7234_v57 }
 0x8c7   :  { %4396 = vmatpush1.bf16.msra.mxu1 %v6019_v53  ;;  %4437 = vmatpush1.bf16.msra.mxu0 %v6021_v60 }
 0x8c8   :  { %4397 = vmatprep.subr.bf16.mxu1 %v6028_v61  ;;  %4438 = vmatprep.subr.bf16.mxu0 %v6030_v62 }
 0x8cb   :  { %4398 = vmatpush1.bf16.msra.mxu1 %v6027_v42  ;;  %4439 = vmatpush1.bf16.msra.mxu0 %v6029_v31 }
 0x8cc   :  { %4399 = vmatprep.subr.bf16.mxu1 %v6036_v32  ;;  %4440 = vmatprep.subr.bf16.mxu0 %v6038_v37 }
 0x8cf   :  { %4400 = vmatpush1.bf16.msra.mxu1 %v6035_v38  ;;  %4441 = vmatpush1.bf16.msra.mxu0 %v6037_v5 }
 0x8d0   :  { %6513 = vmatprep.subr.bf16.mxu0 %v8610_v33  ;;  %6535 = vmatprep.subr.bf16.mxu1 %v8616_v36  ;;  %v6046_v33 = vcombine.low %v6043_v34, %v6043_v34  ;;  %v6048_v36 = vcombine.low %v6044_v40, %v6044_v40  ;;  %v6062_v34 = vld [vmem:[%s9694_s3 + $0x850] sm:$0xff] }
 0x8d2   :  { %6041 = vmatmul.mubr.msk.bf16.vlgmr.msra.gmra.mrb[8].mxu1 %vm392_vm1, %v4114_v46  ;;  %6042 = vmatmul.mubr.msk.bf16.vlgmr.msra.gmra.mrb[12].mxu0 %vm392_vm1, %v4114_v46  ;;  %v6055_v46 = vld [vmem:[%s9694_s3 + $0x818] sm:$0xff] }
 0x8d3   :  { %6514 = vmatpush3.bf16.msra.mxu0 %v8628_v54  ;;  %6536 = vmatpush3.bf16.msra.mxu1 %v8634_v0  ;;  %v7157_v54 = vld [vmem:[%s9693_s0 + $0xb0] ss:$0 sps:$4 sm:$0xff]   ;;  %v6052_v0 = vld [vmem:[%s9694_s3 + $0x800] sm:$0xff]  ;;  %v6090_v50 = vcombine.low %v6055_v46, %v6059_v48  ;;  %v6091_v51 = vcombine.high %v6055_v46, %v6059_v48  ;;  %v5008_v48 = vld [vmem:[%s9696_s5 + $0x18] sm:$0xff] }
 0x8d4   :  { %6515 = vmatprep.subr.bf16.mxu0 %v8640_v59  ;;  %6537 = vmatprep.subr.bf16.mxu1 %v8646_v1  ;;  %v6056_v59 = vld [vmem:[%s9694_s3 + $0x820] sm:$0xff] }
 0x8d5   :  { %4539 = vmatprep.mubr.bf16.mxu0 %v6047_v41  ;;  %4579 = vmatprep.mubr.bf16.mxu1 %v6049_v56  ;;  %v6084_v1 = vcombine.low %v6052_v0, %v6056_v59  ;;  %v6066_v41 = vld [vmem:[%s9694_s3 + $0x870] sm:$0xff]  ;;  %v6063_v56 = vld [vmem:[%s9694_s3 + $0x858] sm:$0xff] }
 0x8d7   :  { %6516 = vmatpush3.bf16.msra.mxu0 %v8652_v2  ;;  %6538 = vmatpush3.bf16.msra.mxu1 %v8658_v4  ;;  %v6085_v2 = vcombine.high %v6052_v0, %v6056_v59  ;;  %v6057_v4 = vld [vmem:[%s9694_s3 + $0x828] sm:$0xff]  ;;  %v6097_v0 = vcombine.high %v6062_v34, %v6066_v41 }
 0x8d8   :  { %6517 = vmatprep.subr.bf16.mxu0 %v8664_v8  ;;  %6539 = vmatprep.subr.bf16.mxu1 %v8670_v9  ;;  %v6060_v8 = vld [vmem:[%s9694_s3 + $0x840] sm:$0xff] }
 0x8d9   :  { %v6064_v9 = vld [vmem:[%s9694_s3 + $0x860] sm:$0xff] }
 0x8db   :  { %6518 = vmatpush3.bf16.msra.mxu0 %v8676_v10  ;;  %6540 = vmatpush3.bf16.msra.mxu1 %v8682_v11 }
 0x8dc   :  { %6519 = vmatprep.subr.bf16.mxu0 %v8688_v12  ;;  %6541 = vmatprep.subr.bf16.mxu1 %v8694_v13  ;;  %v6093_v12 = vcombine.high %v6060_v8, %v6064_v9  ;;  %v6061_v13 = vld [vmem:[%s9694_s3 + $0x848] sm:$0xff] }
 0x8df   :  { %6520 = vmatpush3.bf16.msra.mxu0 %v8700_v14  ;;  %6542 = vmatpush3.bf16.msra.mxu1 %v8706_v15  ;;  %v6065_v14 = vld [vmem:[%s9694_s3 + $0x868] sm:$0xff]  ;;  %v6068_v15 = vld [vmem:[%s9694_s3 + $0x880] sm:$0xff] }
 0x8e0   :  { %6521 = vmatprep.subr.bf16.mxu0 %v8712_v18  ;;  %6543 = vmatprep.subr.bf16.mxu1 %v8718_v19  ;;  %v6095_v18 = vcombine.high %v6061_v13, %v6065_v14  ;;  %v6072_v19 = vld [vmem:[%s9694_s3 + $0x8a0] sm:$0xff] }
 0x8e3   :  { %6522 = vmatpush3.bf16.msra.mxu0 %v8724_v20  ;;  %6544 = vmatpush3.bf16.msra.mxu1 %v8730_v21  ;;  %v6069_v20 = vld [vmem:[%s9694_s3 + $0x888] sm:$0xff] }
 0x8e4   :  { %6523 = vmatprep.subr.bf16.mxu0 %v8736_v22  ;;  %6545 = vmatprep.subr.bf16.mxu1 %v8742_v23  ;;  %v6073_v21 = vld [vmem:[%s9694_s3 + $0x8a8] sm:$0xff]  ;;  %v6092_v22 = vcombine.low %v6060_v8, %v6064_v9  ;;  %v6094_v23 = vcombine.low %v6061_v13, %v6065_v14  ;;  %v6096_v8 = vcombine.low %v6062_v34, %v6066_v41  ;;  %v6082_v13 = vld [vmem:[%s9694_s3 + $0x8f0] sm:$0xff]  ;;  %v6079_v14 = vld [vmem:[%s9694_s3 + $0x8d8] sm:$0xff] }
 0x8e5   :  { %v5059_v34 = vld [vmem:[%s9696_s5 + $0x1b0] sm:$0xff] }
 0x8e7   :  { %6524 = vmatpush3.bf16.msra.mxu0 %v8748_v17  ;;  %6546 = vmatpush3.bf16.msra.mxu1 %v8754_v7  ;;  %v6101_v17 = vcombine.high %v6068_v15, %v6072_v19  ;;  %v6103_v7 = vcombine.high %v6069_v20, %v6073_v21 }
 0x8e8   :  { %6525 = vmatprep.subr.bf16.mxu0 %v8760_v24  ;;  %6547 = vmatprep.subr.bf16.mxu1 %v8766_v25  ;;  %v6100_v24 = vcombine.low %v6068_v15, %v6072_v19  ;;  %v6102_v25 = vcombine.low %v6069_v20, %v6073_v21  ;;  %v6083_v15 = vld [vmem:[%s9694_s3 + $0x8f8] sm:$0xff] }
 0x8e9   :  { %v6115_v21 = vcombine.high %v6079_v14, %v6083_v15 }
 0x8eb   :  { %6526 = vmatpush3.bf16.msra.mxu0 %v8772_v28  ;;  %6548 = vmatpush3.bf16.msra.mxu1 %v8778_v29  ;;  %v6076_v28 = vld [vmem:[%s9694_s3 + $0x8c0] sm:$0xff] }
 0x8ec   :  { %6527 = vmatprep.subr.bf16.mxu0 %v8784_v43  ;;  %6549 = vmatprep.subr.bf16.mxu1 %v8790_v3  ;;  %v6080_v29 = vld [vmem:[%s9694_s3 + $0x8e0] sm:$0xff]  ;;  %v6077_v43 = vld [vmem:[%s9694_s3 + $0x8c8] sm:$0xff] }
 0x8ed   :  { %v6109_v3 = vcombine.high %v6076_v28, %v6080_v29 }
 0x8ef   :  { %6528 = vmatpush3.bf16.msra.mxu0 %v8800_v16  ;;  %6550 = vmatpush3.bf16.msra.mxu1 %v8806_v26  ;;  %v6081_v16 = vld [vmem:[%s9694_s3 + $0x8e8] sm:$0xff]  ;;  %v6108_v26 = vcombine.low %v6076_v28, %v6080_v29 }
 0x8f0   :  { %6798 = vmatprep.subr.bf16.mxu0 %v7232_v35  ;;  %4825 = vmatprep.subr.bf16.mxu1 %v6085_v2  ;;  %v6071_v2 = vld [vmem:[%s9694_s3 + $0x898] sm:$0xff]  ;;  %v5006_v28 = vld [vmem:[%s9696_s5 + $0x8] sm:$0xff] }
 0x8f2   :  { %4540 = vmatmul.mubr.bf16.vlgmr.msra.gmra.mrb[56].mxu0 %v6046_v33  ;;  %4580 = vmatmul.mubr.bf16.vlgmr.msra.gmra.mrb[56].mxu1 %v6048_v36 }
 0x8f3   :  { %6799 = vmatpush3.bf16.msra.mxu0 %v8813_v44  ;;  %6806 = vmatprep.mubr.msk.bf16.mxu0 %vm7233_vm0, %v7232_v35  ;;  %v6110_v44 = vcombine.low %v6077_v43, %v6081_v16 }
 0x8f4   :  { %6800 = vmatprep.subr.bf16.mxu0 %v7232_v35  ;;  %4857 = vmatprep.mubr.bf16.mxu1 %v7234_v57 }
 0x8f5   :  { %4826 = vmatpush1.bf16.msra.mxu1 %v6084_v1  ;;  %v6074_v1 = vld [vmem:[%s9694_s3 + $0x8b0] sm:$0xff] }
 0x8f6   :  { %4827 = vmatprep.subr.bf16.mxu1 %v6093_v12  ;;  %v6078_v12 = vld [vmem:[%s9694_s3 + $0x8d0] sm:$0xff] }
 0x8f7   :  { %6801 = vmatpush3.bf16.msra.mxu0 %v8823_v27  ;;  %v6111_v27 = vcombine.high %v6077_v43, %v6081_v16  ;;  %v6113_v20 = vcombine.high %v6078_v12, %v6082_v13  ;;  %v5038_v16 = vld [vmem:[%s9696_s5 + $0x108] sm:$0xff] }
 0x8f8   :  { %6802 = vmatprep.subr.bf16.mxu0 %v7232_v35 }
 0x8f9   :  { %4828 = vmatpush1.bf16.msra.mxu1 %v6092_v22  ;;  %v5021_v22 = vld [vmem:[%s9696_s5 + $0x80] sm:$0xff] }
 0x8fa   :  { %4829 = vmatprep.subr.bf16.mxu1 %v6101_v17  ;;  %v5054_v17 = vld [vmem:[%s9696_s5 + $0x188] sm:$0xff] }
 0x8fb   :  { %6803 = vmatpush3.bf16.msra.mxu0 %v8830_v30  ;;  %v6054_v30 = vld [vmem:[%s9694_s3 + $0x810] sm:$0xff] }
 0x8fc   :  { %6804 = vmatprep.subr.bf16.mxu0 %v7232_v35  ;;  %v6053_v35 = vld [vmem:[%s9694_s3 + $0x808] sm:$0xff] }
 0x8fd   :  { %v6086_v10 = vcombine.low %v6053_v35, %v6057_v4  ;;  %v6087_v11 = vcombine.high %v6053_v35, %v6057_v4  ;;  %4830 = vmatpush1.bf16.msra.mxu1 %v6100_v24  ;;  %v6070_v35 = vld [vmem:[%s9694_s3 + $0x890] sm:$0xff]  ;;  %v6075_v4 = vld [vmem:[%s9694_s3 + $0x8b8] sm:$0xff]  ;;  %v6114_v24 = vcombine.low %v6079_v14, %v6083_v15  ;;  %v5045_v14 = vld [vmem:[%s9696_s5 + $0x140] sm:$0xff] }
 0x8fe   :  { %4831 = vmatprep.subr.bf16.mxu1 %v6109_v3  ;;  %v6106_v19 = vcombine.low %v6071_v2, %v6075_v4  ;;  %v5037_v3 = vld [vmem:[%s9696_s5 + $0x100] sm:$0xff]  ;;  %v5046_v15 = vld [vmem:[%s9696_s5 + $0x148] sm:$0xff] }
 0x8ff   :  { %6805 = vmatpush3.bf16.msra.mxu0 %v8840_v39  ;;  %v6058_v39 = vld [vmem:[%s9694_s3 + $0x830] sm:$0xff]  ;;  %v6844_v46 = vpack.c.bf16 %v5038_v16, %v5037_v3  ;;  %v5065_v3 = vld [vmem:[%s9696_s5 + $0x1e0] sm:$0xff]  ;;  %v5066_v16 = vld [vmem:[%s9696_s5 + $0x1e8] sm:$0xff] }
 0x900   :  { %4866 = vmatprep.subr.bf16.mxu0 %v6087_v11  ;;  %v6089_v47 = vcombine.high %v6054_v30, %v6058_v39  ;;  %v6088_v49 = vcombine.low %v6054_v30, %v6058_v39  ;;  %v6107_v11 = vcombine.high %v6071_v2, %v6075_v4  ;;  %v5056_v30 = vld [vmem:[%s9696_s5 + $0x198] sm:$0xff]  ;;  %v5061_v2 = vld [vmem:[%s9696_s5 + $0x1c0] sm:$0xff]  ;;  %v5062_v4 = vld [vmem:[%s9696_s5 + $0x1c8] sm:$0xff] }
 0x901   :  { %4832 = vmatpush1.bf16.msra.mxu1 %v6108_v26  ;;  %v5023_v26 = vld [vmem:[%s9696_s5 + $0x90] sm:$0xff] }
 0x902   :  { %6807 = vmatmul.mubr.msk.bf16.vlgmr.msra.gmra.mrb[60].mxu0 %vm392_vm1, %v7157_v54  ;;  %4907 = vmatprep.subr.bf16.mxu1 %v6089_v47  ;;  %v5007_v47 = vld [vmem:[%s9696_s5 + $0x10] sm:$0xff] }
 0x903   :  { %4898 = vmatprep.mubr.bf16.mxu0 %v7234_v57  ;;  %4867 = vmatpush1.bf16.msra.mxu0 %v6086_v10  ;;  %v6105_v10 = vcombine.high %v6070_v35, %v6074_v1 }
 0x904   :  { %4868 = vmatprep.subr.bf16.mxu0 %v6095_v18  ;;  %v6104_v18 = vcombine.low %v6070_v35, %v6074_v1  ;;  %v5029_v35 = vld [vmem:[%s9696_s5 + $0xc0] sm:$0xff]  ;;  %v5030_v1 = vld [vmem:[%s9696_s5 + $0xc8] sm:$0xff] }
 0x907   :  { %4869 = vmatpush1.bf16.msra.mxu0 %v6094_v23  ;;  %v5022_v23 = vld [vmem:[%s9696_s5 + $0x88] sm:$0xff] }
 0x908   :  { %4870 = vmatprep.subr.bf16.mxu0 %v6103_v7  ;;  %v6112_v7 = vcombine.low %v6078_v12, %v6082_v13  ;;  %v6810_v29 = vpack.c.bf16 %v5022_v23, %v5021_v22  ;;  %v6826_v12 = vpack.c.bf16 %v5030_v1, %v5029_v35  ;;  %v6858_v13 = vpack.c.bf16 %v5062_v4, %v5061_v2 }
 0x909   :  { %v6860_v23 = vpack.c.bf16 %v5046_v15, %v5045_v14  ;;  %v5101_v15 = vld [vmem:[%s9696_s5 + $0x300] sm:$0xff] }
 0x90b   :  { %4871 = vmatpush1.bf16.msra.mxu0 %v6102_v25  ;;  %v5005_v25 = vld [vmem:[%s9696_s5] sm:$0xff] }
 0x90c   :  { %4872 = vmatprep.subr.bf16.mxu0 %v6111_v27  ;;  %v5055_v27 = vld [vmem:[%s9696_s5 + $0x190] sm:$0xff]  ;;  %v6812_v39 = vpack.c.bf16 %v5006_v28, %v5005_v25  ;;  %v5048_v28 = vld [vmem:[%s9696_s5 + $0x158] sm:$0xff] }
 0x90d   :  { %v5047_v25 = vld [vmem:[%s9696_s5 + $0x150] sm:$0xff] }
 0x90f   :  { %4873 = vmatpush1.bf16.msra.mxu0 %v6110_v44  ;;  %v5024_v44 = vld [vmem:[%s9696_s5 + $0x98] sm:$0xff] }
 0x910   :  { %4948 = vmatprep.subr.bf16.mxu0 %v6091_v51  ;;  %v5039_v51 = vld [vmem:[%s9696_s5 + $0x110] sm:$0xff] }
 0x9c5   :  { %v6529_v52 = vpop.f32.mrb[56].mxu0  ;;  %v6551_v53 = vpop.f32.mrb[56].mxu1 }
 0x9c6   :  { %v6530_v60 = vpop.f32.mrb[57].mxu0  ;;  %v6552_v61 = vpop.f32.mrb[57].mxu1 }
 0x9c7   :  { %v6531_v62 = vadd.f32 %v6530_v60, %v6529_v52  ;;  %v6532_v63 = vpop.f32.mrb[58].mxu0  ;;  %v6553_v55 = vadd.f32 %v6552_v61, %v6551_v53  ;;  %v6554_v45 = vpop.f32.mrb[58].mxu1  ;;  %v5040_v52 = vld [vmem:[%s9696_s5 + $0x118] sm:$0xff]  ;;  %v5025_v53 = vld [vmem:[%s9696_s5 + $0xa0] sm:$0xff]  ;;  %v5026_v60 = vld [vmem:[%s9696_s5 + $0xa8] sm:$0xff] }
 0x9c8   :  { %v6533_v58 = vpop.f32.mrb[59].mxu0  ;;  %v6555_v42 = vpop.f32.mrb[59].mxu1  ;;  %v5057_v61 = vld [vmem:[%s9696_s5 + $0x1a0] sm:$0xff]  ;;  %v6816_v63 = vpack.c.bf16 %v5008_v48, %v5007_v47  ;;  %v5050_v48 = vld [vmem:[%s9696_s5 + $0x168] sm:$0xff] }
 0x9c9   :  { %v4542_v31 = vadd.f32 %v8908_v6, %v6531_v62  ;;  %v6067_v6 = vld [vmem:[%s9694_s3 + $0x878] sm:$0xff]  ;;  %v5058_v62 = vld [vmem:[%s9696_s5 + $0x1a8] sm:$0xff]  ;;  %v5009_v45 = vld [vmem:[%s9696_s5 + $0x20] sm:$0xff]  ;;  %v6818_v42 = vpack.c.bf16 %v5026_v60, %v5025_v53 }
 0x9ca   :  { %v6099_v59 = vcombine.high %v6063_v56, %v6067_v6  ;;  %v6098_v9 = vcombine.low %v6063_v56, %v6067_v6  ;;  %v5010_v58 = vld [vmem:[%s9696_s5 + $0x28] sm:$0xff]  ;;  %v5011_v6 = vld [vmem:[%s9696_s5 + $0x30] sm:$0xff]  ;;  %v5049_v47 = vld [vmem:[%s9696_s5 + $0x160] sm:$0xff] }
 0x9cb   :  { %v4582_v32 = vadd.f32 %v6553_v55, %v4542_v31  ;;  %v6848_v55 = vpack.c.bf16 %v5040_v52, %v5039_v51  ;;  %v6850_v31 = vpack.c.bf16 %v5058_v62, %v5057_v61  ;;  %v6820_v41 = vpack.c.bf16 %v5010_v58, %v5009_v45  ;;  %v5035_v51 = vld [vmem:[%s9696_s5 + $0xf0] sm:$0xff]  ;;  %v5036_v52 = vld [vmem:[%s9696_s5 + $0xf8] sm:$0xff] }
 0x9cc   :  { %v5067_v53 = vld [vmem:[%s9696_s5 + $0x1f0] sm:$0xff]  ;;  %v6838_v60 = vpack.c.bf16 %v5036_v52, %v5035_v51  ;;  %v5068_v61 = vld [vmem:[%s9696_s5 + $0x1f8] sm:$0xff]  ;;  %v5122_v51 = vld [vmem:[%s9696_s5 + $0x3a8] sm:$0xff] }
 0x9cd   :  { %v5019_v62 = vld [vmem:[%s9696_s5 + $0x70] sm:$0xff] }
 0x9ce   :  { %v5051_v58 = vld [vmem:[%s9696_s5 + $0x170] sm:$0xff] }
 0x9d5   :  { %v4621_v37 = vpop.f32.mrb[60].mxu0 }
 0x9d6   :  { %v4622_v38 = vadd.f32 %v4621_v37, %v4582_v32  ;;  %v6808_v5 = vpop.f32.mrb[61].mxu0  ;;  %v5041_v32 = vld [vmem:[%s9696_s5 + $0x120] sm:$0xff]  ;;  %v5042_v37 = vld [vmem:[%s9696_s5 + $0x128] sm:$0xff] }
 0x9d7   :  { %v4624_v40 = vpop.f32.mrb[62].mxu0  ;;  %v5028_v5 = vld [vmem:[%s9696_s5 + $0xb8] sm:$0xff]  ;;  %v6852_v56 = vpack.c.bf16 %v5042_v37, %v5041_v32  ;;  %v5085_v32 = vld [vmem:[%s9696_s5 + $0x280] sm:$0xff]  ;;  %v5086_v37 = vld [vmem:[%s9696_s5 + $0x288] sm:$0xff] }
 0x9d8   :  { %v4627_v33 = vmax.f32 %v4622_v38, 0.0  ;;  %v6809_v36 = vpop.f32.mrb[63].mxu0  ;;  %v5027_v38 = vld [vmem:[%s9696_s5 + $0xb0] sm:$0xff]  ;;  %v5060_v40 = vld [vmem:[%s9696_s5 + $0x1b8] sm:$0xff] }
 0x9d9   :  { %v6822_v36 = vpack.c.bf16 %v5028_v5, %v5027_v38  ;;  %v5117_v38 = vld [vmem:[%s9696_s5 + $0x380] sm:$0xff]  ;;  %v6874_v5 = vpack.c.bf16 %v5086_v37, %v5085_v32  ;;  %v5092_v32 = vld [vmem:[%s9696_s5 + $0x2b8] sm:$0xff]  ;;  %v5123_v37 = vld [vmem:[%s9696_s5 + $0x3b0] sm:$0xff] }
 0x9da   :  { %v9237_v54 = vpack.c.bf16 %v4627_v33, %v4627_v33  ;;  %v5012_v33 = vld [vmem:[%s9696_s5 + $0x38] sm:$0xff] }
 0x9dc   :  { %6116 = vmatmul.mubr.msk.bf16.vlgmr.msra.gmra.mrb[4].mxu1 %vm392_vm1, %v9237_v54  ;;  %6117 = vmatmul.mubr.msk.bf16.vlgmr.msra.gmra.mrb[8].mxu0 %vm392_vm1, %v9237_v54 }
 0x9dd   :  { %4908 = vmatpush1.bf16.msra.mxu1 %v6088_v49  ;;  %4949 = vmatpush1.bf16.msra.mxu0 %v6090_v50  ;;  %v6814_v49 = vpack.c.bf16 %v5024_v44, %v5023_v26  ;;  %v6846_v50 = vpack.c.bf16 %v5056_v30, %v5055_v27  ;;  %v6864_v44 = vpack.c.bf16 %v5048_v28, %v5047_v25  ;;  %v5017_v27 = vld [vmem:[%s9696_s5 + $0x60] sm:$0xff] }
 0x9de   :  { %4909 = vmatprep.subr.bf16.mxu1 %v6097_v0  ;;  %4950 = vmatprep.subr.bf16.mxu0 %v6099_v59  ;;  %v5043_v0 = vld [vmem:[%s9696_s5 + $0x130] sm:$0xff]  ;;  %v5044_v59 = vld [vmem:[%s9696_s5 + $0x138] sm:$0xff] }
 0x9df   :  { %4939 = vmatprep.mubr.bf16.mxu1 %v7234_v57  ;;  %4980 = vmatprep.mubr.bf16.mxu0 %v7234_v57  ;;  %v5053_v57 = vld [vmem:[%s9696_s5 + $0x180] sm:$0xff] }
 0x9e0   :  { %v6842_v43 = vpack.c.bf16 %v5054_v17, %v5053_v57  ;;  %v5015_v57 = vld [vmem:[%s9696_s5 + $0x50] sm:$0xff]  ;;  %v5016_v17 = vld [vmem:[%s9696_s5 + $0x58] sm:$0xff] }
 0x9e1   :  { %4910 = vmatpush1.bf16.msra.mxu1 %v6096_v8  ;;  %4951 = vmatpush1.bf16.msra.mxu0 %v6098_v9  ;;  %v6824_v8 = vpack.c.bf16 %v5012_v33, %v5011_v6  ;;  %v6856_v9 = vpack.c.bf16 %v5044_v59, %v5043_v0  ;;  %v6832_v26 = vpack.c.bf16 %v5016_v17, %v5015_v57  ;;  %v5088_v57 = vld [vmem:[%s9696_s5 + $0x298] sm:$0xff]  ;;  %v5119_v17 = vld [vmem:[%s9696_s5 + $0x390] sm:$0xff] }
 0x9e2   :  { %4911 = vmatprep.subr.bf16.mxu1 %v6105_v10  ;;  %4952 = vmatprep.subr.bf16.mxu0 %v6107_v11  ;;  %v5013_v10 = vld [vmem:[%s9696_s5 + $0x40] sm:$0xff]  ;;  %v5014_v11 = vld [vmem:[%s9696_s5 + $0x48] sm:$0xff] }
 0x9e3   :  { %v6828_v22 = vpack.c.bf16 %v5014_v11, %v5013_v10  ;;  %v5070_v10 = vld [vmem:[%s9696_s5 + $0x208] sm:$0xff] }
 0x9e5   :  { %4912 = vmatpush1.bf16.msra.mxu1 %v6104_v18  ;;  %4953 = vmatpush1.bf16.msra.mxu0 %v6106_v19  ;;  %v5031_v18 = vld [vmem:[%s9696_s5 + $0xd0] sm:$0xff]  ;;  %v5032_v19 = vld [vmem:[%s9696_s5 + $0xd8] sm:$0xff] }
 0x9e6   :  { %4913 = vmatprep.subr.bf16.mxu1 %v6113_v20  ;;  %4954 = vmatprep.subr.bf16.mxu0 %v6115_v21  ;;  %v5063_v20 = vld [vmem:[%s9696_s5 + $0x1d0] sm:$0xff]  ;;  %v5064_v21 = vld [vmem:[%s9696_s5 + $0x1d8] sm:$0xff] }
 0x9e9   :  { %4914 = vmatpush1.bf16.msra.mxu1 %v6112_v7  ;;  %4955 = vmatpush1.bf16.msra.mxu0 %v6114_v24  ;;  %v6830_v7 = vpack.c.bf16 %v5032_v19, %v5031_v18  ;;  %v6862_v24 = vpack.c.bf16 %v5064_v21, %v5063_v20  ;;  %v5102_v18 = vld [vmem:[%s9696_s5 + $0x308] sm:$0xff]  ;;  %v5087_v19 = vld [vmem:[%s9696_s5 + $0x290] sm:$0xff] }
 0x9ea   :  { %6811 = vmatprep.subr.bf16.mxu1 %v6810_v29  ;;  %6843 = vmatprep.subr.bf16.mxu0 %v6842_v43  ;;  %v5033_v29 = vld [vmem:[%s9696_s5 + $0xe0] sm:$0xff]  ;;  %v5034_v43 = vld [vmem:[%s9696_s5 + $0xe8] sm:$0xff] }
 0x9eb   :  { %v6834_v30 = vpack.c.bf16 %v5034_v43, %v5033_v29 }
 0x9ec   :  { %6118 = vmatmul.mubr.msk.bf16.vlgmr.msra.gmra.mrb[8].mxu1 %vm392_vm1, %v9237_v54  ;;  %6119 = vmatmul.mubr.msk.bf16.vlgmr.msra.gmra.mrb[12].mxu0 %vm392_vm1, %v9237_v54  ;;  %v6854_v54 = vpack.c.bf16 %v5060_v40, %v5059_v34  ;;  %v5118_v34 = vld [vmem:[%s9696_s5 + $0x388] sm:$0xff] }
 0x9ed   :  { %6813 = vmatpush3.bf16.msra.mxu1 %v6812_v39  ;;  %6845 = vmatpush3.bf16.msra.mxu0 %v6844_v46  ;;  %v6866_v39 = vpack.c.bf16 %v5066_v16, %v5065_v3  ;;  %v5018_v46 = vld [vmem:[%s9696_s5 + $0x68] sm:$0xff]  ;;  %v6906_v40 = vpack.c.bf16 %v5118_v34, %v5117_v38  ;;  %v6908_v3 = vpack.c.bf16 %v5102_v18, %v5101_v15  ;;  %v5071_v16 = vld [vmem:[%s9696_s5 + $0x210] sm:$0xff]  ;;  %v5124_v38 = vld [vmem:[%s9696_s5 + $0x3b8] sm:$0xff] }
 0x9ee   :  { %6815 = vmatprep.subr.bf16.mxu1 %v6814_v49  ;;  %6847 = vmatprep.subr.bf16.mxu0 %v6846_v50  ;;  %v6836_v49 = vpack.c.bf16 %v5018_v46, %v5017_v27  ;;  %v6868_v50 = vpack.c.bf16 %v5050_v48, %v5049_v47  ;;  %v5103_v46 = vld [vmem:[%s9696_s5 + $0x310] sm:$0xff]  ;;  %v5104_v47 = vld [vmem:[%s9696_s5 + $0x318] sm:$0xff]  ;;  %v5089_v48 = vld [vmem:[%s9696_s5 + $0x2a0] sm:$0xff] }
 0x9f1   :  { %6817 = vmatpush3.bf16.msra.mxu1 %v6816_v63  ;;  %6849 = vmatpush3.bf16.msra.mxu0 %v6848_v55  ;;  %v5020_v63 = vld [vmem:[%s9696_s5 + $0x78] sm:$0xff]  ;;  %v6870_v55 = vpack.c.bf16 %v5068_v61, %v5067_v53  ;;  %v6912_v53 = vpack.c.bf16 %v5104_v47, %v5103_v46  ;;  %v5074_v61 = vld [vmem:[%s9696_s5 + $0x228] sm:$0xff] }
 0x9f2   :  { %6819 = vmatprep.subr.bf16.mxu1 %v6818_v42  ;;  %6851 = vmatprep.subr.bf16.mxu0 %v6850_v31  ;;  %v6840_v45 = vpack.c.bf16 %v5020_v63, %v5019_v62  ;;  %v5052_v42 = vld [vmem:[%s9696_s5 + $0x178] sm:$0xff] }
 0x9f3   :  { %v6872_v31 = vpack.c.bf16 %v5052_v42, %v5051_v58  ;;  %v5091_v58 = vld [vmem:[%s9696_s5 + $0x2b0] sm:$0xff] }
 0x9f5   :  { %6821 = vmatpush3.bf16.msra.mxu1 %v6820_v41  ;;  %6853 = vmatpush3.bf16.msra.mxu0 %v6852_v56  ;;  %v102_v41 = vlaneseq }
 0x9f6   :  { %6823 = vmatprep.subr.bf16.mxu1 %v6822_v36  ;;  %6855 = vmatprep.subr.bf16.mxu0 %v6854_v54  ;;  %v9484_v36 = vld [vmem:[%s9697_s4] sm:$0xff] }
 0x9f7   :  { %v9477_v56 = vshrl.u32 %v102_v41, 7  ;;  %v5076_v41 = vld [vmem:[%s9696_s5 + $0x238] sm:$0xff] }
 0x9f9   :  { %6825 = vmatpush3.bf16.msra.mxu1 %v6824_v8  ;;  %6857 = vmatpush3.bf16.msra.mxu0 %v6856_v9  ;;  %v104_v6 = vsub.s32 0, %v9477_v56  ;;  %v112_v33 = vsub.s32 2, %v9477_v56  ;;  %v108_v54 = vsub.s32 1, %v9477_v56  ;;  %v116_v0 = vsub.s32 3, %v9477_v56  ;;  %v5069_v9 = vld [vmem:[%s9696_s5 + $0x200] sm:$0xff] }
 0x9fa   :  { %6827 = vmatprep.subr.bf16.mxu1 %v6826_v12  ;;  %6859 = vmatprep.subr.bf16.mxu0 %v6858_v13  ;;  %v6876_v43 = vpack.c.bf16 %v5070_v10, %v5069_v9  ;;  %v124_v42 = vsub.s32 5, %v9477_v56 }
 0x9fb   :  { %v105_v59 = vrot.slane %v9484_v36, %v104_v6  ;;  %v113_v35 = vrot.slane %v9484_v36, %v112_v33  ;;  %v109_v1 = vrot.slane %v9484_v36, %v108_v54  ;;  %v117_v2 = vrot.slane %v9484_v36, %v116_v0  ;;  %v5107_v54 = vld [vmem:[%s9696_s5 + $0x330] sm:$0xff]  ;;  %v5108_v0 = vld [vmem:[%s9696_s5 + $0x338] sm:$0xff] }
 0x9fc   :  { %v6886_v6 = vpack.c.bf16 %v5092_v32, %v5091_v58  ;;  %v6918_v33 = vpack.c.bf16 %v5124_v38, %v5123_v37  ;;  %v5114_v32 = vld [vmem:[%s9696_s5 + $0x368] sm:$0xff]  ;;  %v5099_v37 = vld [vmem:[%s9696_s5 + $0x2f0] sm:$0xff] }
 0x9fd   :  { %6829 = vmatpush3.bf16.msra.mxu1 %v6828_v22  ;;  %6861 = vmatpush3.bf16.msra.mxu0 %v6860_v23  ;;  %v5131_v38 = vld [vmem:[%s9696_s5 + $0x3f0] sm:$0xff] }
 0x9fe   :  { %6831 = vmatprep.subr.bf16.mxu1 %v6830_v7  ;;  %6863 = vmatprep.subr.bf16.mxu0 %v6862_v24  ;;  %v5120_v7 = vld [vmem:[%s9696_s5 + $0x398] sm:$0xff] }
 0xa01   :  { %6833 = vmatpush3.bf16.msra.mxu1 %v6832_v26  ;;  %6865 = vmatpush3.bf16.msra.mxu0 %v6864_v44  ;;  %v5072_v26 = vld [vmem:[%s9696_s5 + $0x218] sm:$0xff] }
 0xa02   :  { %6835 = vmatprep.subr.bf16.mxu1 %v6834_v30  ;;  %6867 = vmatprep.subr.bf16.mxu0 %v6866_v39  ;;  %v6878_v30 = vpack.c.bf16 %v5088_v57, %v5087_v19  ;;  %v6910_v39 = vpack.c.bf16 %v5120_v7, %v5119_v17  ;;  %v6880_v52 = vpack.c.bf16 %v5072_v26, %v5071_v16 }
 0xa05   :  { %6837 = vmatpush3.bf16.msra.mxu1 %v6836_v49  ;;  %6869 = vmatpush3.bf16.msra.mxu0 %v6868_v50  ;;  %v5090_v49 = vld [vmem:[%s9696_s5 + $0x2a8] sm:$0xff]  ;;  %v5121_v50 = vld [vmem:[%s9696_s5 + $0x3a0] sm:$0xff] }
 0xa06   :  { %6839 = vmatprep.subr.bf16.mxu1 %v6838_v60  ;;  %6871 = vmatprep.subr.bf16.mxu0 %v6870_v55  ;;  %v5073_v60 = vld [vmem:[%s9696_s5 + $0x220] sm:$0xff]  ;;  %v6882_v62 = vpack.c.bf16 %v5090_v49, %v5089_v48  ;;  %v6914_v63 = vpack.c.bf16 %v5122_v51, %v5121_v50  ;;  %v5111_v48 = vld [vmem:[%s9696_s5 + $0x350] sm:$0xff]  ;;  %v5112_v49 = vld [vmem:[%s9696_s5 + $0x358] sm:$0xff] }
 0xa07   :  { %v5105_v55 = vld [vmem:[%s9696_s5 + $0x320] sm:$0xff]  ;;  %v5098_v51 = vld [vmem:[%s9696_s5 + $0x2e8] sm:$0xff] }
 0xa08   :  { %v5097_v50 = vld [vmem:[%s9696_s5 + $0x2e0] sm:$0xff] }
 0xa09   :  { %6841 = vmatpush3.bf16.msra.mxu1 %v6840_v45  ;;  %6873 = vmatpush3.bf16.msra.mxu0 %v6872_v31  ;;  %v5106_v45 = vld [vmem:[%s9696_s5 + $0x328] sm:$0xff]  ;;  %v132_v31 = vsub.s32 7, %v9477_v56  ;;  %v6898_v58 = vpack.c.bf16 %v5098_v51, %v5097_v50 }
 0xa0a   :  { %6875 = vmatprep.subr.bf16.mxu1 %v6874_v5  ;;  %6907 = vmatprep.subr.bf16.mxu0 %v6906_v40  ;;  %v6884_v5 = vpack.c.bf16 %v5074_v61, %v5073_v60  ;;  %v6916_v34 = vpack.c.bf16 %v5106_v45, %v5105_v55  ;;  %v5075_v40 = vld [vmem:[%s9696_s5 + $0x230] sm:$0xff]  ;;  %v120_v60 = vsub.s32 4, %v9477_v56  ;;  %v5082_v55 = vld [vmem:[%s9696_s5 + $0x268] sm:$0xff]  ;;  %v128_v45 = vsub.s32 6, %v9477_v56  ;;  %v5100_v56 = vld [vmem:[%s9696_s5 + $0x2f8] sm:$0xff] }
 0xaaf   :  { %v4859_v4 = vpop.f32.mrb[4].mxu1  ;;  %v4900_v8 = vpop.f32.mrb[8].mxu0 }
 0xab0   :  { %v6938_v11 = vadd.f32 %v4859_v4, %v105_v59  ;;  %v6940_v12 = vadd.f32 %v4900_v8, %v113_v35  ;;  %v4861_v13 = vpop.f32.mrb[5].mxu1  ;;  %v4902_v14 = vpop.f32.mrb[9].mxu0  ;;  %v5093_v59 = vld [vmem:[%s9696_s5 + $0x2c0] sm:$0xff]  ;;  %v125_v35 = vrot.slane %v9484_v36, %v124_v42  ;;  %v5126_v8 = vld [vmem:[%s9696_s5 + $0x3c8] sm:$0xff] }
 0xab1   :  { %v6939_v20 = vadd.f32 %v4861_v13, %v109_v1  ;;  %v6941_v21 = vadd.f32 %v4902_v14, %v117_v2  ;;  %v4863_v22 = vpop.f32.mrb[6].mxu1  ;;  %v4904_v23 = vpop.f32.mrb[10].mxu0  ;;  %v133_v1 = vrot.slane %v9484_v36, %v132_v31  ;;  %v5094_v2 = vld [vmem:[%s9696_s5 + $0x2c8] sm:$0xff]  ;;  %v5125_v4 = vld [vmem:[%s9696_s5 + $0x3c0] sm:$0xff] }
 0xab2   :  { %v4864_v24 = vpop.f32.mrb[7].mxu1  ;;  %v4905_v25 = vpop.f32.mrb[11].mxu0  ;;  %v4997_v44 = vmax.f32 %v6938_v11, 0.0  ;;  %v4999_v27 = vmax.f32 %v6940_v12, 0.0  ;;  %v6888_v11 = vpack.c.bf16 %v5076_v41, %v5075_v40  ;;  %v6920_v12 = vpack.c.bf16 %v5108_v0, %v5107_v54  ;;  %v5077_v13 = vld [vmem:[%s9696_s5 + $0x240] sm:$0xff]  ;;  %v5078_v14 = vld [vmem:[%s9696_s5 + $0x248] sm:$0xff] }
 0xab3   :  { %v4998_v28 = vmax.f32 %v6939_v20, 0.0  ;;  %v5000_v29 = vmax.f32 %v6941_v21, 0.0  ;;  %v6890_v19 = vpack.c.bf16 %v5094_v2, %v5093_v59  ;;  %v6922_v20 = vpack.c.bf16 %v5126_v8, %v5125_v4  ;;  %v5109_v21 = vld [vmem:[%s9696_s5 + $0x340] sm:$0xff]  ;;  %v5110_v22 = vld [vmem:[%s9696_s5 + $0x348] sm:$0xff]  ;;  %v5095_v23 = vld [vmem:[%s9696_s5 + $0x2d0] sm:$0xff] }
 0xab4   :  { %v5096_v25 = vld [vmem:[%s9696_s5 + $0x2d8] sm:$0xff]  ;;  %v5113_v31 = vld [vmem:[%s9696_s5 + $0x360] sm:$0xff]  ;;  %v6902_v54 = vpack.c.bf16 %v5100_v56, %v5099_v37 }
 0xab5   :  { %5204 = vmatprep.mubr.f32.mxu1 %v4998_v28  ;;  %5274 = vmatprep.mubr.f32.mxu0 %v5000_v29  ;;  %v5127_v28 = vld [vmem:[%s9696_s5 + $0x3d0] sm:$0xff]  ;;  %v5128_v29 = vld [vmem:[%s9696_s5 + $0x3d8] sm:$0xff]  ;;  %v6894_v46 = vpack.c.bf16 %v5096_v25, %v5095_v23  ;;  %v6932_v41 = vpack.c.bf16 %v5114_v32, %v5113_v31 }
 0xab6   :  { %5205 = vmatmul.mubr.f32.vlgmr.msra.gmra.mrb[60].mxu1 %v4997_v44  ;;  %5275 = vmatmul.mubr.f32.vlgmr.msra.gmra.mrb[64].mxu0 %v4999_v27  ;;  %v6892_v44 = vpack.c.bf16 %v5078_v14, %v5077_v13  ;;  %v6924_v27 = vpack.c.bf16 %v5110_v22, %v5109_v21  ;;  %v6926_v47 = vpack.c.bf16 %v5128_v29, %v5127_v28  ;;  %v5084_v59 = vld [vmem:[%s9696_s5 + $0x278] sm:$0xff] }
 0xab7   :  { %6877 = vmatpush3.bf16.msra.mxu1 %v6876_v43  ;;  %6909 = vmatpush3.bf16.msra.mxu0 %v6908_v3 }
 0xab8   :  { %6879 = vmatprep.subr.bf16.mxu1 %v6878_v30  ;;  %6911 = vmatprep.subr.bf16.mxu0 %v6910_v39  ;;  %v5079_v30 = vld [vmem:[%s9696_s5 + $0x250] sm:$0xff]  ;;  %v5080_v39 = vld [vmem:[%s9696_s5 + $0x258] sm:$0xff] }
 0xab9   :  { %v6896_v61 = vpack.c.bf16 %v5080_v39, %v5079_v30 }
 0xabb   :  { %6881 = vmatpush3.bf16.msra.mxu1 %v6880_v52  ;;  %6913 = vmatpush3.bf16.msra.mxu0 %v6912_v53  ;;  %v5129_v52 = vld [vmem:[%s9696_s5 + $0x3e0] sm:$0xff]  ;;  %v5130_v53 = vld [vmem:[%s9696_s5 + $0x3e8] sm:$0xff] }
 0xabc   :  { %6883 = vmatprep.subr.bf16.mxu1 %v6882_v62  ;;  %6915 = vmatprep.subr.bf16.mxu0 %v6914_v63  ;;  %v6928_v62 = vpack.c.bf16 %v5112_v49, %v5111_v48  ;;  %v5081_v63 = vld [vmem:[%s9696_s5 + $0x260] sm:$0xff]  ;;  %v6930_v42 = vpack.c.bf16 %v5130_v53, %v5129_v52 }
 0xabd   :  { %v6900_v40 = vpack.c.bf16 %v5082_v55, %v5081_v63 }
 0xabf   :  { %v9592_v9 = vpop.f32.mrb[8].mxu1  ;;  %v9594_v10 = vpop.f32.mrb[12].mxu0  ;;  %6885 = vmatpush3.bf16.msra.mxu1 %v6884_v5  ;;  %6917 = vmatpush3.bf16.msra.mxu0 %v6916_v34  ;;  %v5132_v5 = vld [vmem:[%s9696_s5 + $0x3f8] sm:$0xff]  ;;  %v121_v34 = vrot.slane %v9484_v36, %v120_v60 }
 0xac0   :  { %v4943_v15 = vpop.f32.mrb[9].mxu1  ;;  %v4984_v18 = vpop.f32.mrb[13].mxu0  ;;  %6887 = vmatprep.subr.bf16.mxu1 %v6886_v6  ;;  %6919 = vmatprep.subr.bf16.mxu0 %v6918_v33  ;;  %v5083_v6 = vld [vmem:[%s9696_s5 + $0x270] sm:$0xff]  ;;  %v129_v33 = vrot.slane %v9484_v36, %v128_v45  ;;  %v6934_v0 = vpack.c.bf16 %v5132_v5, %v5131_v38 }
 0xac1   :  { %v6943_v57 = vadd.f32 %v4943_v15, %v125_v35  ;;  %v6945_v17 = vadd.f32 %v4984_v18, %v133_v1  ;;  %v4945_v7 = vpop.f32.mrb[10].mxu1  ;;  %v4986_v24 = vpop.f32.mrb[14].mxu0  ;;  %v5115_v35 = vld [vmem:[%s9696_s5 + $0x370] sm:$0xff]  ;;  %v5116_v1 = vld [vmem:[%s9696_s5 + $0x378] sm:$0xff]  ;;  %v6904_v2 = vpack.c.bf16 %v5084_v59, %v5083_v6  ;;  %v6942_v4 = vadd.f32 %v9592_v9, %v121_v34  ;;  %v6120_v15 = vld [vmem:[%s9698_s6] ss:$0 sm:$0xff] }
 0xac2   :  { %v4946_v43 = vpop.f32.mrb[11].mxu1  ;;  %v4987_v3 = vpop.f32.mrb[15].mxu0  ;;  %v6936_v36 = vpack.c.bf16 %v5116_v1, %v5115_v35  ;;  %v6944_v8 = vadd.f32 %v9594_v10, %v129_v33 }
 0xac3   :  { %v5002_v16 = vmax.f32 %v6943_v57, 0.0  ;;  %v5004_v26 = vmax.f32 %v6945_v17, 0.0  ;;  %6889 = vmatpush3.bf16.msra.mxu1 %v6888_v11  ;;  %6921 = vmatpush3.bf16.msra.mxu0 %v6920_v12  ;;  %v5001_v11 = vmax.f32 %v6942_v4, 0.0 }
 0xac4   :  { %6891 = vmatprep.subr.bf16.mxu1 %v6890_v19  ;;  %6923 = vmatprep.subr.bf16.mxu0 %v6922_v20  ;;  %v5003_v12 = vmax.f32 %v6944_v8, 0.0 }
 0xac5   :  { %5344 = vmatprep.mubr.f32.mxu1 %v5002_v16  ;;  %5414 = vmatprep.mubr.f32.mxu0 %v5004_v26 }
 0xac7   :  { %6893 = vmatpush3.bf16.msra.mxu1 %v6892_v44  ;;  %6925 = vmatpush3.bf16.msra.mxu0 %v6924_v27 }
 0xac8   :  { %6895 = vmatprep.subr.bf16.mxu1 %v6894_v46  ;;  %6927 = vmatprep.subr.bf16.mxu0 %v6926_v47 }
 0xacb   :  { %6897 = vmatpush3.bf16.msra.mxu1 %v6896_v61  ;;  %6929 = vmatpush3.bf16.msra.mxu0 %v6928_v62 }
 0xacc   :  { %6899 = vmatprep.subr.bf16.mxu1 %v6898_v58  ;;  %6931 = vmatprep.subr.bf16.mxu0 %v6930_v42 }
 0xacf   :  { %6901 = vmatpush3.bf16.msra.mxu1 %v6900_v40  ;;  %6933 = vmatpush3.bf16.msra.mxu0 %v6932_v41 }
 0xad0   :  { %6903 = vmatprep.subr.bf16.mxu1 %v6902_v54  ;;  %6935 = vmatprep.subr.bf16.mxu0 %v6934_v0 }
 0xad3   :  { %6905 = vmatpush3.bf16.msra.mxu1 %v6904_v2  ;;  %6937 = vmatpush3.bf16.msra.mxu0 %v6936_v36 }
 0xad6   :  { %5345 = vmatmul.mubr.f32.vlgmr.msra.gmra.mrb[62].mxu1 %v5001_v11  ;;  %5415 = vmatmul.mubr.f32.vlgmr.msra.gmra.mrb[66].mxu0 %v5003_v12 }
 0xb89   :  { %v6594_v13 = vpop.f32.mrb[60].mxu1  ;;  %v6629_v14 = vpop.f32.mrb[64].mxu0 }
 0xb8a   :  { %v6595_v18 = vpop.f32.mrb[61].mxu1  ;;  %v6630_v19 = vpop.f32.mrb[65].mxu0 }
 0xb8b   :  { %v6596_v20 = vadd.f32 %v6595_v18, %v6594_v13  ;;  %v6631_v9 = vadd.f32 %v6630_v19, %v6629_v14 }
 0xb8d   :  { %v5207_v21 = vadd.f32 %v6596_v20, %v6120_v15 }
 0xb8f   :  { %v5277_v10 = vadd.f32 %v6631_v9, %v5207_v21 }
 0xba9   :  { %v6664_v22 = vpop.f32.mrb[62].mxu1  ;;  %v6699_v23 = vpop.f32.mrb[66].mxu0 }
 0xbaa   :  { %v6665_v57 = vpop.f32.mrb[63].mxu1  ;;  %v6700_v17 = vpop.f32.mrb[67].mxu0 }
 0xbab   :  { %v6666_v7 = vadd.f32 %v6665_v57, %v6664_v22  ;;  %v6701_v24 = vadd.f32 %v6700_v17, %v6699_v23 }
 0xbad   :  { %v5347_v25 = vadd.f32 %v6666_v7, %v5277_v10 }
 0xbaf   :  { %v5417_v28 = vadd.f32 %v6701_v24, %v5347_v25 }
 0xbb1   :  { %5420 = vst [vmem:[%s9699_s7] sm:$0xff] %v5417_v28 }

</bundles_post_ra>
